<compile_context>
chip_gen: v6e
topology: v6e:2x2x1
jax: 0.10.0
libtpu: 0.0.40
codegen_flags: <defaults>
</compile_context>

<pallas_src>
import functools
import math

import jax
import jax.numpy as jnp
from jax import lax
from jax.experimental import pallas as pl
from jax.experimental.pallas import tpu as pltpu

N_HEAD = 8
LN_EPS = 1e-5


# ----------------------------- in-kernel helpers -----------------------------
def _layer_norm(x, g, b):
    mu = jnp.mean(x, axis=-1, keepdims=True)
    var = jnp.mean(jnp.square(x - mu), axis=-1, keepdims=True)
    return (x - mu) * lax.rsqrt(var + LN_EPS) * g + b


def _gelu_new(x):
    return 0.5 * x * (1.0 + jnp.tanh(
        math.sqrt(2.0 / math.pi) * (x + 0.044715 * x * x * x)))


# ------------------ fused (step x layer) GPT-2 transformer kernel ------------------
def fused_transformer_kernel(inj_ref, bias_ref,
                             ln1g_ref, ln1b_ref, wqkv_ref, bqkv_ref,
                             wproj_ref, bproj_ref, ln2g_ref, ln2b_ref,
                             wfc_ref, bfc_ref, wfc2_ref, bfc2_ref,
                             lnfg_ref, lnfb_ref,
                             hout_ref,
                             x_scr, hstate_scr,
                             *, n_head, batch, seq):
    s_id = pl.program_id(0)
    l_id = pl.program_id(1)
    n_step = pl.num_programs(0)
    n_layer = pl.num_programs(1)
    bf16 = jnp.bfloat16

    # --- injection at the start of every step: h = hidden_state + (emb + wpe[0]) ---
    @pl.when(l_id == 0)
    def _():
        inj = inj_ref[...]

        @pl.when(s_id == 0)
        def _():
            x_scr[...] = inj                      # hidden_state starts at zero

        @pl.when(s_id > 0)
        def _():
            x_scr[...] = hstate_scr[...] + inj    # carry is post-ln_f (HF semantics)

    x = x_scr[...]                                # (B*S, D) f32
    BS, D = x.shape
    B, S, H = batch, seq, n_head
    Dh = D // H
    scale = 1.0 / math.sqrt(Dh)

    # --- attention sub-block ---
    h1 = _layer_norm(x, ln1g_ref[0], ln1b_ref[0])
    qkv = jnp.dot(h1.astype(bf16), wqkv_ref[0],
                  preferred_element_type=jnp.float32) + bqkv_ref[0]    # (BS, 3D)
    qkv3 = qkv.reshape(B, S, 3 * D)

    def heads(off):
        # (B, S, D) slice of qkv -> (H*B, S, Dh); batch stays separate from sequence.
        return jnp.stack(
            [qkv3[:, :, off + h * Dh: off + (h + 1) * Dh] for h in range(H)],
            axis=0).reshape(H * B, S, Dh)

    q = heads(0)
    k = heads(D)
    v = heads(2 * D)

    # per-(head, batch) scores with a plain causal bias (hoisted, additive)
    scores = jnp.einsum('nqd,nkd->nqk', q.astype(bf16), k.astype(bf16),
                        preferred_element_type=jnp.float32)            # (H*B, S, S)
    scores = scores * scale + bias_ref[...][None]
    scores = scores - jnp.max(scores, axis=-1, keepdims=True)
    p = jnp.exp(scores)
    p = p * pl.reciprocal(jnp.sum(p, axis=-1, keepdims=True), approx=True)

    ctx = jnp.einsum('nqk,nkd->nqd', p.astype(bf16), v.astype(bf16),
                     preferred_element_type=jnp.float32)                # (H*B, S, Dh)

    # merge heads back to (B*S, D) and do ONE full-K projection matmul
    ctx4 = ctx.reshape(H, B, S, Dh)
    merged = jnp.concatenate([ctx4[h] for h in range(H)], axis=-1)      # (B, S, D)
    merged = merged.reshape(BS, D)
    a = jnp.dot(merged.astype(bf16), wproj_ref[0],
                preferred_element_type=jnp.float32) + bproj_ref[0]
    x = x + a

    # --- MLP sub-block ---
    h2 = _layer_norm(x, ln2g_ref[0], ln2b_ref[0])
    f = jnp.dot(h2.astype(bf16), wfc_ref[0],
                preferred_element_type=jnp.float32) + bfc_ref[0]
    g = _gelu_new(f)
    m = jnp.dot(g.astype(bf16), wfc2_ref[0],
                preferred_element_type=jnp.float32) + bfc2_ref[0]
    x = x + m

    x_scr[...] = x

    # --- final LayerNorm (ln_f) after the last layer of this step ---
    @pl.when(l_id == n_layer - 1)
    def _():
        hn = _layer_norm(x, lnfg_ref[...], lnfb_ref[...])
        hstate_scr[...] = hn                      # carried into next step's injection

        @pl.when(s_id == n_step - 1)
        def _():
            hout_ref[...] = hn.astype(hout_ref.dtype)


def fused_transformer(inj, mask_bias, params, batch, seq, step):
    """Run `step` iterations of (injection -> depth GPT-2 blocks -> ln_f).

    inj: (B*S, D) = input_emb + wpe[0].  Returns the final ln_f output (B*S, D)."""
    BS, D = inj.shape
    layers = params['layers']
    L = len(layers)
    H = N_HEAD
    bf16 = jnp.bfloat16

    def stack(name, cast=None):
        w = jnp.stack([lp[name] for lp in layers], axis=0)
        return w.astype(cast) if cast is not None else w

    ln1_g = stack('ln1_g');             ln1_b = stack('ln1_b')
    w_qkv = stack('w_qkv', bf16);       b_qkv = stack('b_qkv')
    w_proj = stack('w_proj', bf16);     b_proj = stack('b_proj')
    ln2_g = stack('ln2_g');             ln2_b = stack('ln2_b')
    w_fc = stack('w_fc', bf16);         b_fc = stack('b_fc')
    w_fc2 = stack('w_fc2', bf16);       b_fc2 = stack('b_fc2')
    lnf_g = params['lnf_g'];            lnf_b = params['lnf_b']

    per_layer = [ln1_g, ln1_b, w_qkv, b_qkv, w_proj, b_proj, ln2_g, ln2_b,
                 w_fc, b_fc, w_fc2, b_fc2]

    def layer_spec(arr):
        rest = arr.ndim - 1
        return pl.BlockSpec((1,) + arr.shape[1:],
                            lambda s, l, _r=rest: (l,) + (0,) * _r)

    def const_spec(arr):
        nd = arr.ndim
        return pl.BlockSpec(arr.shape, lambda s, l, _nd=nd: (0,) * _nd)

    in_specs = ([const_spec(inj), const_spec(mask_bias)]
                + [layer_spec(w) for w in per_layer]
                + [const_spec(lnf_g), const_spec(lnf_b)])

    grid_spec = pltpu.PrefetchScalarGridSpec(
        num_scalar_prefetch=0,
        grid=(step, L),                               # step outer, layer inner
        in_specs=in_specs,
        out_specs=pl.BlockSpec((BS, D), lambda s, l: (0, 0)),
        scratch_shapes=[pltpu.VMEM((BS, D), jnp.float32),    # working activation
                        pltpu.VMEM((BS, D), jnp.float32)],   # post-ln_f hidden carry
    )
    return pl.pallas_call(
        functools.partial(fused_transformer_kernel, n_head=H, batch=batch, seq=seq),
        out_shape=jax.ShapeDtypeStruct((BS, D), jnp.float32),
        grid_spec=grid_spec,
        compiler_params=pltpu.CompilerParams(
            dimension_semantics=("arbitrary", "arbitrary")),   # sequential step/layer deps
    )(inj, mask_bias, *per_layer, lnf_g, lnf_b)


# ------------------------- tied LM-head kernel (row x vocab tiled) ---------------------
def lm_head_kernel(h_ref, wte_ref, out_ref):
    h = h_ref[...].astype(jnp.bfloat16)                      # (tm, D)
    out_ref[...] = lax.dot_general(h, wte_ref[...], (((1,), (1,)), ((), ())),
                                   preferred_element_type=jnp.float32)


def lm_head(h, wte):
    """logits = h @ wte^T with vocab padded to a multiple of 128 and (row, vocab) tiling.

    Returns (R, Vp) f32 logits (padded vocab columns are 0 because wte padding is 0)."""
    R, D = h.shape
    V = wte.shape[0]
    Vp = ((V + 127) // 128) * 128
    tv = min(Vp, 2048)
    while Vp % tv:
        tv -= 128
    tm = min(((R + 7) // 8) * 8, 256)
    Rp = ((R + tm - 1) // tm) * tm

    h_p = h if Rp == R else jnp.zeros((Rp, D), h.dtype).at[:R, :].set(h)
    wte_b = wte.astype(jnp.bfloat16)
    wte_p = wte_b if Vp == V else jnp.zeros((Vp, D), jnp.bfloat16).at[:V, :].set(wte_b)

    out = pl.pallas_call(
        lm_head_kernel,
        out_shape=jax.ShapeDtypeStruct((Rp, Vp), jnp.float32),
        grid=(Rp // tm, Vp // tv),
        in_specs=[pl.BlockSpec((tm, D), lambda r, v: (r, 0)),
                  pl.BlockSpec((tv, D), lambda r, v: (v, 0))],
        out_specs=pl.BlockSpec((tm, tv), lambda r, v: (r, v)),
        compiler_params=pltpu.CompilerParams(
            dimension_semantics=("parallel", "parallel")),
    )(h_p, wte_p)
    return out[:R] if Rp != R else out


# ------------------------------ cross-entropy kernel ---------------------------
def ce_kernel(labels_ref, logits_ref, loss_ref):
    logits = logits_ref[...]                                 # (N, Vp) f32
    N, V = logits.shape
    m = jnp.max(logits, axis=-1, keepdims=True)
    lse = jnp.log(jnp.sum(jnp.exp(logits - m), axis=-1, keepdims=True)) + m   # (N, 1)
    labels = labels_ref[...]                                 # (N, 1) int32
    vid = lax.broadcasted_iota(jnp.int32, (N, V), 1)
    tgt = jnp.sum(jnp.where(vid == labels, logits, 0.0), axis=-1, keepdims=True)
    loss_ref[0, 0] = jnp.sum(lse - tgt) / N


def cross_entropy(logits2, labels1d):
    N, Vp = logits2.shape
    labels2 = labels1d.astype(jnp.int32).reshape(N, 1)
    out = pl.pallas_call(
        ce_kernel,
        out_shape=jax.ShapeDtypeStruct((1, 1), jnp.float32),
        grid=(1,),
        in_specs=[pl.BlockSpec((N, 1), lambda i: (0, 0)),
                  pl.BlockSpec((N, Vp), lambda i: (0, 0))],
        out_specs=pl.BlockSpec(memory_space=pltpu.MemorySpace.SMEM),
    )(labels2, logits2)
    return out[0, 0]


# ----------------------------------- params ------------------------------------
def init_params(key, vocab, d_model, depth):
    std = 0.02
    keys = jax.random.split(key, 3 + depth)
    params = {
        'emb':  jax.random.normal(keys[0], (vocab, d_model), jnp.float32) * std,
        'wte':  jax.random.normal(keys[1], (vocab, d_model), jnp.float32) * std,
        'wpe0': jax.random.normal(keys[2], (1, d_model), jnp.float32) * std,
        'lnf_g': jnp.ones((1, d_model), jnp.float32),
        'lnf_b': jnp.zeros((1, d_model), jnp.float32),
        'layers': [],
    }
    for l in range(depth):
        k = jax.random.split(keys[3 + l], 4)
        params['layers'].append({
            'ln1_g': jnp.ones((1, d_model), jnp.float32),
            'ln1_b': jnp.zeros((1, d_model), jnp.float32),
            'w_qkv': jax.random.normal(k[0], (d_model, 3 * d_model), jnp.float32) * std,
            'b_qkv': jnp.zeros((1, 3 * d_model), jnp.float32),
            'w_proj': jax.random.normal(k[1], (d_model, d_model), jnp.float32) * std,
            'b_proj': jnp.zeros((1, d_model), jnp.float32),
            'ln2_g': jnp.ones((1, d_model), jnp.float32),
            'ln2_b': jnp.zeros((1, d_model), jnp.float32),
            'w_fc':  jax.random.normal(k[2], (d_model, 4 * d_model), jnp.float32) * std,
            'b_fc':  jnp.zeros((1, 4 * d_model), jnp.float32),
            'w_fc2': jax.random.normal(k[3], (4 * d_model, d_model), jnp.float32) * std,
            'b_fc2': jnp.zeros((1, d_model), jnp.float32),
        })
    return params


# ----------------------------------- forward ------------------------------------
def loop_tf_forward(params, input_ids, output_ids, length_q, length_a, step):
    V, D = params['wte'].shape
    B, S = input_ids.shape

    input_emb = jnp.take(params['emb'], input_ids, axis=0)          # (B, S, D)
    inj = (input_emb + params['wpe0'][None]).reshape(B * S, D)      # injection + wpe[0]

    # static causal mask, hoisted out of the per-layer/per-step kernel body
    r = jnp.arange(S)
    mask_bias = jnp.where(r[:, None] >= r[None, :], 0.0, -1e9).astype(jnp.float32)

    hidden2 = fused_transformer(inj, mask_bias, params, B, S, step) # (B*S, D), post-ln_f
    hidden_state = hidden2.reshape(B, S, D)

    # LM head only on the rows consumed by the loss / returned logits
    rows = hidden_state[:, length_q + 1:length_q + length_a + 1, :]  # (B, length_a, D)
    logits_p = lm_head(rows.reshape(B * length_a, D), params['wte'])  # (B*la, Vp)
    Vp = logits_p.shape[1]

    labels = output_ids[:, length_q + 1:length_q + length_a + 1].reshape(-1)

    if Vp != V:                                   # mask padded vocab columns for the CE
        vmask = jnp.arange(Vp) < V
        logits_ce = jnp.where(vmask[None, :], logits_p, -1e30)
    else:
        logits_ce = logits_p
    loss = cross_entropy(logits_ce, labels)

    logits_slice = logits_p[:, :V].reshape(B, length_a, V)
    return loss, logits_slice, hidden_state


# ------------------------------------- main --------------------------------------
if __name__ == "__main__":
    VOCAB, D_MODEL, DEPTH = 32, 256, 2      # n_embd=256, n_head=8 as in the module
    B, S = 2, 8
    length_q, length_a, step = 2, 4, 2

    key = jax.random.PRNGKey(0)
    kp, ki, ko = jax.random.split(key, 3)
    params = init_params(kp, VOCAB, D_MODEL, DEPTH)
    input_ids = jax.random.randint(ki, (B, S), 0, VOCAB, dtype=jnp.int32)
    output_ids = jax.random.randint(ko, (B, S), 0, VOCAB, dtype=jnp.int32)

    loss, logits, hidden = loop_tf_forward(
        params, input_ids, output_ids, length_q, length_a, step)
    (loss, logits, hidden) = jax.block_until_ready((loss, logits, hidden))

    assert logits.shape == (B, length_a, VOCAB)
    assert hidden.shape == (B, S, D_MODEL)
    assert bool(jnp.isfinite(loss))
    print("KERNEL_OK")
</pallas_src>

<mosaic_0001>
module attributes {stable_mosaic.version = 11 : i64} {
  func.func @fused_transformer_kernel(%arg0: i32, %arg1: i32, %arg2: memref<16x256xf32, #tpu.memory_space<vmem>>, %arg3: memref<8x8xf32, #tpu.memory_space<vmem>>, %arg4: memref<1x1x256xf32, #tpu.memory_space<vmem>>, %arg5: memref<1x1x256xf32, #tpu.memory_space<vmem>>, %arg6: memref<1x256x768xbf16, #tpu.memory_space<vmem>>, %arg7: memref<1x1x768xf32, #tpu.memory_space<vmem>>, %arg8: memref<1x256x256xbf16, #tpu.memory_space<vmem>>, %arg9: memref<1x1x256xf32, #tpu.memory_space<vmem>>, %arg10: memref<1x1x256xf32, #tpu.memory_space<vmem>>, %arg11: memref<1x1x256xf32, #tpu.memory_space<vmem>>, %arg12: memref<1x256x1024xbf16, #tpu.memory_space<vmem>>, %arg13: memref<1x1x1024xf32, #tpu.memory_space<vmem>>, %arg14: memref<1x1024x256xbf16, #tpu.memory_space<vmem>>, %arg15: memref<1x1x256xf32, #tpu.memory_space<vmem>>, %arg16: memref<1x256xf32, #tpu.memory_space<vmem>>, %arg17: memref<1x256xf32, #tpu.memory_space<vmem>>, %arg18: memref<16x256xf32, #tpu.memory_space<vmem>>, %arg19: memref<16x256xf32, #tpu.memory_space<vmem>>, %arg20: memref<16x256xf32, #tpu.memory_space<vmem>>) attributes {dimension_semantics = [#tpu.dimension_semantics<arbitrary>, #tpu.dimension_semantics<arbitrary>], iteration_bounds = array<i64: 2, 2>, scalar_prefetch = 0 : i64, scratch_operands = 2 : i64, tpu.core_type = #tpu.core_type<tc>, window_params = [{pipeline_mode = #tpu.pipeline_mode<synchronous>, transform_indices = @transform_0, window_bounds = array<i64: 16, 256>}, {pipeline_mode = #tpu.pipeline_mode<synchronous>, transform_indices = @transform_1, window_bounds = array<i64: 8, 8>}, {transform_indices = @transform_2, window_bounds = array<i64: 1, 1, 256>}, {transform_indices = @transform_3, window_bounds = array<i64: 1, 1, 256>}, {transform_indices = @transform_4, window_bounds = array<i64: 1, 256, 768>}, {transform_indices = @transform_5, window_bounds = array<i64: 1, 1, 768>}, {transform_indices = @transform_6, window_bounds = array<i64: 1, 256, 256>}, {transform_indices = @transform_7, window_bounds = array<i64: 1, 1, 256>}, {transform_indices = @transform_8, window_bounds = array<i64: 1, 1, 256>}, {transform_indices = @transform_9, window_bounds = array<i64: 1, 1, 256>}, {transform_indices = @transform_10, window_bounds = array<i64: 1, 256, 1024>}, {transform_indices = @transform_11, window_bounds = array<i64: 1, 1, 1024>}, {transform_indices = @transform_12, window_bounds = array<i64: 1, 1024, 256>}, {transform_indices = @transform_13, window_bounds = array<i64: 1, 1, 256>}, {pipeline_mode = #tpu.pipeline_mode<synchronous>, transform_indices = @transform_14, window_bounds = array<i64: 1, 256>}, {pipeline_mode = #tpu.pipeline_mode<synchronous>, transform_indices = @transform_15, window_bounds = array<i64: 1, 256>}, {pipeline_mode = #tpu.pipeline_mode<synchronous>, transform_indices = @transform_16, window_bounds = array<i64: 16, 256>}]} {
    %c0_i32 = arith.constant 0 : i32
    %0 = arith.cmpi eq, %arg1, %c0_i32 : i32
    %1 = arith.extui %0 : i1 to i32
    %c0_i32_0 = arith.constant 0 : i32
    %2 = arith.cmpi ne, %1, %c0_i32_0 : i32
    scf.if %2 {
      %c0_65 = arith.constant 0 : index
      %c0_66 = arith.constant 0 : index
      %203 = vector.load %arg2[%c0_65, %c0_66] : memref<16x256xf32, #tpu.memory_space<vmem>>, vector<16x256xf32>
      %c0_i32_67 = arith.constant 0 : i32
      %204 = arith.cmpi eq, %arg0, %c0_i32_67 : i32
      %205 = arith.extui %204 : i1 to i32
      %c0_i32_68 = arith.constant 0 : i32
      %206 = arith.cmpi ne, %205, %c0_i32_68 : i32
      scf.if %206 {
        %c0_71 = arith.constant 0 : index
        %c0_72 = arith.constant 0 : index
        %210 = vector.load %arg19[%c0_71, %c0_72] : memref<16x256xf32, #tpu.memory_space<vmem>>, vector<16x256xf32>
        tpu.vector_store %arg19[%c0_71, %c0_72], %203 {strides = array<i32>} : memref<16x256xf32, #tpu.memory_space<vmem>>, vector<16x256xf32>,
      } else {
      }
      %c0_i32_69 = arith.constant 0 : i32
      %207 = arith.cmpi sgt, %arg0, %c0_i32_69 : i32
      %208 = arith.extui %207 : i1 to i32
      %c0_i32_70 = arith.constant 0 : i32
      %209 = arith.cmpi ne, %208, %c0_i32_70 : i32
      scf.if %209 {
        %c0_71 = arith.constant 0 : index
        %c0_72 = arith.constant 0 : index
        %210 = vector.load %arg20[%c0_71, %c0_72] : memref<16x256xf32, #tpu.memory_space<vmem>>, vector<16x256xf32>
        %211 = arith.addf %210, %203 : vector<16x256xf32>
        %c0_73 = arith.constant 0 : index
        %c0_74 = arith.constant 0 : index
        %212 = vector.load %arg19[%c0_73, %c0_74] : memref<16x256xf32, #tpu.memory_space<vmem>>, vector<16x256xf32>
        tpu.vector_store %arg19[%c0_73, %c0_74], %211 {strides = array<i32>} : memref<16x256xf32, #tpu.memory_space<vmem>>, vector<16x256xf32>,
      } else {
      }
    } else {
    }
    %c0 = arith.constant 0 : index
    %c0_1 = arith.constant 0 : index
    %3 = vector.load %arg19[%c0, %c0_1] : memref<16x256xf32, #tpu.memory_space<vmem>>, vector<16x256xf32>
    %c0_2 = arith.constant 0 : index
    %c0_3 = arith.constant 0 : index
    %c0_4 = arith.constant 0 : index
    %4 = vector.load %arg4[%c0_2, %c0_3, %c0_4] : memref<1x1x256xf32, #tpu.memory_space<vmem>>, vector<1x1x256xf32>
    %5 = vector.shape_cast %4 : vector<1x1x256xf32> to vector<1x256xf32>
    %c0_5 = arith.constant 0 : index
    %c0_6 = arith.constant 0 : index
    %c0_7 = arith.constant 0 : index
    %6 = vector.load %arg5[%c0_5, %c0_6, %c0_7] : memref<1x1x256xf32, #tpu.memory_space<vmem>>, vector<1x1x256xf32>
    %7 = vector.shape_cast %6 : vector<1x1x256xf32> to vector<1x256xf32>
    %cst = arith.constant dense<0.000000e+00> : vector<16xf32>
    %8 = vector.multi_reduction <add>, %3, %cst [1] : vector<16x256xf32> to vector<16xf32>
    %9 = vector.shape_cast %8 : vector<16xf32> to vector<16x1xf32>
    %cst_8 = arith.constant 2.560000e+02 : f32
    %10 = vector.broadcast %cst_8 : f32 to vector<16x1xf32>
    %11 = arith.divf %9, %10 : vector<16x1xf32>
    %12 = vector.broadcast %11 : vector<16x1xf32> to vector<16x256xf32>
    %13 = arith.subf %3, %12 : vector<16x256xf32>
    %14 = arith.mulf %13, %13 : vector<16x256xf32>
    %cst_9 = arith.constant dense<0.000000e+00> : vector<16xf32>
    %15 = vector.multi_reduction <add>, %14, %cst_9 [1] : vector<16x256xf32> to vector<16xf32>
    %16 = vector.shape_cast %15 : vector<16xf32> to vector<16x1xf32>
    %cst_10 = arith.constant 2.560000e+02 : f32
    %17 = vector.broadcast %cst_10 : f32 to vector<16x1xf32>
    %18 = arith.divf %16, %17 : vector<16x1xf32>
    %19 = vector.broadcast %11 : vector<16x1xf32> to vector<16x256xf32>
    %20 = arith.subf %3, %19 : vector<16x256xf32>
    %cst_11 = arith.constant 9.99999974E-6 : f32
    %21 = vector.broadcast %cst_11 : f32 to vector<16x1xf32>
    %22 = arith.addf %18, %21 : vector<16x1xf32>
    %23 = math.rsqrt %22 : vector<16x1xf32>
    %24 = vector.broadcast %23 : vector<16x1xf32> to vector<16x256xf32>
    %25 = arith.mulf %20, %24 : vector<16x256xf32>
    %26 = vector.broadcast %5 : vector<1x256xf32> to vector<16x256xf32>
    %27 = arith.mulf %25, %26 : vector<16x256xf32>
    %28 = vector.broadcast %7 : vector<1x256xf32> to vector<16x256xf32>
    %29 = arith.addf %27, %28 : vector<16x256xf32>
    %30 = arith.truncf %29 : vector<16x256xf32> to vector<16x256xbf16>
    %c0_12 = arith.constant 0 : index
    %c0_13 = arith.constant 0 : index
    %c0_14 = arith.constant 0 : index
    %31 = vector.load %arg6[%c0_12, %c0_13, %c0_14] : memref<1x256x768xbf16, #tpu.memory_space<vmem>>, vector<1x256x768xbf16>
    %32 = vector.shape_cast %31 : vector<1x256x768xbf16> to vector<256x768xbf16>
    %cst_15 = arith.constant dense<0.000000e+00> : vector<16x768xf32>
    %33 = tpu.matmul %30, %32, %cst_15 {dimension_numbers = #tpu.dot_dimension_numbers<[1], [0], [0], [1], [0, 0, 1, 1], [], []>} : vector<16x256xbf16>, vector<256x768xbf16>, vector<16x768xf32> -> vector<16x768xf32>
    %c0_16 = arith.constant 0 : index
    %c0_17 = arith.constant 0 : index
    %c0_18 = arith.constant 0 : index
    %34 = vector.load %arg7[%c0_16, %c0_17, %c0_18] : memref<1x1x768xf32, #tpu.memory_space<vmem>>, vector<1x1x768xf32>
    %35 = vector.shape_cast %34 : vector<1x1x768xf32> to vector<1x768xf32>
    %36 = vector.broadcast %35 : vector<1x768xf32> to vector<16x768xf32>
    %37 = arith.addf %33, %36 : vector<16x768xf32>
    %38 = vector.shape_cast %37 : vector<16x768xf32> to vector<2x8x768xf32>
    %39 = vector.extract_strided_slice %38 {offsets = [0, 0, 0], sizes = [2, 8, 32], strides = [1, 1, 1]} : vector<2x8x768xf32> to vector<2x8x32xf32>
    %40 = vector.extract_strided_slice %38 {offsets = [0, 0, 32], sizes = [2, 8, 32], strides = [1, 1, 1]} : vector<2x8x768xf32> to vector<2x8x32xf32>
    %41 = vector.extract_strided_slice %38 {offsets = [0, 0, 64], sizes = [2, 8, 32], strides = [1, 1, 1]} : vector<2x8x768xf32> to vector<2x8x32xf32>
    %42 = vector.extract_strided_slice %38 {offsets = [0, 0, 96], sizes = [2, 8, 32], strides = [1, 1, 1]} : vector<2x8x768xf32> to vector<2x8x32xf32>
    %43 = vector.extract_strided_slice %38 {offsets = [0, 0, 128], sizes = [2, 8, 32], strides = [1, 1, 1]} : vector<2x8x768xf32> to vector<2x8x32xf32>
    %44 = vector.extract_strided_slice %38 {offsets = [0, 0, 160], sizes = [2, 8, 32], strides = [1, 1, 1]} : vector<2x8x768xf32> to vector<2x8x32xf32>
    %45 = vector.extract_strided_slice %38 {offsets = [0, 0, 192], sizes = [2, 8, 32], strides = [1, 1, 1]} : vector<2x8x768xf32> to vector<2x8x32xf32>
    %46 = vector.extract_strided_slice %38 {offsets = [0, 0, 224], sizes = [2, 8, 32], strides = [1, 1, 1]} : vector<2x8x768xf32> to vector<2x8x32xf32>
    %47 = vector.shape_cast %39 : vector<2x8x32xf32> to vector<1x2x8x32xf32>
    %48 = vector.shape_cast %40 : vector<2x8x32xf32> to vector<1x2x8x32xf32>
    %49 = vector.shape_cast %41 : vector<2x8x32xf32> to vector<1x2x8x32xf32>
    %50 = vector.shape_cast %42 : vector<2x8x32xf32> to vector<1x2x8x32xf32>
    %51 = vector.shape_cast %43 : vector<2x8x32xf32> to vector<1x2x8x32xf32>
    %52 = vector.shape_cast %44 : vector<2x8x32xf32> to vector<1x2x8x32xf32>
    %53 = vector.shape_cast %45 : vector<2x8x32xf32> to vector<1x2x8x32xf32>
    %54 = vector.shape_cast %46 : vector<2x8x32xf32> to vector<1x2x8x32xf32>
    %55 = tpu.concatenate %47, %48, %49, %50, %51, %52, %53, %54 in 0 : vector<1x2x8x32xf32>, vector<1x2x8x32xf32>, vector<1x2x8x32xf32>, vector<1x2x8x32xf32>, vector<1x2x8x32xf32>, vector<1x2x8x32xf32>, vector<1x2x8x32xf32>, vector<1x2x8x32xf32> -> vector<8x2x8x32xf32>
    %56 = vector.shape_cast %55 : vector<8x2x8x32xf32> to vector<16x8x32xf32>
    %57 = vector.extract_strided_slice %38 {offsets = [0, 0, 256], sizes = [2, 8, 32], strides = [1, 1, 1]} : vector<2x8x768xf32> to vector<2x8x32xf32>
    %58 = vector.extract_strided_slice %38 {offsets = [0, 0, 288], sizes = [2, 8, 32], strides = [1, 1, 1]} : vector<2x8x768xf32> to vector<2x8x32xf32>
    %59 = vector.extract_strided_slice %38 {offsets = [0, 0, 320], sizes = [2, 8, 32], strides = [1, 1, 1]} : vector<2x8x768xf32> to vector<2x8x32xf32>
    %60 = vector.extract_strided_slice %38 {offsets = [0, 0, 352], sizes = [2, 8, 32], strides = [1, 1, 1]} : vector<2x8x768xf32> to vector<2x8x32xf32>
    %61 = vector.extract_strided_slice %38 {offsets = [0, 0, 384], sizes = [2, 8, 32], strides = [1, 1, 1]} : vector<2x8x768xf32> to vector<2x8x32xf32>
    %62 = vector.extract_strided_slice %38 {offsets = [0, 0, 416], sizes = [2, 8, 32], strides = [1, 1, 1]} : vector<2x8x768xf32> to vector<2x8x32xf32>
    %63 = vector.extract_strided_slice %38 {offsets = [0, 0, 448], sizes = [2, 8, 32], strides = [1, 1, 1]} : vector<2x8x768xf32> to vector<2x8x32xf32>
    %64 = vector.extract_strided_slice %38 {offsets = [0, 0, 480], sizes = [2, 8, 32], strides = [1, 1, 1]} : vector<2x8x768xf32> to vector<2x8x32xf32>
    %65 = vector.shape_cast %57 : vector<2x8x32xf32> to vector<1x2x8x32xf32>
    %66 = vector.shape_cast %58 : vector<2x8x32xf32> to vector<1x2x8x32xf32>
    %67 = vector.shape_cast %59 : vector<2x8x32xf32> to vector<1x2x8x32xf32>
    %68 = vector.shape_cast %60 : vector<2x8x32xf32> to vector<1x2x8x32xf32>
    %69 = vector.shape_cast %61 : vector<2x8x32xf32> to vector<1x2x8x32xf32>
    %70 = vector.shape_cast %62 : vector<2x8x32xf32> to vector<1x2x8x32xf32>
    %71 = vector.shape_cast %63 : vector<2x8x32xf32> to vector<1x2x8x32xf32>
    %72 = vector.shape_cast %64 : vector<2x8x32xf32> to vector<1x2x8x32xf32>
    %73 = tpu.concatenate %65, %66, %67, %68, %69, %70, %71, %72 in 0 : vector<1x2x8x32xf32>, vector<1x2x8x32xf32>, vector<1x2x8x32xf32>, vector<1x2x8x32xf32>, vector<1x2x8x32xf32>, vector<1x2x8x32xf32>, vector<1x2x8x32xf32>, vector<1x2x8x32xf32> -> vector<8x2x8x32xf32>
    %74 = vector.shape_cast %73 : vector<8x2x8x32xf32> to vector<16x8x32xf32>
    %75 = vector.extract_strided_slice %38 {offsets = [0, 0, 512], sizes = [2, 8, 32], strides = [1, 1, 1]} : vector<2x8x768xf32> to vector<2x8x32xf32>
    %76 = vector.extract_strided_slice %38 {offsets = [0, 0, 544], sizes = [2, 8, 32], strides = [1, 1, 1]} : vector<2x8x768xf32> to vector<2x8x32xf32>
    %77 = vector.extract_strided_slice %38 {offsets = [0, 0, 576], sizes = [2, 8, 32], strides = [1, 1, 1]} : vector<2x8x768xf32> to vector<2x8x32xf32>
    %78 = vector.extract_strided_slice %38 {offsets = [0, 0, 608], sizes = [2, 8, 32], strides = [1, 1, 1]} : vector<2x8x768xf32> to vector<2x8x32xf32>
    %79 = vector.extract_strided_slice %38 {offsets = [0, 0, 640], sizes = [2, 8, 32], strides = [1, 1, 1]} : vector<2x8x768xf32> to vector<2x8x32xf32>
    %80 = vector.extract_strided_slice %38 {offsets = [0, 0, 672], sizes = [2, 8, 32], strides = [1, 1, 1]} : vector<2x8x768xf32> to vector<2x8x32xf32>
    %81 = vector.extract_strided_slice %38 {offsets = [0, 0, 704], sizes = [2, 8, 32], strides = [1, 1, 1]} : vector<2x8x768xf32> to vector<2x8x32xf32>
    %82 = vector.extract_strided_slice %38 {offsets = [0, 0, 736], sizes = [2, 8, 32], strides = [1, 1, 1]} : vector<2x8x768xf32> to vector<2x8x32xf32>
    %83 = vector.shape_cast %75 : vector<2x8x32xf32> to vector<1x2x8x32xf32>
    %84 = vector.shape_cast %76 : vector<2x8x32xf32> to vector<1x2x8x32xf32>
    %85 = vector.shape_cast %77 : vector<2x8x32xf32> to vector<1x2x8x32xf32>
    %86 = vector.shape_cast %78 : vector<2x8x32xf32> to vector<1x2x8x32xf32>
    %87 = vector.shape_cast %79 : vector<2x8x32xf32> to vector<1x2x8x32xf32>
    %88 = vector.shape_cast %80 : vector<2x8x32xf32> to vector<1x2x8x32xf32>
    %89 = vector.shape_cast %81 : vector<2x8x32xf32> to vector<1x2x8x32xf32>
    %90 = vector.shape_cast %82 : vector<2x8x32xf32> to vector<1x2x8x32xf32>
    %91 = tpu.concatenate %83, %84, %85, %86, %87, %88, %89, %90 in 0 : vector<1x2x8x32xf32>, vector<1x2x8x32xf32>, vector<1x2x8x32xf32>, vector<1x2x8x32xf32>, vector<1x2x8x32xf32>, vector<1x2x8x32xf32>, vector<1x2x8x32xf32>, vector<1x2x8x32xf32> -> vector<8x2x8x32xf32>
    %92 = vector.shape_cast %91 : vector<8x2x8x32xf32> to vector<16x8x32xf32>
    %93 = arith.truncf %56 : vector<16x8x32xf32> to vector<16x8x32xbf16>
    %94 = arith.truncf %74 : vector<16x8x32xf32> to vector<16x8x32xbf16>
    "tpu.trace_start"() <{level = 10 : i32, message = "nqd,nkd->nqk"}> : () -> ()
    %cst_19 = arith.constant dense<0.000000e+00> : vector<16x8x8xf32>
    %95 = tpu.matmul %93, %94, %cst_19 {dimension_numbers = #tpu.dot_dimension_numbers<[2], [2], [1], [1], [0, 0, 0, 1, 1, 1], [0], [0]>} : vector<16x8x32xbf16>, vector<16x8x32xbf16>, vector<16x8x8xf32> -> vector<16x8x8xf32>
    "tpu.trace_stop"() : () -> ()
    %cst_20 = arith.constant 0.176776692 : f32
    %96 = vector.broadcast %cst_20 : f32 to vector<16x8x8xf32>
    %97 = arith.mulf %95, %96 : vector<16x8x8xf32>
    %c0_21 = arith.constant 0 : index
    %c0_22 = arith.constant 0 : index
    %98 = vector.load %arg3[%c0_21, %c0_22] : memref<8x8xf32, #tpu.memory_space<vmem>>, vector<8x8xf32>
    %99 = vector.shape_cast %98 : vector<8x8xf32> to vector<1x8x8xf32>
    %100 = vector.broadcast %99 : vector<1x8x8xf32> to vector<16x8x8xf32>
    %101 = arith.addf %97, %100 : vector<16x8x8xf32>
    %cst_23 = arith.constant dense<0xFF800000> : vector<16x8xf32>
    %102 = vector.multi_reduction <maximumf>, %101, %cst_23 [2] : vector<16x8x8xf32> to vector<16x8xf32>
    %103 = vector.shape_cast %102 : vector<16x8xf32> to vector<16x8x1xf32>
    %104 = vector.broadcast %103 : vector<16x8x1xf32> to vector<16x8x8xf32>
    %105 = arith.subf %101, %104 : vector<16x8x8xf32>
    %106 = math.exp %105 : vector<16x8x8xf32>
    %cst_24 = arith.constant dense<0.000000e+00> : vector<16x8xf32>
    %107 = vector.multi_reduction <add>, %106, %cst_24 [2] : vector<16x8x8xf32> to vector<16x8xf32>
    %108 = vector.shape_cast %107 : vector<16x8xf32> to vector<16x8x1xf32>
    %109 = tpu.reciprocal %108 {approx = true} : vector<16x8x1xf32> -> vector<16x8x1xf32>
    %110 = vector.broadcast %109 : vector<16x8x1xf32> to vector<16x8x8xf32>
    %111 = arith.mulf %106, %110 : vector<16x8x8xf32>
    %112 = arith.truncf %111 : vector<16x8x8xf32> to vector<16x8x8xbf16>
    %113 = arith.truncf %92 : vector<16x8x32xf32> to vector<16x8x32xbf16>
    "tpu.trace_start"() <{level = 10 : i32, message = "nqk,nkd->nqd"}> : () -> ()
    %cst_25 = arith.constant dense<0.000000e+00> : vector<16x8x32xf32>
    %114 = tpu.matmul %112, %113, %cst_25 {dimension_numbers = #tpu.dot_dimension_numbers<[2], [1], [1], [2], [0, 0, 0, 1, 1, 2], [0], [0]>} : vector<16x8x8xbf16>, vector<16x8x32xbf16>, vector<16x8x32xf32> -> vector<16x8x32xf32>
    "tpu.trace_stop"() : () -> ()
    %115 = vector.shape_cast %114 : vector<16x8x32xf32> to vector<8x2x8x32xf32>
    %116 = vector.extract_strided_slice %115 {offsets = [0, 0, 0, 0], sizes = [1, 2, 8, 32], strides = [1, 1, 1, 1]} : vector<8x2x8x32xf32> to vector<1x2x8x32xf32>
    %117 = vector.shape_cast %116 : vector<1x2x8x32xf32> to vector<2x8x32xf32>
    %118 = vector.extract_strided_slice %115 {offsets = [1, 0, 0, 0], sizes = [1, 2, 8, 32], strides = [1, 1, 1, 1]} : vector<8x2x8x32xf32> to vector<1x2x8x32xf32>
    %119 = vector.shape_cast %118 : vector<1x2x8x32xf32> to vector<2x8x32xf32>
    %120 = vector.extract_strided_slice %115 {offsets = [2, 0, 0, 0], sizes = [1, 2, 8, 32], strides = [1, 1, 1, 1]} : vector<8x2x8x32xf32> to vector<1x2x8x32xf32>
    %121 = vector.shape_cast %120 : vector<1x2x8x32xf32> to vector<2x8x32xf32>
    %122 = vector.extract_strided_slice %115 {offsets = [3, 0, 0, 0], sizes = [1, 2, 8, 32], strides = [1, 1, 1, 1]} : vector<8x2x8x32xf32> to vector<1x2x8x32xf32>
    %123 = vector.shape_cast %122 : vector<1x2x8x32xf32> to vector<2x8x32xf32>
    %124 = vector.extract_strided_slice %115 {offsets = [4, 0, 0, 0], sizes = [1, 2, 8, 32], strides = [1, 1, 1, 1]} : vector<8x2x8x32xf32> to vector<1x2x8x32xf32>
    %125 = vector.shape_cast %124 : vector<1x2x8x32xf32> to vector<2x8x32xf32>
    %126 = vector.extract_strided_slice %115 {offsets = [5, 0, 0, 0], sizes = [1, 2, 8, 32], strides = [1, 1, 1, 1]} : vector<8x2x8x32xf32> to vector<1x2x8x32xf32>
    %127 = vector.shape_cast %126 : vector<1x2x8x32xf32> to vector<2x8x32xf32>
    %128 = vector.extract_strided_slice %115 {offsets = [6, 0, 0, 0], sizes = [1, 2, 8, 32], strides = [1, 1, 1, 1]} : vector<8x2x8x32xf32> to vector<1x2x8x32xf32>
    %129 = vector.shape_cast %128 : vector<1x2x8x32xf32> to vector<2x8x32xf32>
    %130 = vector.extract_strided_slice %115 {offsets = [7, 0, 0, 0], sizes = [1, 2, 8, 32], strides = [1, 1, 1, 1]} : vector<8x2x8x32xf32> to vector<1x2x8x32xf32>
    %131 = vector.shape_cast %130 : vector<1x2x8x32xf32> to vector<2x8x32xf32>
    %132 = tpu.concatenate %117, %119, %121, %123, %125, %127, %129, %131 in 2 : vector<2x8x32xf32>, vector<2x8x32xf32>, vector<2x8x32xf32>, vector<2x8x32xf32>, vector<2x8x32xf32>, vector<2x8x32xf32>, vector<2x8x32xf32>, vector<2x8x32xf32> -> vector<2x8x256xf32>
    %133 = vector.shape_cast %132 : vector<2x8x256xf32> to vector<16x256xf32>
    %134 = arith.truncf %133 : vector<16x256xf32> to vector<16x256xbf16>
    %c0_26 = arith.constant 0 : index
    %c0_27 = arith.constant 0 : index
    %c0_28 = arith.constant 0 : index
    %135 = vector.load %arg8[%c0_26, %c0_27, %c0_28] : memref<1x256x256xbf16, #tpu.memory_space<vmem>>, vector<1x256x256xbf16>
    %136 = vector.shape_cast %135 : vector<1x256x256xbf16> to vector<256x256xbf16>
    %cst_29 = arith.constant dense<0.000000e+00> : vector<16x256xf32>
    %137 = tpu.matmul %134, %136, %cst_29 {dimension_numbers = #tpu.dot_dimension_numbers<[1], [0], [0], [1], [0, 0, 1, 1], [], []>} : vector<16x256xbf16>, vector<256x256xbf16>, vector<16x256xf32> -> vector<16x256xf32>
    %c0_30 = arith.constant 0 : index
    %c0_31 = arith.constant 0 : index
    %c0_32 = arith.constant 0 : index
    %138 = vector.load %arg9[%c0_30, %c0_31, %c0_32] : memref<1x1x256xf32, #tpu.memory_space<vmem>>, vector<1x1x256xf32>
    %139 = vector.shape_cast %138 : vector<1x1x256xf32> to vector<1x256xf32>
    %140 = vector.broadcast %139 : vector<1x256xf32> to vector<16x256xf32>
    %141 = arith.addf %137, %140 : vector<16x256xf32>
    %142 = arith.addf %3, %141 : vector<16x256xf32>
    %c0_33 = arith.constant 0 : index
    %c0_34 = arith.constant 0 : index
    %c0_35 = arith.constant 0 : index
    %143 = vector.load %arg10[%c0_33, %c0_34, %c0_35] : memref<1x1x256xf32, #tpu.memory_space<vmem>>, vector<1x1x256xf32>
    %144 = vector.shape_cast %143 : vector<1x1x256xf32> to vector<1x256xf32>
    %c0_36 = arith.constant 0 : index
    %c0_37 = arith.constant 0 : index
    %c0_38 = arith.constant 0 : index
    %145 = vector.load %arg11[%c0_36, %c0_37, %c0_38] : memref<1x1x256xf32, #tpu.memory_space<vmem>>, vector<1x1x256xf32>
    %146 = vector.shape_cast %145 : vector<1x1x256xf32> to vector<1x256xf32>
    %cst_39 = arith.constant dense<0.000000e+00> : vector<16xf32>
    %147 = vector.multi_reduction <add>, %142, %cst_39 [1] : vector<16x256xf32> to vector<16xf32>
    %148 = vector.shape_cast %147 : vector<16xf32> to vector<16x1xf32>
    %cst_40 = arith.constant 2.560000e+02 : f32
    %149 = vector.broadcast %cst_40 : f32 to vector<16x1xf32>
    %150 = arith.divf %148, %149 : vector<16x1xf32>
    %151 = vector.broadcast %150 : vector<16x1xf32> to vector<16x256xf32>
    %152 = arith.subf %142, %151 : vector<16x256xf32>
    %153 = arith.mulf %152, %152 : vector<16x256xf32>
    %cst_41 = arith.constant dense<0.000000e+00> : vector<16xf32>
    %154 = vector.multi_reduction <add>, %153, %cst_41 [1] : vector<16x256xf32> to vector<16xf32>
    %155 = vector.shape_cast %154 : vector<16xf32> to vector<16x1xf32>
    %cst_42 = arith.constant 2.560000e+02 : f32
    %156 = vector.broadcast %cst_42 : f32 to vector<16x1xf32>
    %157 = arith.divf %155, %156 : vector<16x1xf32>
    %158 = vector.broadcast %150 : vector<16x1xf32> to vector<16x256xf32>
    %159 = arith.subf %142, %158 : vector<16x256xf32>
    %cst_43 = arith.constant 9.99999974E-6 : f32
    %160 = vector.broadcast %cst_43 : f32 to vector<16x1xf32>
    %161 = arith.addf %157, %160 : vector<16x1xf32>
    %162 = math.rsqrt %161 : vector<16x1xf32>
    %163 = vector.broadcast %162 : vector<16x1xf32> to vector<16x256xf32>
    %164 = arith.mulf %159, %163 : vector<16x256xf32>
    %165 = vector.broadcast %144 : vector<1x256xf32> to vector<16x256xf32>
    %166 = arith.mulf %164, %165 : vector<16x256xf32>
    %167 = vector.broadcast %146 : vector<1x256xf32> to vector<16x256xf32>
    %168 = arith.addf %166, %167 : vector<16x256xf32>
    %169 = arith.truncf %168 : vector<16x256xf32> to vector<16x256xbf16>
    %c0_44 = arith.constant 0 : index
    %c0_45 = arith.constant 0 : index
    %c0_46 = arith.constant 0 : index
    %170 = vector.load %arg12[%c0_44, %c0_45, %c0_46] : memref<1x256x1024xbf16, #tpu.memory_space<vmem>>, vector<1x256x1024xbf16>
    %171 = vector.shape_cast %170 : vector<1x256x1024xbf16> to vector<256x1024xbf16>
    %cst_47 = arith.constant dense<0.000000e+00> : vector<16x1024xf32>
    %172 = tpu.matmul %169, %171, %cst_47 {dimension_numbers = #tpu.dot_dimension_numbers<[1], [0], [0], [1], [0, 0, 1, 1], [], []>} : vector<16x256xbf16>, vector<256x1024xbf16>, vector<16x1024xf32> -> vector<16x1024xf32>
    %c0_48 = arith.constant 0 : index
    %c0_49 = arith.constant 0 : index
    %c0_50 = arith.constant 0 : index
    %173 = vector.load %arg13[%c0_48, %c0_49, %c0_50] : memref<1x1x1024xf32, #tpu.memory_space<vmem>>, vector<1x1x1024xf32>
    %174 = vector.shape_cast %173 : vector<1x1x1024xf32> to vector<1x1024xf32>
    %175 = vector.broadcast %174 : vector<1x1024xf32> to vector<16x1024xf32>
    %176 = arith.addf %172, %175 : vector<16x1024xf32>
    %cst_51 = arith.constant 5.000000e-01 : f32
    %177 = vector.broadcast %cst_51 : f32 to vector<16x1024xf32>
    %178 = arith.mulf %177, %176 : vector<16x1024xf32>
    %cst_52 = arith.constant 4.471500e-02 : f32
    %179 = vector.broadcast %cst_52 : f32 to vector<16x1024xf32>
    %180 = arith.mulf %179, %176 : vector<16x1024xf32>
    %181 = arith.mulf %180, %176 : vector<16x1024xf32>
    %182 = arith.mulf %181, %176 : vector<16x1024xf32>
    %183 = arith.addf %176, %182 : vector<16x1024xf32>
    %cst_53 = arith.constant 0.797884583 : f32
    %184 = vector.broadcast %cst_53 : f32 to vector<16x1024xf32>
    %185 = arith.mulf %184, %183 : vector<16x1024xf32>
    %186 = math.tanh %185 : vector<16x1024xf32>
    %cst_54 = arith.constant 1.000000e+00 : f32
    %187 = vector.broadcast %cst_54 : f32 to vector<16x1024xf32>
    %188 = arith.addf %187, %186 : vector<16x1024xf32>
    %189 = arith.mulf %178, %188 : vector<16x1024xf32>
    %190 = arith.truncf %189 : vector<16x1024xf32> to vector<16x1024xbf16>
    %c0_55 = arith.constant 0 : index
    %c0_56 = arith.constant 0 : index
    %c0_57 = arith.constant 0 : index
    %191 = vector.load %arg14[%c0_55, %c0_56, %c0_57] : memref<1x1024x256xbf16, #tpu.memory_space<vmem>>, vector<1x1024x256xbf16>
    %192 = vector.shape_cast %191 : vector<1x1024x256xbf16> to vector<1024x256xbf16>
    %cst_58 = arith.constant dense<0.000000e+00> : vector<16x256xf32>
    %193 = tpu.matmul %190, %192, %cst_58 {dimension_numbers = #tpu.dot_dimension_numbers<[1], [0], [0], [1], [0, 0, 1, 1], [], []>} : vector<16x1024xbf16>, vector<1024x256xbf16>, vector<16x256xf32> -> vector<16x256xf32>
    %c0_59 = arith.constant 0 : index
    %c0_60 = arith.constant 0 : index
    %c0_61 = arith.constant 0 : index
    %194 = vector.load %arg15[%c0_59, %c0_60, %c0_61] : memref<1x1x256xf32, #tpu.memory_space<vmem>>, vector<1x1x256xf32>
    %195 = vector.shape_cast %194 : vector<1x1x256xf32> to vector<1x256xf32>
    %196 = vector.broadcast %195 : vector<1x256xf32> to vector<16x256xf32>
    %197 = arith.addf %193, %196 : vector<16x256xf32>
    %198 = arith.addf %142, %197 : vector<16x256xf32>
    %c0_62 = arith.constant 0 : index
    %c0_63 = arith.constant 0 : index
    %199 = vector.load %arg19[%c0_62, %c0_63] : memref<16x256xf32, #tpu.memory_space<vmem>>, vector<16x256xf32>
    tpu.vector_store %arg19[%c0_62, %c0_63], %198 {strides = array<i32>} : memref<16x256xf32, #tpu.memory_space<vmem>>, vector<16x256xf32>,
    %c1_i32 = arith.constant 1 : i32
    %200 = arith.cmpi eq, %arg1, %c1_i32 : i32
    %201 = arith.extui %200 : i1 to i32
    %c0_i32_64 = arith.constant 0 : i32
    %202 = arith.cmpi ne, %201, %c0_i32_64 : i32
    scf.if %202 {
      %c0_65 = arith.constant 0 : index
      %c0_66 = arith.constant 0 : index
      %203 = vector.load %arg16[%c0_65, %c0_66] : memref<1x256xf32, #tpu.memory_space<vmem>>, vector<1x256xf32>
      %c0_67 = arith.constant 0 : index
      %c0_68 = arith.constant 0 : index
      %204 = vector.load %arg17[%c0_67, %c0_68] : memref<1x256xf32, #tpu.memory_space<vmem>>, vector<1x256xf32>
      %cst_69 = arith.constant dense<0.000000e+00> : vector<16xf32>
      %205 = vector.multi_reduction <add>, %198, %cst_69 [1] : vector<16x256xf32> to vector<16xf32>
      %206 = vector.shape_cast %205 : vector<16xf32> to vector<16x1xf32>
      %cst_70 = arith.constant 2.560000e+02 : f32
      %207 = vector.broadcast %cst_70 : f32 to vector<16x1xf32>
      %208 = arith.divf %206, %207 : vector<16x1xf32>
      %209 = vector.broadcast %208 : vector<16x1xf32> to vector<16x256xf32>
      %210 = arith.subf %198, %209 : vector<16x256xf32>
      %211 = arith.mulf %210, %210 : vector<16x256xf32>
      %cst_71 = arith.constant dense<0.000000e+00> : vector<16xf32>
      %212 = vector.multi_reduction <add>, %211, %cst_71 [1] : vector<16x256xf32> to vector<16xf32>
      %213 = vector.shape_cast %212 : vector<16xf32> to vector<16x1xf32>
      %cst_72 = arith.constant 2.560000e+02 : f32
      %214 = vector.broadcast %cst_72 : f32 to vector<16x1xf32>
      %215 = arith.divf %213, %214 : vector<16x1xf32>
      %216 = vector.broadcast %208 : vector<16x1xf32> to vector<16x256xf32>
      %217 = arith.subf %198, %216 : vector<16x256xf32>
      %cst_73 = arith.constant 9.99999974E-6 : f32
      %218 = vector.broadcast %cst_73 : f32 to vector<16x1xf32>
      %219 = arith.addf %215, %218 : vector<16x1xf32>
      %220 = math.rsqrt %219 : vector<16x1xf32>
      %221 = vector.broadcast %220 : vector<16x1xf32> to vector<16x256xf32>
      %222 = arith.mulf %217, %221 : vector<16x256xf32>
      %223 = vector.broadcast %203 : vector<1x256xf32> to vector<16x256xf32>
      %224 = arith.mulf %222, %223 : vector<16x256xf32>
      %225 = vector.broadcast %204 : vector<1x256xf32> to vector<16x256xf32>
      %226 = arith.addf %224, %225 : vector<16x256xf32>
      %c0_74 = arith.constant 0 : index
      %c0_75 = arith.constant 0 : index
      %227 = vector.load %arg20[%c0_74, %c0_75] : memref<16x256xf32, #tpu.memory_space<vmem>>, vector<16x256xf32>
      tpu.vector_store %arg20[%c0_74, %c0_75], %226 {strides = array<i32>} : memref<16x256xf32, #tpu.memory_space<vmem>>, vector<16x256xf32>,
      %c1_i32_76 = arith.constant 1 : i32
      %228 = arith.cmpi eq, %arg0, %c1_i32_76 : i32
      %229 = arith.extui %228 : i1 to i32
      %c0_i32_77 = arith.constant 0 : i32
      %230 = arith.cmpi ne, %229, %c0_i32_77 : i32
      scf.if %230 {
        %c0_78 = arith.constant 0 : index
        %c0_79 = arith.constant 0 : index
        %231 = vector.load %arg18[%c0_78, %c0_79] : memref<16x256xf32, #tpu.memory_space<vmem>>, vector<16x256xf32>
        tpu.vector_store %arg18[%c0_78, %c0_79], %226 {strides = array<i32>} : memref<16x256xf32, #tpu.memory_space<vmem>>, vector<16x256xf32>,
      } else {
      }
    } else {
    }
    return
  }
  func.func @transform_0(%arg0: i32, %arg1: i32) -> (i32, i32) {
    %c0_i32 = arith.constant 0 : i32
    %c0_i32_0 = arith.constant 0 : i32
    %c0_i32_1 = arith.constant 0 : i32
    return %c0_i32, %c0_i32_0 : i32, i32
  }
  func.func @transform_1(%arg0: i32, %arg1: i32) -> (i32, i32) {
    %c0_i32 = arith.constant 0 : i32
    %c0_i32_0 = arith.constant 0 : i32
    %c0_i32_1 = arith.constant 0 : i32
    return %c0_i32, %c0_i32_0 : i32, i32
  }
  func.func @transform_2(%arg0: i32, %arg1: i32) -> (i32, i32, i32) {
    %c0_i32 = arith.constant 0 : i32
    %c0_i32_0 = arith.constant 0 : i32
    %c0_i32_1 = arith.constant 0 : i32
    return %arg1, %c0_i32, %c0_i32_0 : i32, i32, i32
  }
  func.func @transform_3(%arg0: i32, %arg1: i32) -> (i32, i32, i32) {
    %c0_i32 = arith.constant 0 : i32
    %c0_i32_0 = arith.constant 0 : i32
    %c0_i32_1 = arith.constant 0 : i32
    return %arg1, %c0_i32, %c0_i32_0 : i32, i32, i32
  }
  func.func @transform_4(%arg0: i32, %arg1: i32) -> (i32, i32, i32) {
    %c0_i32 = arith.constant 0 : i32
    %c0_i32_0 = arith.constant 0 : i32
    %c0_i32_1 = arith.constant 0 : i32
    return %arg1, %c0_i32, %c0_i32_0 : i32, i32, i32
  }
  func.func @transform_5(%arg0: i32, %arg1: i32) -> (i32, i32, i32) {
    %c0_i32 = arith.constant 0 : i32
    %c0_i32_0 = arith.constant 0 : i32
    %c0_i32_1 = arith.constant 0 : i32
    return %arg1, %c0_i32, %c0_i32_0 : i32, i32, i32
  }
  func.func @transform_6(%arg0: i32, %arg1: i32) -> (i32, i32, i32) {
    %c0_i32 = arith.constant 0 : i32
    %c0_i32_0 = arith.constant 0 : i32
    %c0_i32_1 = arith.constant 0 : i32
    return %arg1, %c0_i32, %c0_i32_0 : i32, i32, i32
  }
  func.func @transform_7(%arg0: i32, %arg1: i32) -> (i32, i32, i32) {
    %c0_i32 = arith.constant 0 : i32
    %c0_i32_0 = arith.constant 0 : i32
    %c0_i32_1 = arith.constant 0 : i32
    return %arg1, %c0_i32, %c0_i32_0 : i32, i32, i32
  }
  func.func @transform_8(%arg0: i32, %arg1: i32) -> (i32, i32, i32) {
    %c0_i32 = arith.constant 0 : i32
    %c0_i32_0 = arith.constant 0 : i32
    %c0_i32_1 = arith.constant 0 : i32
    return %arg1, %c0_i32, %c0_i32_0 : i32, i32, i32
  }
  func.func @transform_9(%arg0: i32, %arg1: i32) -> (i32, i32, i32) {
    %c0_i32 = arith.constant 0 : i32
    %c0_i32_0 = arith.constant 0 : i32
    %c0_i32_1 = arith.constant 0 : i32
    return %arg1, %c0_i32, %c0_i32_0 : i32, i32, i32
  }
  func.func @transform_10(%arg0: i32, %arg1: i32) -> (i32, i32, i32) {
    %c0_i32 = arith.constant 0 : i32
    %c0_i32_0 = arith.constant 0 : i32
    %c0_i32_1 = arith.constant 0 : i32
    return %arg1, %c0_i32, %c0_i32_0 : i32, i32, i32
  }
  func.func @transform_11(%arg0: i32, %arg1: i32) -> (i32, i32, i32) {
    %c0_i32 = arith.constant 0 : i32
    %c0_i32_0 = arith.constant 0 : i32
    %c0_i32_1 = arith.constant 0 : i32
    return %arg1, %c0_i32, %c0_i32_0 : i32, i32, i32
  }
  func.func @transform_12(%arg0: i32, %arg1: i32) -> (i32, i32, i32) {
    %c0_i32 = arith.constant 0 : i32
    %c0_i32_0 = arith.constant 0 : i32
    %c0_i32_1 = arith.constant 0 : i32
    return %arg1, %c0_i32, %c0_i32_0 : i32, i32, i32
  }
  func.func @transform_13(%arg0: i32, %arg1: i32) -> (i32, i32, i32) {
    %c0_i32 = arith.constant 0 : i32
    %c0_i32_0 = arith.constant 0 : i32
    %c0_i32_1 = arith.constant 0 : i32
    return %arg1, %c0_i32, %c0_i32_0 : i32, i32, i32
  }
  func.func @transform_14(%arg0: i32, %arg1: i32) -> (i32, i32) {
    %c0_i32 = arith.constant 0 : i32
    %c0_i32_0 = arith.constant 0 : i32
    %c0_i32_1 = arith.constant 0 : i32
    return %c0_i32, %c0_i32_0 : i32, i32
  }
  func.func @transform_15(%arg0: i32, %arg1: i32) -> (i32, i32) {
    %c0_i32 = arith.constant 0 : i32
    %c0_i32_0 = arith.constant 0 : i32
    %c0_i32_1 = arith.constant 0 : i32
    return %c0_i32, %c0_i32_0 : i32, i32
  }
  func.func @transform_16(%arg0: i32, %arg1: i32) -> (i32, i32) {
    %c0_i32 = arith.constant 0 : i32
    %c0_i32_0 = arith.constant 0 : i32
    %c0_i32_1 = arith.constant 0 : i32
    return %c0_i32, %c0_i32_0 : i32, i32
  }
}

</mosaic_0001>

<bundles_post_ra>
// kernel: tpu_custom_call.1
= control target key start
LH: loop header
LB: loop body
LE: loop exit
PB: predicated region body
PF: predicated region fallthrough
CT: control target
= control target key end

     0   :  { %s9908_s0 = inlined_call_operand.hbm [shape: f32[16,256], index: 0, kind: input, shape index: {}]   ;;  %s9909_s1 = inlined_call_operand.hbm [shape: f32[8,8], index: 1, kind: input, shape index: {}]   ;;  %s9910_s2 = inlined_call_operand.hbm [shape: f32[2,1,256], index: 2, kind: input, shape index: {}]   ;;  %s9911_s3 = inlined_call_operand.vmem [shape: f32[2,1,256], index: 3, kind: input, shape index: {}]   ;;  %s9912_s4 = inlined_call_operand.hbm [shape: bf16[2,256,768], index: 4, kind: input, shape index: {}]   ;;  %s9913_s5 = inlined_call_operand.hbm [shape: f32[2,1,768], index: 5, kind: input, shape index: {}]   ;;  %s9914_s6 = inlined_call_operand.hbm [shape: bf16[2,256,256], index: 6, kind: input, shape index: {}]   ;;  %s9915_s7 = inlined_call_operand.hbm [shape: f32[2,1,256], index: 7, kind: input, shape index: {}]   ;;  %s9916_s8 = inlined_call_operand.hbm [shape: f32[2,1,256], index: 8, kind: input, shape index: {}]   ;;  %s9917_s9 = inlined_call_operand.hbm [shape: f32[2,1,256], index: 9, kind: input, shape index: {}]   ;;  %s9918_s10 = inlined_call_operand.hbm [shape: bf16[2,256,1024], index: 10, kind: input, shape index: {}]   ;;  %s9919_s11 = inlined_call_operand.vmem [shape: f32[2,1,1024], index: 11, kind: input, shape index: {}]   ;;  %s9920_s12 = inlined_call_operand.hbm [shape: bf16[2,1024,256], index: 12, kind: input, shape index: {}]   ;;  %s9921_s13 = inlined_call_operand.hbm [shape: f32[2,1,256], index: 13, kind: input, shape index: {}]   ;;  %s9922_s14 = inlined_call_operand.vmem [shape: f32[1,256], index: 14, kind: input, shape index: {}]   ;;  %s9923_s15 = inlined_call_operand.vmem [shape: f32[1,256], index: 15, kind: input, shape index: {}]   ;;  %s9924_s16 = inlined_call_operand.hbm [shape: f32[16,256], index: 16, kind: output, shape index: {}]  }
   0x1   :  { %9939 = sst [smem:[#allocation36_spill]] %s9908_s0 }
   0x2   :  { %9940 = sst [smem:[#allocation37_spill]] %s9909_s1 }
   0x3   :  { %9941 = sst [smem:[#allocation38_spill]] %s9910_s2 }
   0x4   :  { %9942 = sst [smem:[#allocation39_spill]] %s9911_s3 }
   0x5   :  { %9943 = sst [smem:[#allocation40_spill]] %s9912_s4 }
   0x6   :  { %9944 = sst [smem:[#allocation41_spill]] %s9913_s5 }
   0x7   :  { %9945 = sst [smem:[#allocation42_spill]] %s9919_s11 }
   0x8   :  { %9946 = sst [smem:[#allocation43_spill]] %s9921_s13 }
   0x9   :  { %9947 = sst [smem:[#allocation44_spill]] %s9922_s14 }
   0xa   :  { %9948 = sst [smem:[#allocation45_spill]] %s9923_s15 }
   0xb   :  { %9949 = sst [smem:[#allocation46_spill]] %s9924_s16 }
   0xc   :  { %21 = vsyncpa [#allocation5], 0 }
   0xd   :  { %22 = vsyncpa [#allocation8], 0 }
   0xe   :  { %23 = vsyncpa [#allocation6], 0  ;;  %s8511_s21 = smov 0   ;;  %s8513_s22 = smov 0  }
   0xf   :  { %s8515_s23 = smov 0   ;;  %s8517_s24 = smov 0  }
  0x10   :  { %s8519_s25 = smov 0   ;;  %s8521_s26 = smov 0  }
  0x11   :  { %s8523_s27 = smov 0   ;;  %s8525_s28 = smov 0  }
  0x12 LB: > { %9950 = sst [smem:[#allocation24_spill]] %s8372_s22  ;;  %s8550_s29 = sadd.s32 4294967295, %s8396_s28   ;;  %s8396_s28 = sphi %s8525_s28, %s29_s28   ;;  %s8392_s27 = sphi %s8523_s27, %s10001_s27   ;;  %s8388_s26 = sphi %s8521_s26, %s10003_s26   ;;  %s8384_s25 = sphi %s8519_s25, %s9999_s25   ;;  %s8380_s24 = sphi %s8517_s24, %s10002_s24   ;;  %s8376_s23 = sphi %s8515_s23, %s9998_s23   ;;  %s8372_s22 = sphi %s8513_s22, %s9997_s22   ;;  %s8368_s21 = sphi %s8511_s21, %s9996_s21  }
  0x13   : > { %9951 = sst [smem:[#allocation25_spill]] %s8376_s23  ;;  %s38_s30 = sadd.s32 1, %s8388_s26 }
  0x14   : > { %9952 = sst [smem:[#allocation26_spill]] %s8380_s24  ;;  %p39_p0 = scmp.ge.s32.totalorder %s38_s30, 2 }
  0x15   : > { %9953 = sst [smem:[#allocation27_spill]] %s8384_s25  ;;  %s41_s0 = sadd.s32 1, %s8392_s27 }
  0x16   : > { %9954 = sst [smem:[#allocation28_spill]] %s8392_s27  ;;  %s90_s17 = sadd.s32 1, %s8376_s23 }
  0x17   : > { %9955 = sst [smem:[#allocation29_spill]] %s8396_s28  ;;  %p97_p1 = scmp.ne.s32.totalorder %s8376_s23, %s8372_s22 }
  0x18   : > { %9956 = sst [smem:[#allocation30_spill]] %s8550_s29  ;;  %s10005_s30 = smov (%p39_p0, %s38_s30), 0 }
  0x19   : > { %9957 = sst [smem:[#allocation31_spill]] %s10005_s30  ;;  %s10007_s0 = smov (!%p39_p0, %s41_s0), %s8392_s27 }
  0x1a   : > { %s87_s18 = ssub.s32 %s8388_s26, %s10005_s30  ;;  %p98_p2 = scmp.eq.s32.totalorder %s8396_s28, 0 }
  0x1b   : > { %p43_p3 = scmp.ge.s32.totalorder %s10007_s0, 2  ;;  %p88_p4 = scmp.eq.s32.totalorder %s87_s18, 0 }
  0x1c   : > { %p8563_p5 = por %p98_p2, %p97_p1  ;;  %p103_p6 = scmp.ne.s32.totalorder %s8372_s22, %s8368_s21 }
  0x1d   : > { %s10009_s0 = smov (%p43_p3, %s10007_s0), 0  ;;  %p9927_p7 = scmp.eq.s32.totalorder %s8550_s29, 0 }
  0x1e   : > { %9959 = sst [smem:[#allocation32_spill]] %s10009_s0  ;;  %p6479_p8 = scmp.ge.s32.totalorder %s8396_s28, 1 }
  0x1f   : > { %s8571_s20 = scalar_select %p88_p4, %s8376_s23, %s90_s17  }
  0x20   : > { %p463_p9 = scmp.lt.s32.totalorder %s8396_s28, 5  ;;  %p8578_p10 = por %p9927_p7, %p103_p6 }
  0x21   : > { %9960 = sst [smem:[#allocation33_spill]] %s8571_s20  ;;  %s8398_s27 = smov [#allocation4]  }
  0x22   : > { %s9961_s30 = scalar_select %p8578_p10, 1, 0 }
  0x23   : > { %p8582_p11 = pnand %p6479_p8, %p463_p9  ;;  %s475_s21 = sshll.u32 %s8398_s27, 4  ;;  %s476_s21 = int_to_ptr.vmem [resolvable:$true] %s475_s21 }
  0x24   : > { %9962 = sst [smem:[#allocation34_spill]] %s9961_s30  ;;  %p7289_p13 = scmp.lt.s32.totalorder %s8396_s28, 4 }
  0x25   : > { %s9963_s18 = scalar_select %p8582_p11, 1, 0 }
  0x26   : > { %p7249_p12 = pneg %p8582_p11  ;;  %s506_s0 = sand.u32 1, %s8396_s28  }
  0x27   : > { %9964 = sst [smem:[#allocation35_spill]] %s9963_s18  ;;  %p8598_p1 = pnand %p7289_p13, %p8563_p5 }
  0x28   : > { %p8591_p0 = pnand %p7249_p12, %p9927_p7  ;;  %s8603_s16 = sand.u32 1, %s8376_s23  }
  0x29   : > { %s7973_s27 = scalar_lea.vmem %s476_s21, 512  ;;  %p7981_p8 = scmp.lt.s32.totalorder %s476_s21, %s476_s21 }
  0x2a   : > { %p7964_p2 = pneg %p8591_p0  ;;  %p7974_p3 = scmp.ne.s32.totalorder %s476_s21, %s7973_s27 }
  0x2b   : > { %p7982_p9 = scmp.lt.s32.totalorder %s7973_s27, %s7973_s27 }
  0x2c   : > { %p7976_p4 = pnand %p7974_p3, %p7964_p2 }
  0x2d   : > { %p7983_p12 = por %p7982_p9, %p7981_p8 }
  0x2e   : > { %p7977_p6 = pneg %p7976_p4 }
  0x30   : > { %p7984_p7 = pnand %p7983_p12, %p7977_p6 }
  0x32   : > { %7987 = shalt.err (!%p7984_p7)
}
  0x33   : > { %s8399_s19 = smov 256   ;;  %s8400_s23 = smov 16  }
  0x34   : > { %s9967_s14 = sld [smem:[#allocation36_spill]]  ;;  %s8616_s25 = sshll.u32 %s8603_s16, 1 }
  0x35   : > { %s8619_s11 = sshll.u32 %s8388_s26, 5  ;;  %s9968_s2 = sld [smem:[#allocation38_spill]] }
  0x36   : > { %s510_s30 = scalar_lea.vmem [#allocation9], %s8616_s25  ;;  %s7211_s29 = smul.u32 768, %s8603_s16 }
  0x37   : > { %s518_s22 = sshll.u32 %s510_s30, 4  ;;  %s8627_s18 = scalar_lea.sflag [#allocation5], %s506_s0  ;;  %s519_s22 = int_to_ptr.vmem [resolvable:$true] %s518_s22 }
  0x38   : > { %p8631_p5 = pneg %p8598_p1 }
  0x3a   : > { %7252 = dma.hbm_to_vmem [thread:$0]  (!%p8591_p0), %s9967_s14, 512, %s476_s21, [#allocation5], %s8399_s19, %s8399_s19, %s8400_s23  }
  0x3b   : > { %s516_s24 = scalar_lea.hbm %s9968_s2, %s8619_s11  ;;  %s8001_s14 = scalar_lea.vmem %s519_s22, 32 }
  0x3c   : > { %p8002_p7 = scmp.ne.s32.totalorder %s519_s22, %s8001_s14  ;;  %s8401_s23 = smov [#allocation9]  }
  0x3d   : > { %s8006_s3 = sshll.u32 %s8401_s23, 4  ;;  %s8007_s3 = int_to_ptr.vmem [resolvable:$false] %s8006_s3 }
  0x3e   : > { %p8004_p13 = pnand %p8002_p7, %p8631_p5  ;;  %s8008_s28 = scalar_lea.vmem %s8007_s3, 64 }
  0x3f   : > { %p8009_p4 = scmp.lt.s32.totalorder %s519_s22, %s8007_s3  ;;  %p8010_p6 = scmp.lt.s32.totalorder %s8008_s28, %s8001_s14 }
  0x40   : > { %p8005_p3 = pneg %p8004_p13 }
  0x41   : > { %p8011_p8 = por %p8010_p6, %p8009_p4 }
  0x43   : > { %p8012_p9 = pnand %p8011_p8, %p8005_p3 }
  0x45   : > { %8015 = shalt.err (!%p8012_p9)
}
  0x46   : > { %7259 = dma.hbm_to_vmem [thread:$0]  (!%p8598_p1), %s516_s24, 32, %s519_s22, %s8627_s18  }
  0x47   : > { %s7212_s30 = smul.u32 12288, %s8388_s26  ;;  %s536_s0 = scalar_lea.vmem [#allocation10], %s7211_s29 }
  0x48   : > { %s543_s21 = sshll.u32 %s536_s0, 4  ;;  %s9970_s4 = sld [smem:[#allocation40_spill]]  ;;  %s544_s21 = int_to_ptr.vmem [resolvable:$true] %s543_s21 }
  0x49   : > { %s7213_s3 = smul.u32 6, %s8603_s16  ;;  %s8029_s14 = scalar_lea.vmem %s544_s21, 12288 }
  0x4a   : > { %p8030_p12 = scmp.ne.s32.totalorder %s544_s21, %s8029_s14  ;;  %s8402_s28 = smov [#allocation10]  }
  0x4b   : > { %s8034_s2 = sshll.u32 %s8402_s28, 4  ;;  %s8035_s2 = int_to_ptr.vmem [resolvable:$false] %s8034_s2 }
  0x4c   : > { %p8032_p7 = pnand %p8030_p12, %p8631_p5  ;;  %s8036_s1 = scalar_lea.vmem %s8035_s2, 24576 }
  0x4d   : > { %p8037_p3 = scmp.lt.s32.totalorder %s544_s21, %s8035_s2  ;;  %p8038_p4 = scmp.lt.s32.totalorder %s8036_s1, %s8029_s14 }
  0x4e   : > { %s542_s23 = scalar_lea.hbm %s9970_s4, %s7212_s30  ;;  %p8033_p13 = pneg %p8032_p7 }
  0x4f   : > { %p8039_p6 = por %p8038_p4, %p8037_p3 }
  0x51   : > { %p8040_p8 = pnand %p8039_p6, %p8033_p13 }
  0x53   : > { %8043 = shalt.err (!%p8040_p8)
}
  0x54   : > { %s8403_s22 = smov 384   ;;  %s8404_s24 = smov 24  }
  0x55   : > { %7262 = dma.hbm_to_vmem [thread:$0]  (!%p8598_p1), %s542_s23, 12288, %s544_s21, %s8627_s18, %s8403_s22, %s8403_s22, %s8404_s24  }
  0x56   : > { %s7214_s29 = smul.u32 96, %s8388_s26  ;;  %s557_s30 = scalar_lea.vmem [#allocation11], %s7213_s3 }
  0x57   : > { %s565_s0 = sshll.u32 %s557_s30, 4  ;;  %s6488_s19 = sshll.u32 %s8603_s16, 8  ;;  %s566_s0 = int_to_ptr.vmem [resolvable:$true] %s565_s0 }
  0x58   : > { %s9971_s5 = sld [smem:[#allocation41_spill]]  ;;  %s8057_s2 = scalar_lea.vmem %s566_s0, 96 }
  0x59   : > { %p8058_p9 = scmp.ne.s32.totalorder %s566_s0, %s8057_s2  ;;  %s8405_s14 = smov [#allocation11]  }
  0x5a   : > { %s8062_s4 = sshll.u32 %s8405_s14, 4  ;;  %s8063_s4 = int_to_ptr.vmem [resolvable:$false] %s8062_s4 }
  0x5b   : > { %p8060_p12 = pnand %p8058_p9, %p8631_p5  ;;  %s8064_s13 = scalar_lea.vmem %s8063_s4, 192 }
  0x5c   : > { %p8065_p13 = scmp.lt.s32.totalorder %s566_s0, %s8063_s4  ;;  %p8066_p3 = scmp.lt.s32.totalorder %s8064_s13, %s8057_s2 }
  0x5d   : > { %p8061_p7 = pneg %p8060_p12 }
  0x5e   : > { %s563_s1 = scalar_lea.hbm %s9971_s5, %s7214_s29  ;;  %p8067_p4 = por %p8066_p3, %p8065_p13 }
  0x60   : > { %p8068_p6 = pnand %p8067_p4, %p8061_p7 }
  0x62   : > { %8071 = shalt.err (!%p8068_p6)
}
  0x63   : > { %7265 = dma.hbm_to_vmem [thread:$0]  (!%p8598_p1), %s563_s1, 96, %s566_s0, %s8627_s18  }
  0x64   : > { %s6948_s21 = sshll.u32 %s8388_s26, 12  ;;  %s576_s24 = scalar_lea.vmem [#allocation12], %s6488_s19 }
  0x65   : > { %s582_s22 = scalar_lea.hbm %s9914_s6, %s6948_s21  ;;  %s583_s29 = sshll.u32 %s576_s24, 4  ;;  %s584_s29 = int_to_ptr.vmem [resolvable:$true] %s583_s29 }
  0x66   : > { %s8085_s30 = scalar_lea.vmem %s584_s29, 4096  ;;  %s8406_s4 = smov [#allocation12]  }
  0x67   : > { %p8086_p8 = scmp.ne.s32.totalorder %s584_s29, %s8085_s30  ;;  %s8090_s13 = sshll.u32 %s8406_s4, 4  ;;  %s8091_s13 = int_to_ptr.vmem [resolvable:$false] %s8090_s13 }
  0x68   : > { %s8092_s27 = scalar_lea.vmem %s8091_s13, 8192  ;;  %p8093_p7 = scmp.lt.s32.totalorder %s584_s29, %s8091_s13 }
  0x69   : > { %p8088_p9 = pnand %p8086_p8, %p8631_p5  ;;  %p8094_p13 = scmp.lt.s32.totalorder %s8092_s27, %s8085_s30 }
  0x6b   : > { %p8089_p12 = pneg %p8088_p9  ;;  %p8095_p3 = por %p8094_p13, %p8093_p7 }
  0x6d   : > { %p8096_p4 = pnand %p8095_p3, %p8089_p12 }
  0x6f   : > { %8099 = shalt.err (!%p8096_p4)
}
  0x70   : > { %s9938_s0 = smov 128   ;;  %s8408_s19 = smov 8  }
  0x71   : > { %7268 = dma.hbm_to_vmem [thread:$0]  (!%p8598_p1), %s582_s22, 4096, %s584_s29, %s8627_s18, %s9938_s0, %s9938_s0, %s8408_s19  }
  0x72   : > { %s603_s2 = scalar_lea.hbm %s9915_s7, %s8619_s11  ;;  %s597_s14 = scalar_lea.vmem [#allocation13], %s8616_s25 }
  0x73   : > { %s605_s21 = sshll.u32 %s597_s14, 4  ;;  %s8409_s3 = smov [#allocation13]   ;;  %s606_s21 = int_to_ptr.vmem [resolvable:$true] %s605_s21 }
  0x74   : > { %s8113_s23 = scalar_lea.vmem %s606_s21, 32  ;;  %s8118_s24 = sshll.u32 %s8409_s3, 4  ;;  %s8119_s24 = int_to_ptr.vmem [resolvable:$false] %s8118_s24 }
  0x75   : > { %p8114_p6 = scmp.ne.s32.totalorder %s606_s21, %s8113_s23  ;;  %s8120_s30 = scalar_lea.vmem %s8119_s24, 64 }
  0x76   : > { %p8121_p12 = scmp.lt.s32.totalorder %s606_s21, %s8119_s24  ;;  %p8122_p7 = scmp.lt.s32.totalorder %s8120_s30, %s8113_s23 }
  0x77   : > { %p8116_p8 = pnand %p8114_p6, %p8631_p5 }
  0x78   : > { %p8123_p13 = por %p8122_p7, %p8121_p12 }
  0x79   : > { %p8117_p9 = pneg %p8116_p8 }
  0x7b   : > { %p8124_p3 = pnand %p8123_p13, %p8117_p9 }
  0x7d   : > { %8127 = shalt.err (!%p8124_p3)
}
  0x7e   : > { %7271 = dma.hbm_to_vmem [thread:$0]  (!%p8598_p1), %s603_s2, 32, %s606_s21, %s8627_s18  }
  0x7f   : > { %s622_s4 = scalar_lea.hbm %s9916_s8, %s8619_s11  ;;  %s616_s13 = scalar_lea.vmem [#allocation14], %s8616_s25 }
  0x80   : > { %s624_s27 = sshll.u32 %s616_s13, 4  ;;  %s8410_s1 = smov [#allocation14]   ;;  %s625_s27 = int_to_ptr.vmem [resolvable:$true] %s624_s27 }
  0x81   : > { %s8141_s28 = scalar_lea.vmem %s625_s27, 32  ;;  %s8146_s14 = sshll.u32 %s8410_s1, 4  ;;  %s8147_s14 = int_to_ptr.vmem [resolvable:$false] %s8146_s14 }
  0x82   : > { %p8142_p4 = scmp.ne.s32.totalorder %s625_s27, %s8141_s28  ;;  %s8148_s23 = scalar_lea.vmem %s8147_s14, 64 }
  0x83   : > { %p8149_p9 = scmp.lt.s32.totalorder %s625_s27, %s8147_s14  ;;  %p8150_p12 = scmp.lt.s32.totalorder %s8148_s23, %s8141_s28 }
  0x84   : > { %p8144_p6 = pnand %p8142_p4, %p8631_p5 }
  0x85   : > { %p8151_p7 = por %p8150_p12, %p8149_p9 }
  0x86   : > { %p8145_p8 = pneg %p8144_p6 }
  0x88   : > { %p8152_p13 = pnand %p8151_p7, %p8145_p8 }
  0x8a   : > { %8155 = shalt.err (!%p8152_p13)
}
  0x8b   : > { %7274 = dma.hbm_to_vmem [thread:$0]  (!%p8598_p1), %s622_s4, 32, %s625_s27, %s8627_s18  }
  0x8c   : > { %s641_s3 = scalar_lea.hbm %s9917_s9, %s8619_s11  ;;  %s635_s24 = scalar_lea.vmem [#allocation15], %s8616_s25 }
  0x8d   : > { %s643_s30 = sshll.u32 %s635_s24, 4  ;;  %s6500_s22 = sshll.u32 %s8603_s16, 10  ;;  %s644_s30 = int_to_ptr.vmem [resolvable:$true] %s643_s30 }
  0x8e   : > { %s8169_s29 = scalar_lea.vmem %s644_s30, 32  ;;  %s8411_s13 = smov [#allocation15]  }
  0x8f   : > { %p8170_p3 = scmp.ne.s32.totalorder %s644_s30, %s8169_s29  ;;  %s8174_s28 = sshll.u32 %s8411_s13, 4  ;;  %s8175_s28 = int_to_ptr.vmem [resolvable:$false] %s8174_s28 }
  0x90   : > { %s8176_s1 = scalar_lea.vmem %s8175_s28, 64  ;;  %p8177_p8 = scmp.lt.s32.totalorder %s644_s30, %s8175_s28 }
  0x91   : > { %p8172_p4 = pnand %p8170_p3, %p8631_p5  ;;  %p8178_p9 = scmp.lt.s32.totalorder %s8176_s1, %s8169_s29 }
  0x93   : > { %p8173_p6 = pneg %p8172_p4  ;;  %p8179_p12 = por %p8178_p9, %p8177_p8 }
  0x95   : > { %p8180_p7 = pnand %p8179_p12, %p8173_p6 }
  0x97   : > { %8183 = shalt.err (!%p8180_p7)
}
  0x98   : > { %7277 = dma.hbm_to_vmem [thread:$0]  (!%p8598_p1), %s641_s3, 32, %s644_s30, %s8627_s18  }
  0x99   : > { %s6952_s4 = sshll.u32 %s8388_s26, 14  ;;  %s654_s2 = scalar_lea.vmem [#allocation16], %s6500_s22 }
  0x9a   : > { %s660_s23 = scalar_lea.hbm %s9918_s10, %s6952_s4  ;;  %s661_s21 = sshll.u32 %s654_s2, 4  ;;  %s662_s21 = int_to_ptr.vmem [resolvable:$true] %s661_s21 }
  0x9b   : > { %s8197_s24 = scalar_lea.vmem %s662_s21, 16384  ;;  %s8412_s29 = smov [#allocation16]  }
  0x9c   : > { %p8198_p13 = scmp.ne.s32.totalorder %s662_s21, %s8197_s24  ;;  %s8202_s13 = sshll.u32 %s8412_s29, 4  ;;  %s8203_s13 = int_to_ptr.vmem [resolvable:$false] %s8202_s13 }
  0x9d   : > { %s8204_s28 = scalar_lea.vmem %s8203_s13, 32768  ;;  %p8205_p6 = scmp.lt.s32.totalorder %s662_s21, %s8203_s13 }
  0x9e   : > { %p8200_p3 = pnand %p8198_p13, %p8631_p5  ;;  %p8206_p8 = scmp.lt.s32.totalorder %s8204_s28, %s8197_s24 }
  0xa0   : > { %p8201_p4 = pneg %p8200_p3  ;;  %p8207_p9 = por %p8206_p8, %p8205_p6 }
  0xa2   : > { %p8208_p12 = pnand %p8207_p9, %p8201_p4 }
  0xa4   : > { %8211 = shalt.err (!%p8208_p12)
}
  0xa5   : > { %s8413_s3 = smov 512   ;;  %s8414_s30 = smov 32  }
  0xa6   : > { %7280 = dma.hbm_to_vmem [thread:$0]  (!%p8598_p1), %s660_s23, 16384, %s662_s21, %s8627_s18, %s8413_s3, %s8413_s3, %s8414_s30  }
  0xa7   : > { %s688_s14 = scalar_lea.hbm %s9920_s12, %s6952_s4  ;;  %s682_s2 = scalar_lea.vmem [#allocation17], %s6500_s22 }
  0xa8   : > { %s689_s29 = sshll.u32 %s682_s2, 4  ;;  %s8415_s13 = smov [#allocation17]   ;;  %s690_s29 = int_to_ptr.vmem [resolvable:$true] %s689_s29 }
  0xa9   : > { %s8225_s24 = scalar_lea.vmem %s690_s29, 16384  ;;  %s8230_s28 = sshll.u32 %s8415_s13, 4  ;;  %s8231_s28 = int_to_ptr.vmem [resolvable:$false] %s8230_s28 }
  0xaa   : > { %p8226_p7 = scmp.ne.s32.totalorder %s690_s29, %s8225_s24  ;;  %s8232_s0 = scalar_lea.vmem %s8231_s28, 32768 }
  0xab   : > { %p8233_p4 = scmp.lt.s32.totalorder %s690_s29, %s8231_s28  ;;  %p8234_p6 = scmp.lt.s32.totalorder %s8232_s0, %s8225_s24 }
  0xac   : > { %p8228_p13 = pnand %p8226_p7, %p8631_p5 }
  0xad   : > { %p8235_p8 = por %p8234_p6, %p8233_p4 }
  0xae   : > { %p8229_p3 = pneg %p8228_p13 }
  0xb0   : > { %p8236_p9 = pnand %p8235_p8, %p8229_p3 }
  0xb2   : > { %8239 = shalt.err (!%p8236_p9)
}
  0xb3   : > { %s9972_s16 = smov 128   ;;  %s8416_s22 = smov [#allocation7]  }
  0xb4   : > { %7283 = dma.hbm_to_vmem [thread:$0]  (!%p8598_p1), %s688_s14, 16384, %s690_s29, %s8627_s18, %s9972_s16, %s9972_s16, %s8408_s19  }
  0xb5   : > { %s489_s4 = sshll.u32 %s8416_s22, 4  ;;  %s9973_s3 = sld [smem:[#allocation43_spill]]  ;;  %s490_s4 = int_to_ptr.vmem [resolvable:$true] %s489_s4 }
  0xb6   : > { %s8251_s0 = scalar_lea.vmem %s490_s4, 128  ;;  %p8259_p3 = scmp.lt.s32.totalorder %s490_s4, %s490_s4 }
  0xb7   : > { %p8252_p12 = scmp.ne.s32.totalorder %s490_s4, %s8251_s0  ;;  %p8260_p4 = scmp.lt.s32.totalorder %s8251_s0, %s8251_s0 }
  0xb9   : > { %p8254_p7 = pnand %p8252_p12, %p7964_p2  ;;  %p8261_p6 = por %p8260_p4, %p8259_p3 }
  0xbb   : > { %s709_s30 = scalar_lea.hbm %s9973_s3, %s8619_s11  ;;  %p8255_p13 = pneg %p8254_p7 }
  0xbd   : > { %p8262_p8 = pnand %p8261_p6, %p8255_p13 }
  0xbf   : > { %8265 = shalt.err (!%p8262_p8)
}
  0xc0   : > { %s9974_s27 = sld [smem:[#allocation37_spill]]  ;;  %s703_s11 = scalar_lea.vmem [#allocation18], %s8616_s25 }
  0xc1   : > { %s711_s14 = sshll.u32 %s703_s11, 4  ;;  %s8417_s29 = smov [#allocation18]   ;;  %s712_s14 = int_to_ptr.vmem [resolvable:$true] %s711_s14 }
  0xc2   : > { %s8279_s2 = scalar_lea.vmem %s712_s14, 32  ;;  %s8284_s24 = sshll.u32 %s8417_s29, 4  ;;  %s8285_s24 = int_to_ptr.vmem [resolvable:$false] %s8284_s24 }
  0xc3   : > { %p8280_p9 = scmp.ne.s32.totalorder %s712_s14, %s8279_s2  ;;  %s8286_s13 = scalar_lea.vmem %s8285_s24, 64 }
  0xc4   : > { %p8287_p7 = scmp.lt.s32.totalorder %s712_s14, %s8285_s24  ;;  %p8288_p13 = scmp.lt.s32.totalorder %s8286_s13, %s8279_s2 }
  0xc5   : > { %p8282_p2 = pnand %p8280_p9, %p8631_p5 }
  0xc6   : > { %7255 = dma.hbm_to_vmem [thread:$0]  (!%p8591_p0), %s9974_s27, 128, %s490_s4, [#allocation8]  }
  0xc7   : > { %p8283_p12 = pneg %p8282_p2  ;;  %p8289_p3 = por %p8288_p13, %p8287_p7 }
  0xc9   : > { %p8290_p4 = pnand %p8289_p3, %p8283_p12 }
  0xcb   : > { %8293 = shalt.err (!%p8290_p4)
}
  0xcc   : > { %7286 = dma.hbm_to_vmem [thread:$0]  (!%p8598_p1), %s709_s30, 32, %s712_s14, %s8627_s18  }
  0xcd   : > { %720 = sbr.rel (%p8582_p11) target bundleno = 3205 (0xc85), region = 84  ;;  %s9976_s17 = sld [smem:[#allocation30_spill]] (!%p8582_p11) }
  0xd3   : > { %p9977_p0 = scmp.eq.s32.totalorder %s9976_s17, 0 }
  0xd5   : > { %8351 = dma.done.wait (%p9977_p0), [#allocation5], 512   ;;  %p9978_p5 = pmov %p9977_p0 }
  0xd6   : > { %p9979_p6 = pmov %p9977_p0 }
  0xd7   : > { %8353 = vsyncadd (%p9978_p5), [#allocation5], 4294966784 }
  0xd8   : > { %8355 = dma.done.wait (%p9979_p6), [#allocation8], 128   ;;  %p9980_p8 = pmov %p9977_p0 }
  0xd9   : > { %s9981_s15 = sld [smem:[#allocation24_spill]]  ;;  %s730_s28 = sand.u32 1, %s9976_s17  }
  0xda   : > { %8357 = vsyncadd (%p9980_p8), [#allocation8], 4294967168  ;;  %s731_s22 = scalar_lea.sflag [#allocation5], %s730_s28 }
  0xdf   : > { %s732_s18 = sand.u32 1, %s9981_s15  }
  0xe0   : > { %s8757_s16 = sshll.u32 %s732_s18, 1 }
  0xe1   : > { %8359 = dma.done.wait (%p8578_p10), %s731_s22, 49408  }
  0xe2   : > { %8361 = vsyncadd (%p8578_p10), %s731_s22, 4294917888  ;;  %s9983_s23 = sld [smem:[#allocation26_spill]]  ;;  %s7215_s21 = smul.u32 768, %s732_s18 }
  0xe3   : > { %s6513_s3 = sshll.u32 %s732_s18, 8  ;;  %s7216_s30 = smul.u32 6, %s732_s18 }
  0xe4   : > { %s6517_s0 = sshll.u32 %s732_s18, 10  ;;  %s9984_s2 = sld [smem:[#allocation39_spill]] }
  0xe5   : > { %s9985_s25 = sld [smem:[#allocation42_spill]]  ;;  %s8776_s15 = scalar_lea.vmem [#allocation10], %s7215_s21 }
  0xe6   : > { %s8778_s20 = scalar_lea.vmem [#allocation11], %s7216_s30  ;;  %s8780_s28 = scalar_lea.vmem [#allocation12], %s6513_s3 }
  0xe7   : > { %s770_s18 = scalar_lea.vmem [#allocation13], %s8757_s16  ;;  %s779_s22 = scalar_lea.vmem [#allocation14], %s8757_s16 }
  0xe8   : > { %p912_p11 = scmp.lt.s32.totalorder %s9983_s23, 1  ;;  %s788_s4 = scalar_lea.vmem [#allocation15], %s8757_s16 }
  0xe9   : > { %s8787_s5 = scalar_lea.vmem [#allocation17], %s6517_s0  ;;  %p6522_p10 = scmp.ne.s32.totalorder %s9983_s23, 0 }
  0xea   : > { %s913_s19 = scalar_select %p912_p11, %s9983_s23, 1 }
  0xeb   : > { %924 = sbr.rel (%p6522_p10) target bundleno = 268 (0x10c), region = 136  ;;  %s9986_s21 = sld [smem:[#allocation27_spill]] (!%p6522_p10) }
  0xec   : > { %s6520_s1 = sshll.u32 %s913_s19, 1  ;;  %s6521_s27 = sshll.u32 %s913_s19, 3 }
  0xed   : > { %s8769_s29 = scalar_lea.vmem %s9984_s2, %s6520_s1  ;;  %s8774_s17 = scalar_lea.vmem %s9985_s25, %s6521_s27 }
  0xee   : > { %s8785_s19 = scalar_lea.vmem [#allocation16], %s6517_s0  ;;  %s815_s1 = scalar_lea.vmem [#allocation18], %s8757_s16 }
  0xf0   : > { %v925_v0 = vld [vmem:[#allocation4] sm:$0xff]  ;;  %v926_v1 = vld [vmem:[#allocation4 + $0x8] sm:$0xff]  ;;  %v927_v2 = vld [vmem:[#allocation4 + $0x10] sm:$0xff] }
  0xf1   : > { %v928_v3 = vld [vmem:[#allocation4 + $0x18] sm:$0xff]  ;;  %p6523_p1 = scmp.ne.s32.totalorder %s9986_s21, 0 }
  0xf3   : > { %932 = sbr.rel (%p6523_p1) target bundleno = 250 (0xfa), region = 140 }
  0xf8   : > { %933 = vst [vmem:[#allocation2 + $0x10] sm:$0xff] %v925_v0  ;;  %934 = vst [vmem:[#allocation2] sm:$0xff] %v926_v1 }
  0xf9   : > { %935 = vst [vmem:[#allocation2 + $0x18] sm:$0xff] %v927_v2  ;;  %936 = vst [vmem:[#allocation2 + $0x8] sm:$0xff] %v928_v3 }
  0xfa PF: > { %s9987_s3 = sld [smem:[#allocation27_spill]] }
 0x100   : > { %p6524_p9 = scmp.le.s32.totalorder %s9987_s3, 0 }
 0x102   : > { %940 = sbr.rel (%p6524_p9) target bundleno = 268 (0x10c), region = 144 }
 0x107   : > { %v941_v4 = vld [vmem:[#allocation3] sm:$0xff]  ;;  %v942_v5 = vld [vmem:[#allocation3 + $0x18] sm:$0xff]  ;;  %v943_v6 = vld [vmem:[#allocation3 + $0x8] sm:$0xff] }
 0x108   : > { %v945_v7 = vadd.f32 %v941_v4, %v925_v0  ;;  %v946_v8 = vadd.f32 %v942_v5, %v926_v1  ;;  %v947_v9 = vadd.f32 %v943_v6, %v927_v2  ;;  %v944_v10 = vld [vmem:[#allocation3 + $0x10] sm:$0xff] }
 0x109   : > { %v948_v11 = vadd.f32 %v944_v10, %v928_v3 }
 0x10a   : > { %949 = vst [vmem:[#allocation2 + $0x10] sm:$0xff] %v945_v7  ;;  %950 = vst [vmem:[#allocation2] sm:$0xff] %v946_v8 }
 0x10b   : > { %951 = vst [vmem:[#allocation2 + $0x18] sm:$0xff] %v947_v9  ;;  %952 = vst [vmem:[#allocation2 + $0x8] sm:$0xff] %v948_v11 }
 0x10c PF: > { %v7466_v18 = vld [vmem:[%s8776_s15 + $0x154] ss:$24 sps:$4 sm:$0xff]   ;;  %v7468_v19 = vld [vmem:[%s8776_s15 + $0x150] ss:$24 sps:$4 sm:$0xff]   ;;  %v7472_v22 = vld [vmem:[%s8776_s15 + $0x124] ss:$24 sps:$4 sm:$0xff]  }
 0x10d   : > { %v7469_v20 = vld [vmem:[%s8776_s15 + $0x15c] ss:$24 sps:$4 sm:$0xff]   ;;  %v7471_v21 = vld [vmem:[%s8776_s15 + $0x158] ss:$24 sps:$4 sm:$0xff]   ;;  %1632 = vmatprep.subr.bf16.mxu0 %v7466_v18  ;;  %v7475_v23 = vld [vmem:[%s8776_s15 + $0x12c] ss:$24 sps:$4 sm:$0xff]  }
 0x10e   : > { %1675 = vmatprep.subr.bf16.mxu1 %v7469_v20  ;;  %1633 = vmatpush1.bf16.msra.mxu0 %v7468_v19  ;;  %v7474_v24 = vld [vmem:[%s8776_s15 + $0x120] ss:$24 sps:$4 sm:$0xff]   ;;  %v7478_v26 = vld [vmem:[%s8776_s15 + $0xf4] ss:$24 sps:$4 sm:$0xff]   ;;  %v7480_v28 = vld [vmem:[%s8776_s15 + $0xf0] ss:$24 sps:$4 sm:$0xff]  }
 0x10f   : > { %1676 = vmatpush1.bf16.msra.mxu1 %v7471_v21  ;;  %v7477_v25 = vld [vmem:[%s8776_s15 + $0x128] ss:$24 sps:$4 sm:$0xff]   ;;  %1634 = vmatprep.subr.bf16.mxu0 %v7472_v22  ;;  %v7481_v27 = vld [vmem:[%s8776_s15 + $0xfc] ss:$24 sps:$4 sm:$0xff]   ;;  %v7483_v29 = vld [vmem:[%s8776_s15 + $0xf8] ss:$24 sps:$4 sm:$0xff]  }
 0x110   : > { %1677 = vmatprep.subr.bf16.mxu1 %v7475_v23  ;;  %v7484_v30 = vld [vmem:[%s8776_s15 + $0xc4] ss:$24 sps:$4 sm:$0xff]   ;;  %v7486_v32 = vld [vmem:[%s8776_s15 + $0xc0] ss:$24 sps:$4 sm:$0xff]   ;;  %v7490_v34 = vld [vmem:[%s8776_s15 + $0x94] ss:$24 sps:$4 sm:$0xff]  }
 0x111   : > { %v8793_v12 = vld [vmem:[#allocation2 + $0x10] sm:$0xff]  ;;  %v8795_v13 = vld [vmem:[#allocation2] sm:$0xff]  ;;  %s9988_s23 = scalar_lea.vmem [#allocation9], %s8757_s16  ;;  %vm8419_vm0 = vmmov 0   ;;  %vm1913_vm1 = vcmask 261120   ;;  %s8420_s30 = smov 96  }
 0x112   : > { %v8797_v14 = vld [vmem:[#allocation2 + $0x18] sm:$0xff]  ;;  %v959_v15 = vadd.f32 %v8795_v13, %v8793_v12  ;;  %v8801_v16 = vld [vmem:[#allocation2 + $0x8] sm:$0xff]  ;;  %1635 = vmatpush1.bf16.msra.mxu0 %v7474_v24  ;;  %s8421_s0 = smov 64   ;;  %s8422_s27 = smov 32   ;;  %vm2895_vm2 = vcmask 1043456   ;;  %vm2683_vm3 = vcmask 64512  }
 0x113   : > { %v962_v17 = vadd.f32 %v8801_v16, %v8797_v14  ;;  %1678 = vmatpush1.bf16.msra.mxu1 %v7477_v25  ;;  %1636 = vmatprep.subr.bf16.mxu0 %v7478_v26  ;;  %v7487_v31 = vld [vmem:[%s8776_s15 + $0xcc] ss:$24 sps:$4 sm:$0xff]   ;;  %v7489_v33 = vld [vmem:[%s8776_s15 + $0xc8] ss:$24 sps:$4 sm:$0xff]   ;;  %v7493_v35 = vld [vmem:[%s8776_s15 + $0x9c] ss:$24 sps:$4 sm:$0xff]  }
 0x114   : > { %960 = vadd.xlane.f32.xlu0 %v959_v15  ;;  %1679 = vmatprep.subr.bf16.mxu1 %v7481_v27  ;;  %v7492_v36 = vld [vmem:[%s8776_s15 + $0x90] ss:$24 sps:$4 sm:$0xff]   ;;  %v7496_v38 = vld [vmem:[%s8776_s15 + $0x64] ss:$24 sps:$4 sm:$0xff]   ;;  %v7498_v40 = vld [vmem:[%s8776_s15 + $0x60] ss:$24 sps:$4 sm:$0xff]  }
 0x115   : > { %v7495_v37 = vld [vmem:[%s8776_s15 + $0x98] ss:$24 sps:$4 sm:$0xff]   ;;  %v7499_v39 = vld [vmem:[%s8776_s15 + $0x6c] ss:$24 sps:$4 sm:$0xff]   ;;  %v7501_v41 = vld [vmem:[%s8776_s15 + $0x68] ss:$24 sps:$4 sm:$0xff]  }
 0x116   : > { %1637 = vmatpush1.bf16.msra.mxu0 %v7480_v28  ;;  %v7502_v42 = vld [vmem:[%s8776_s15 + $0x34] ss:$24 sps:$4 sm:$0xff]   ;;  %v7504_v44 = vld [vmem:[%s8776_s15 + $0x30] ss:$24 sps:$4 sm:$0xff]   ;;  %v7508_v46 = vld [vmem:[%s8776_s15 + $0x4] ss:$24 sps:$4 sm:$0xff]  }
 0x117   : > { %1680 = vmatpush1.bf16.msra.mxu1 %v7483_v29  ;;  %1638 = vmatprep.subr.bf16.mxu0 %v7484_v30  ;;  %v7505_v43 = vld [vmem:[%s8776_s15 + $0x3c] ss:$24 sps:$4 sm:$0xff]   ;;  %v7507_v45 = vld [vmem:[%s8776_s15 + $0x38] ss:$24 sps:$4 sm:$0xff]   ;;  %v7511_v47 = vld [vmem:[%s8776_s15 + $0xc] ss:$24 sps:$4 sm:$0xff]  }
 0x118   : > { %963 = vadd.xlane.f32.xlu0 %v962_v17  ;;  %1681 = vmatprep.subr.bf16.mxu1 %v7487_v31  ;;  %v7510_v48 = vld [vmem:[%s8776_s15] ss:$24 sps:$4 sm:$0xff]   ;;  %v7514_v50 = vld [vmem:[%s8776_s15 + $0x2d4] ss:$24 sps:$4 sm:$0xff]   ;;  %v7516_v52 = vld [vmem:[%s8776_s15 + $0x2d0] ss:$24 sps:$4 sm:$0xff]  }
 0x119   : > { %v7513_v49 = vld [vmem:[%s8776_s15 + $0x8] ss:$24 sps:$4 sm:$0xff]   ;;  %v7517_v51 = vld [vmem:[%s8776_s15 + $0x2dc] ss:$24 sps:$4 sm:$0xff]   ;;  %v7519_v3 = vld [vmem:[%s8776_s15 + $0x2d8] ss:$24 sps:$4 sm:$0xff]  }
 0x11a   : > { %1639 = vmatpush1.bf16.msra.mxu0 %v7486_v32  ;;  %v7520_v4 = vld [vmem:[%s8776_s15 + $0x2a4] ss:$24 sps:$4 sm:$0xff]   ;;  %v7522_v5 = vld [vmem:[%s8776_s15 + $0x2a0] ss:$24 sps:$4 sm:$0xff]   ;;  %v7526_v8 = vld [vmem:[%s8776_s15 + $0x274] ss:$24 sps:$4 sm:$0xff]  }
 0x11b   : > { %1682 = vmatpush1.bf16.msra.mxu1 %v7489_v33  ;;  %1640 = vmatprep.subr.bf16.mxu0 %v7490_v34  ;;  %v7523_v6 = vld [vmem:[%s8776_s15 + $0x2ac] ss:$24 sps:$4 sm:$0xff]   ;;  %v7525_v7 = vld [vmem:[%s8776_s15 + $0x2a8] ss:$24 sps:$4 sm:$0xff]   ;;  %v7529_v10 = vld [vmem:[%s8776_s15 + $0x27c] ss:$24 sps:$4 sm:$0xff]  }
 0x11c   : > { %1683 = vmatprep.subr.bf16.mxu1 %v7493_v35  ;;  %v7528_v9 = vld [vmem:[%s8776_s15 + $0x270] ss:$24 sps:$4 sm:$0xff]   ;;  %v7541_v17 = vld [vmem:[%s8776_s15 + $0x21c] ss:$24 sps:$4 sm:$0xff]   ;;  %v7547_v21 = vld [vmem:[%s8776_s15 + $0x1ec] ss:$24 sps:$4 sm:$0xff]  }
 0x11d   : > { %v7531_v11 = vld [vmem:[%s8776_s15 + $0x278] ss:$24 sps:$4 sm:$0xff]   ;;  %v7537_v15 = vld [vmem:[%s8776_s15 + $0x248] ss:$24 sps:$4 sm:$0xff]   ;;  %v7544_v20 = vld [vmem:[%s8776_s15 + $0x1e4] ss:$24 sps:$4 sm:$0xff]  }
 0x11e   : > { %1641 = vmatpush1.bf16.msra.mxu0 %v7492_v36  ;;  %v7540_v18 = vld [vmem:[%s8776_s15 + $0x210] ss:$24 sps:$4 sm:$0xff]   ;;  %v7546_v22 = vld [vmem:[%s8776_s15 + $0x1e0] ss:$24 sps:$4 sm:$0xff]   ;;  %v7550_v24 = vld [vmem:[%s8776_s15 + $0x1b4] ss:$24 sps:$4 sm:$0xff]  }
 0x11f   : > { %1684 = vmatpush1.bf16.msra.mxu1 %v7495_v37  ;;  %1642 = vmatprep.subr.bf16.mxu0 %v7496_v38  ;;  %v7543_v19 = vld [vmem:[%s8776_s15 + $0x218] ss:$24 sps:$4 sm:$0xff]   ;;  %v7549_v23 = vld [vmem:[%s8776_s15 + $0x1e8] ss:$24 sps:$4 sm:$0xff]   ;;  %v7553_v25 = vld [vmem:[%s8776_s15 + $0x1bc] ss:$24 sps:$4 sm:$0xff]  }
 0x120   : > { %1685 = vmatprep.subr.bf16.mxu1 %v7499_v39  ;;  %v7552_v26 = vld [vmem:[%s8776_s15 + $0x1b0] ss:$24 sps:$4 sm:$0xff]   ;;  %v7556_v28 = vld [vmem:[%s8776_s15 + $0x184] ss:$24 sps:$4 sm:$0xff]   ;;  %v7558_v30 = vld [vmem:[%s8776_s15 + $0x180] ss:$24 sps:$4 sm:$0xff]   ;;  %v993_v39 = vlaneseq }
 0x121   : > { %v7555_v27 = vld [vmem:[%s8776_s15 + $0x1b8] ss:$24 sps:$4 sm:$0xff]   ;;  %v7559_v29 = vld [vmem:[%s8776_s15 + $0x18c] ss:$24 sps:$4 sm:$0xff]   ;;  %v7561_v31 = vld [vmem:[%s8776_s15 + $0x188] ss:$24 sps:$4 sm:$0xff]  }
 0x122   : > { %1643 = vmatpush1.bf16.msra.mxu0 %v7498_v40  ;;  %v7564_v32 = vld [vmem:[%s8776_s15 + $0x164] ss:$24 sps:$4 sm:$0xff]   ;;  %v8890_v40 = vshrl.u32 %v993_v39, 7  ;;  %vm3679_vm4 = vcmask 523264   ;;  %vm3682_vm5 = vcmask 785408  }
 0x123   : > { %1686 = vmatpush1.bf16.msra.mxu1 %v7501_v41  ;;  %1644 = vmatprep.subr.bf16.mxu0 %v7502_v42 }
 0x124   : > { %1687 = vmatprep.subr.bf16.mxu1 %v7505_v43  ;;  %v8893_v41 = vsub.s32 1, %v8890_v40  ;;  %v8896_v42 = vsub.s32 0, %v8890_v40  ;;  %v957_v43 = vld [vmem:[%s9988_s23] sm:$0x3] }
 0x126   : > { %1645 = vmatpush1.bf16.msra.mxu0 %v7504_v44 }
 0x127   : > { %1688 = vmatpush1.bf16.msra.mxu1 %v7507_v45  ;;  %1646 = vmatprep.subr.bf16.mxu0 %v7508_v46  ;;  %v958_v45 = vld [vmem:[%s8769_s29] sm:$0x3] }
 0x128   : > { %1689 = vmatprep.subr.bf16.mxu1 %v7511_v47  ;;  %v1000_v47 = vrot.slane %v957_v43, %v8893_v41 }
 0x12a   : > { %1647 = vmatpush1.bf16.msra.mxu0 %v7510_v48 }
 0x12b   : > { %1690 = vmatpush1.bf16.msra.mxu1 %v7513_v49  ;;  %1648 = vmatprep.subr.bf16.mxu0 %v7514_v50  ;;  %v996_v49 = vrot.slane %v957_v43, %v8896_v42 }
 0x12c   : > { %1691 = vmatprep.subr.bf16.mxu1 %v7517_v51  ;;  %v1015_v51 = vrot.slane %v958_v45, %v8893_v41 }
 0x12e   : > { %1649 = vmatpush2.bf16.msra.mxu0 %v7516_v52  ;;  %v1011_v52 = vrot.slane %v958_v45, %v8896_v42 }
 0x12f   : > { %1692 = vmatpush2.bf16.msra.mxu1 %v7519_v3  ;;  %1650 = vmatprep.subr.bf16.mxu0 %v7520_v4  ;;  %v7570_v4 = vld [vmem:[%s8776_s15 + $0x104] ss:$24 sps:$4 sm:$0xff]  }
 0x130   : > { %1693 = vmatprep.subr.bf16.mxu1 %v7523_v6  ;;  %v7573_v6 = vld [vmem:[%s8776_s15 + $0xd4] ss:$24 sps:$4 sm:$0xff]  }
 0x132   : > { %1651 = vmatpush2.bf16.msra.mxu0 %v7522_v5  ;;  %v7568_v5 = vld [vmem:[%s8776_s15 + $0x100] ss:$24 sps:$4 sm:$0xff]  }
 0x133   : > { %1694 = vmatpush2.bf16.msra.mxu1 %v7525_v7  ;;  %1652 = vmatprep.subr.bf16.mxu0 %v7526_v8  ;;  %v7571_v7 = vld [vmem:[%s8776_s15 + $0xd0] ss:$24 sps:$4 sm:$0xff]   ;;  %v7576_v8 = vld [vmem:[%s8776_s15 + $0xa4] ss:$24 sps:$4 sm:$0xff]  }
 0x134   : > { %1695 = vmatprep.subr.bf16.mxu1 %v7529_v10  ;;  %v7579_v10 = vld [vmem:[%s8776_s15 + $0x74] ss:$24 sps:$4 sm:$0xff]  }
 0x136   : > { %1653 = vmatpush2.bf16.msra.mxu0 %v7528_v9  ;;  %v7574_v9 = vld [vmem:[%s8776_s15 + $0xa0] ss:$24 sps:$4 sm:$0xff]  }
 0x137   : > { %1696 = vmatpush2.bf16.msra.mxu1 %v7531_v11  ;;  %v7577_v11 = vld [vmem:[%s8776_s15 + $0x70] ss:$24 sps:$4 sm:$0xff]  }
 0x19d   : > { %v961_v53 = vpop.xlane.xlu0 %960 }
 0x19e   : > { %v966_v54 = vmul.f32 0.00390625, %v961_v53 }
 0x1a0   : > { %v8841_v55 = vsub.f32 %v8793_v12, %v966_v54  ;;  %v8844_v56 = vsub.f32 %v8795_v13, %v966_v54  ;;  %v7532_v12 = vld [vmem:[%s8776_s15 + $0x244] ss:$24 sps:$4 sm:$0xff]   ;;  %v7534_v13 = vld [vmem:[%s8776_s15 + $0x240] ss:$24 sps:$4 sm:$0xff]  }
 0x1a1   : > { %v964_v57 = vpop.xlane.xlu0 %963  ;;  %1654 = vmatprep.subr.bf16.mxu0 %v7532_v12  ;;  %v7582_v12 = vld [vmem:[%s8776_s15 + $0x44] ss:$24 sps:$4 sm:$0xff]  }
 0x1a2   : > { %v967_v58 = vmul.f32 0.00390625, %v964_v57  ;;  %v972_v59 = vmul.f32 %v8841_v55, %v8841_v55  ;;  %v973_v60 = vmul.f32 %v8844_v56, %v8844_v56  ;;  %1655 = vmatpush2.bf16.msra.mxu0 %v7534_v13  ;;  %v7580_v13 = vld [vmem:[%s8776_s15 + $0x40] ss:$24 sps:$4 sm:$0xff]  }
 0x1a4   : > { %v8851_v61 = vsub.f32 %v8797_v14, %v967_v58  ;;  %v8854_v62 = vsub.f32 %v8801_v16, %v967_v58  ;;  %v976_v63 = vadd.f32 %v973_v60, %v972_v59  ;;  %v7535_v14 = vld [vmem:[%s8776_s15 + $0x24c] ss:$24 sps:$4 sm:$0xff]  }
 0x1a5   : > { %v7538_v16 = vld [vmem:[%s8776_s15 + $0x214] ss:$24 sps:$4 sm:$0xff]   ;;  %1697 = vmatprep.subr.bf16.mxu1 %v7535_v14 }
 0x1a6   : > { %977 = vadd.xlane.f32.xlu1 %v976_v63  ;;  %v974_v0 = vmul.f32 %v8851_v61, %v8851_v61  ;;  %v975_v1 = vmul.f32 %v8854_v62, %v8854_v62  ;;  %1698 = vmatpush2.bf16.msra.mxu1 %v7537_v15  ;;  %v7585_v14 = vld [vmem:[%s8776_s15 + $0x14] ss:$24 sps:$4 sm:$0xff]   ;;  %v7583_v15 = vld [vmem:[%s8776_s15 + $0x10] ss:$24 sps:$4 sm:$0xff]  }
 0x1a7   : > { %1656 = vmatprep.subr.bf16.mxu0 %v7538_v16  ;;  %1699 = vmatprep.subr.bf16.mxu1 %v7541_v17  ;;  %v7588_v16 = vld [vmem:[%s8776_s15 + $0x2e4] ss:$24 sps:$4 sm:$0xff]   ;;  %v7586_v17 = vld [vmem:[%s8776_s15 + $0x2e0] ss:$24 sps:$4 sm:$0xff]  }
 0x1a8   : > { %v979_v2 = vadd.f32 %v975_v1, %v974_v0  ;;  %1657 = vmatpush2.bf16.msra.mxu0 %v7540_v18  ;;  %v7591_v18 = vld [vmem:[%s8776_s15 + $0x2b4] ss:$24 sps:$4 sm:$0xff]  }
 0x1a9   : > { %1658 = vmatprep.subr.bf16.mxu0 %v7544_v20  ;;  %v7594_v20 = vld [vmem:[%s8776_s15 + $0x284] ss:$24 sps:$4 sm:$0xff]  }
 0x1aa   : > { %980 = vadd.xlane.f32.xlu1 %v979_v2  ;;  %1700 = vmatpush2.bf16.msra.mxu1 %v7543_v19  ;;  %v7562_v2 = vld [vmem:[%s8776_s15 + $0x160] ss:$24 sps:$4 sm:$0xff]   ;;  %v7589_v19 = vld [vmem:[%s8776_s15 + $0x2b0] ss:$24 sps:$4 sm:$0xff]  }
 0x1ab   : > { %1701 = vmatprep.subr.bf16.mxu1 %v7547_v21  ;;  %v7592_v21 = vld [vmem:[%s8776_s15 + $0x280] ss:$24 sps:$4 sm:$0xff]  }
 0x1ac   : > { %1659 = vmatpush2.bf16.msra.mxu0 %v7546_v22  ;;  %v7597_v22 = vld [vmem:[%s8776_s15 + $0x254] ss:$24 sps:$4 sm:$0xff]  }
 0x1ad   : > { %1660 = vmatprep.subr.bf16.mxu0 %v7550_v24  ;;  %v7600_v24 = vld [vmem:[%s8776_s15 + $0x224] ss:$24 sps:$4 sm:$0xff]  }
 0x1ae   : > { %1702 = vmatpush2.bf16.msra.mxu1 %v7549_v23  ;;  %v7595_v23 = vld [vmem:[%s8776_s15 + $0x250] ss:$24 sps:$4 sm:$0xff]  }
 0x1af   : > { %1703 = vmatprep.subr.bf16.mxu1 %v7553_v25  ;;  %v7598_v25 = vld [vmem:[%s8776_s15 + $0x220] ss:$24 sps:$4 sm:$0xff]  }
 0x1b0   : > { %1661 = vmatpush2.bf16.msra.mxu0 %v7552_v26  ;;  %v7603_v26 = vld [vmem:[%s8776_s15 + $0x1f4] ss:$24 sps:$4 sm:$0xff]  }
 0x1b1   : > { %1662 = vmatprep.subr.bf16.mxu0 %v7556_v28  ;;  %v7606_v28 = vld [vmem:[%s8776_s15 + $0x1c4] ss:$24 sps:$4 sm:$0xff]  }
 0x1b2   : > { %1704 = vmatpush2.bf16.msra.mxu1 %v7555_v27  ;;  %v7601_v27 = vld [vmem:[%s8776_s15 + $0x1f0] ss:$24 sps:$4 sm:$0xff]  }
 0x1b3   : > { %1705 = vmatprep.subr.bf16.mxu1 %v7559_v29  ;;  %v7604_v29 = vld [vmem:[%s8776_s15 + $0x1c0] ss:$24 sps:$4 sm:$0xff]  }
 0x1b4   : > { %1663 = vmatpush2.bf16.msra.mxu0 %v7558_v30  ;;  %v7609_v30 = vld [vmem:[%s8776_s15 + $0x194] ss:$24 sps:$4 sm:$0xff]  }
 0x1b5   : > { %1718 = vmatprep.subr.bf16.mxu0 %v7564_v32  ;;  %v8418_v32 = vmov 0.0  }
 0x1b6   : > { %1706 = vmatpush2.bf16.msra.mxu1 %v7561_v31  ;;  %v7607_v31 = vld [vmem:[%s8776_s15 + $0x190] ss:$24 sps:$4 sm:$0xff]  }
 0x1b7   : > { %7019 = vmatprep.subr.bf16.mxu1 %v8418_v32 }
 0x22f   : > { %v978_v33 = vpop.xlane.xlu1 %977 }
 0x230   : > { %v982_v34 = vmul.f32 0.00390625, %v978_v33  ;;  %v1132_v33 = vsub.s32 2, %v8890_v40 }
 0x232   : > { %v984_v35 = vadd.f32 1e-05, %v982_v34  ;;  %v8953_v34 = vld [vmem:[%s8778_s20] sm:$0x3f] }
 0x233   : > { %v981_v36 = vpop.xlane.xlu1 %980 }
 0x234   : > { %7850 = vrsqrt.f32 %v984_v35  ;;  %v983_v37 = vmul.f32 0.00390625, %v981_v36  ;;  %v1133_v35 = vrot.slane %v8953_v34, %v1132_v33 }
 0x236   : > { %v985_v38 = vadd.f32 1e-05, %v983_v37  ;;  %v1125_v37 = vrot.slane %v8953_v34, %v8896_v42 }
 0x238   : > { %7852 = vrsqrt.f32 %v985_v38 }
 0x241   : > { %v7851_v44 = vpop.eup %7850 }
 0x242   : > { %v989_v46 = vmul.f32 %v7851_v44, %v8844_v56  ;;  %v988_v48 = vmul.f32 %v7851_v44, %v8841_v55 }
 0x244   : > { %v1004_v54 = vmul.f32 %v1000_v47, %v989_v46  ;;  %v1003_v58 = vmul.f32 %v996_v49, %v988_v48 }
 0x245   : > { %v7853_v50 = vpop.eup %7852 }
 0x246   : > { %v991_v53 = vmul.f32 %v7853_v50, %v8854_v62  ;;  %v990_v57 = vmul.f32 %v7853_v50, %v8851_v61  ;;  %v1019_v60 = vadd.f32 %v1015_v51, %v1004_v54  ;;  %v1018_v63 = vadd.f32 %v1011_v52, %v1003_v58  ;;  %v7567_v62 = vld [vmem:[%s8776_s15 + $0x134] ss:$24 sps:$4 sm:$0xff]   ;;  %v7565_v61 = vld [vmem:[%s8776_s15 + $0x130] ss:$24 sps:$4 sm:$0xff]  }
 0x248   : > { %v1006_v56 = vmul.f32 %v1000_v47, %v991_v53  ;;  %v1005_v59 = vmul.f32 %v996_v49, %v990_v57 }
 0x24a   : > { %v1021_v55 = vadd.f32 %v1015_v51, %v1006_v56  ;;  %v1020_v0 = vadd.f32 %v1011_v52, %v1005_v59  ;;  %v1136_v51 = vsub.s32 3, %v8890_v40  ;;  %v1129_v56 = vrot.slane %v8953_v34, %v8893_v41 }
 0x24c   : > { %v1023_v1 = vpack.c.bf16 %v1021_v55, %v1019_v60  ;;  %v8910_v3 = vpack.c.bf16 %v1020_v0, %v1018_v63  ;;  %v1137_v59 = vrot.slane %v8953_v34, %v1136_v51 }
 0x24e   : > { %1664 = vmatprep.mubr.bf16.mxu0 %v1023_v1  ;;  %1707 = vmatprep.mubr.bf16.mxu1 %v1023_v1 }
 0x24f   : > { %1665 = vmatmul.mubr.bf16.vlgmr.msra.gmra.mxu0 %v8910_v3  ;;  %1708 = vmatmul.mubr.bf16.vlgmr.msra.gmra.mxu1 %v8910_v3 }
 0x250   : > { %1719 = vmatpush1.bf16.msra.mxu0 %v7562_v2  ;;  %1750 = vmatprep.mubr.bf16.mxu0 %v1023_v1 }
 0x251   : > { %1720 = vmatprep.subr.bf16.mxu0 %v7567_v62  ;;  %7021 = vmatprep.mubr.msk.bf16.mxu1 %vm8419_vm0, %v8418_v32 }
 0x254   : > { %1721 = vmatpush1.bf16.msra.mxu0 %v7565_v61  ;;  %v1140_v61 = vsub.s32 4, %v8890_v40 }
 0x255   : > { %1722 = vmatprep.subr.bf16.mxu0 %v7570_v4 }
 0x256   : > { %v1141_v4 = vrot.slane %v8953_v34, %v1140_v61 }
 0x258   : > { %1723 = vmatpush1.bf16.msra.mxu0 %v7568_v5 }
 0x259   : > { %1724 = vmatprep.subr.bf16.mxu0 %v7573_v6 }
 0x25c   : > { %1725 = vmatpush1.bf16.msra.mxu0 %v7571_v7 }
 0x25d   : > { %1726 = vmatprep.subr.bf16.mxu0 %v7576_v8 }
 0x260   : > { %1727 = vmatpush1.bf16.msra.mxu0 %v7574_v9 }
 0x261   : > { %1728 = vmatprep.subr.bf16.mxu0 %v7579_v10 }
 0x264   : > { %1729 = vmatpush1.bf16.msra.mxu0 %v7577_v11 }
 0x265   : > { %1730 = vmatprep.subr.bf16.mxu0 %v7582_v12 }
 0x268   : > { %1731 = vmatpush1.bf16.msra.mxu0 %v7580_v13 }
 0x269   : > { %1732 = vmatprep.subr.bf16.mxu0 %v7585_v14 }
 0x26c   : > { %1733 = vmatpush1.bf16.msra.mxu0 %v7583_v15 }
 0x26d   : > { %1734 = vmatprep.subr.bf16.mxu0 %v7588_v16 }
 0x270   : > { %1735 = vmatpush2.bf16.msra.mxu0 %v7586_v17 }
 0x271   : > { %1736 = vmatprep.subr.bf16.mxu0 %v7591_v18 }
 0x274   : > { %1737 = vmatpush2.bf16.msra.mxu0 %v7589_v19 }
 0x275   : > { %1738 = vmatprep.subr.bf16.mxu0 %v7594_v20 }
 0x278   : > { %1739 = vmatpush2.bf16.msra.mxu0 %v7592_v21 }
 0x279   : > { %1740 = vmatprep.subr.bf16.mxu0 %v7597_v22 }
 0x27c   : > { %1741 = vmatpush2.bf16.msra.mxu0 %v7595_v23 }
 0x27d   : > { %1742 = vmatprep.subr.bf16.mxu0 %v7600_v24 }
 0x280   : > { %1743 = vmatpush2.bf16.msra.mxu0 %v7598_v25 }
 0x281   : > { %1744 = vmatprep.subr.bf16.mxu0 %v7603_v26 }
 0x284   : > { %1745 = vmatpush2.bf16.msra.mxu0 %v7601_v27 }
 0x285   : > { %1746 = vmatprep.subr.bf16.mxu0 %v7606_v28 }
 0x288   : > { %1747 = vmatpush2.bf16.msra.mxu0 %v7604_v29 }
 0x289   : > { %1748 = vmatprep.subr.bf16.mxu0 %v7609_v30 }
 0x28c   : > { %1749 = vmatpush2.bf16.msra.mxu0 %v7607_v31 }
 0x28d   : > { %7115 = vmatprep.subr.bf16.mxu0 %v8418_v32 }
 0x28f   : > { %1751 = vmatmul.mubr.bf16.vlgmr.msra.gmra.mxu0 %v8910_v3 }
 0x290   : > { %7117 = vmatprep.mubr.msk.bf16.mxu0 %vm8419_vm0, %v8418_v32 }
 0x30f   : > { %v1709_v36 = vpop.f32.mrf.mxu1  ;;  %v1666_v38 = vpop.f32.mrf.mxu0 }
 0x310   : > { %v1710_v39 = vadd.f32 %v1709_v36, %v1133_v35  ;;  %v1667_v46 = vadd.f32 %v1666_v38, %v1125_v37 }
 0x311   : > { %v1711_v43 = vpop.f32.mrf.mxu1  ;;  %v1668_v47 = vpop.f32.mrf.mxu0 }
 0x312   : > { %1803 = vrot.lane.b32.xlu0 %v1710_v39, %s8420_s30  ;;  %v1897_v44 = vpack.c.bf16 %v1710_v39, %v1710_v39  ;;  %v1881_v54 = vpack.c.bf16 %v1667_v46, %v1667_v46  ;;  %v8980_v63 = vadd.f32 %v1668_v47, %v1129_v56  ;;  %v8991_v2 = vadd.f32 %v1711_v43, %v1137_v59 }
 0x313   : > { %v1713_v45 = vpop.f32.mrf.mxu1  ;;  %v1670_v52 = vpop.f32.mrf.mxu0 }
 0x314   : > { %v1714_v48 = vadd.f32 %v1713_v45, %v1133_v35  ;;  %v1918_v49 = vsel %vm1913_vm1, %v1897_v44, 0  ;;  %v1671_v57 = vadd.f32 %v1670_v52, %v1125_v37  ;;  %v1905_v52 = vpack.c.bf16 %v8991_v2, %v8991_v2 }
 0x315   : > { %7020 = vmatpush3.bf16.xpose.msra.mxu1 %v1918_v49  ;;  %v1715_v58 = vpop.f32.mrf.mxu1  ;;  %v1672_v3 = vpop.f32.mrf.mxu0 }
 0x316   : > { %v7381_v50 = vpack.i.bf16 %v1714_v48, %v1667_v46  ;;  %7025 = vmatprep.subr.bf16.mxu1 %v8418_v32  ;;  %v1898_v53 = vpack.c.bf16 %v1714_v48, %v1714_v48  ;;  %v8975_v55 = vadd.f32 %v1715_v58, %v1137_v59  ;;  %v1882_v0 = vpack.c.bf16 %v1671_v57, %v1671_v57 }
 0x317   : > { %v8996_v62 = vadd.f32 %v1672_v3, %v1129_v56  ;;  %v1889_v58 = vpack.c.bf16 %v8980_v63, %v8980_v63 }
 0x318   : > { %7382 = vrot.lane.b32.xlu0 %v7381_v50, %s8421_s0  ;;  %7377 = vrot.lane.b32.xlu1 %v7381_v50, %s8420_s30  ;;  %v1964_v60 = vsel %vm1913_vm1, %v1898_v53, 0  ;;  %v7391_v1 = vpack.i.bf16 %v8975_v55, %v8980_v63 }
 0x31c   : > { %1815 = vrot.lane.b32.xlu0 %v1710_v39, %s8422_s27  ;;  %7022 = vmatmul.mubr.msk.bf16.vlgmr.msra.gmra.mxu1 %vm1913_vm1, %v1881_v54  ;;  %v2286_v54 = vsel %vm1913_vm1, %v1905_v52, 0 }
 0x31d   : > { %1765 = vrot.lane.b32.xlu1 %v1671_v57, %s8420_s30  ;;  %7026 = vmatpush3.bf16.xpose.msra.mxu1 %v1964_v60 }
 0x31e   : > { %7027 = vmatprep.mubr.msk.bf16.mxu1 %vm8419_vm0, %v8418_v32  ;;  %7031 = vmatprep.subr.bf16.mxu1 %v8418_v32 }
 0x320   : > { %1777 = vrot.lane.b32.xlu0 %v1671_v57, %s8422_s27 }
 0x321   : > { %1809 = vrot.lane.b32.xlu1 %v1710_v39, %s8421_s0 }
 0x324   : > { %7392 = vrot.lane.b32.xlu0 %v7391_v1, %s8420_s30  ;;  %7028 = vmatmul.mubr.msk.bf16.vlgmr.msra.gmra.mxu1 %vm1913_vm1, %v1882_v0 }
 0x325   : > { %1771 = vrot.lane.b32.xlu1 %v1671_v57, %s8421_s0  ;;  %7033 = vmatprep.mubr.msk.bf16.mxu1 %vm8419_vm0, %v8418_v32  ;;  %v1906_v57 = vpack.c.bf16 %v8975_v55, %v8975_v55 }
 0x327   : > { %v2332_v56 = vsel %vm1913_vm1, %v1906_v57, 0 }
 0x328   : > { %1829 = vrot.lane.b32.xlu0 %v8991_v2, %s8421_s0 }
 0x329   : > { %7387 = vrot.lane.b32.xlu1 %v7381_v50, %s8422_s27 }
 0x32c   : > { %1791 = vrot.lane.b32.xlu0 %v8996_v62, %s8421_s0 }
 0x32d   : > { %1823 = vrot.lane.b32.xlu1 %v8991_v2, %s8420_s30 }
 0x330   : > { %7402 = vrot.lane.b32.xlu0 %v7391_v1, %s8422_s27 }
 0x331   : > { %1785 = vrot.lane.b32.xlu1 %v8996_v62, %s8420_s30 }
 0x335   : > { %7397 = vrot.lane.b32.xlu1 %v7391_v1, %s8421_s0  ;;  %v1890_v1 = vpack.c.bf16 %v8996_v62, %v8996_v62 }
 0x339   : > { %1835 = vrot.lane.b32.xlu1 %v8991_v2, %s8422_s27 }
 0x33d   : > { %1797 = vrot.lane.b32.xlu1 %v8996_v62, %s8422_s27 }
 0x34f   : > { %v1752_v5 = vpop.f32.mrf.mxu0 }
 0x350   : > { %v1753_v6 = vadd.f32 %v1752_v5, %v1141_v4 }
 0x351   : > { %v9014_v7 = vpop.f32.mrf.mxu0 }
 0x352   : > { %v2876_v8 = vpack.c.bf16 %v1753_v6, %v1753_v6 }
 0x353   : > { %v1756_v9 = vpop.f32.mrf.mxu0 }
 0x354   : > { %v9016_v10 = vadd.f32 %v1756_v9, %v1141_v4  ;;  %v2897_v11 = vsel %vm2895_vm2, %v2876_v8, 0 }
 0x355   : > { %7116 = vmatpush3.bf16.msra.mxu0 %v2897_v11 }
 0x356   : > { %v9020_v12 = vpack.i.bf16 %v9016_v10, %v1753_v6  ;;  %7127 = vmatprep.subr.bf16.mxu0 %v8418_v32 }
 0x384   : > { %v1804_v13 = vpop.permute.xlu0 %1803 }
 0x385   : > { %v1899_v14 = vpack.c.bf16 %v1804_v13, %v1804_v13 }
 0x387   : > { %v2010_v15 = vsel %vm1913_vm1, %v1899_v14, 0 }
 0x388   : > { %7032 = vmatpush3.bf16.xpose.msra.mxu1 %v2010_v15 }
 0x389   : > { %7037 = vmatprep.subr.bf16.mxu1 %v8418_v32 }
 0x38a   : > { %v7378_v16 = vpop.permute.xlu1 %7377  ;;  %v7383_v25 = vpop.permute.xlu0 %7382 }
 0x38b   : > { %v7380_v17 = vunpack.i.h.bf16 %v7378_v16  ;;  %v7379_v18 = vunpack.i.l.bf16 %v7378_v16  ;;  %v7385_v27 = vunpack.i.h.bf16 %v7383_v25  ;;  %v7384_v29 = vunpack.i.l.bf16 %v7383_v25 }
 0x38d   : > { %v1900_v19 = vpack.c.bf16 %v7380_v17, %v7380_v17  ;;  %v1883_v20 = vpack.c.bf16 %v7379_v18, %v7379_v18  ;;  %v1902_v30 = vpack.c.bf16 %v7385_v27, %v7385_v27  ;;  %v1885_v31 = vpack.c.bf16 %v7384_v29, %v7384_v29  ;;  %v9083_v18 = vld [vmem:[#allocation7] sm:$0xff] }
 0x38e   : > { %v1816_v37 = vpop.permute.xlu0 %1815 }
 0x38f   : > { %v1766_v21 = vpop.permute.xlu1 %1765  ;;  %7034 = vmatmul.mubr.msk.bf16.vlgmr.msra.gmra.mxu1 %vm1913_vm1, %v1883_v20  ;;  %v2056_v22 = vsel %vm1913_vm1, %v1900_v19, 0  ;;  %v2148_v36 = vsel %vm1913_vm1, %v1902_v30, 0  ;;  %v1903_v38 = vpack.c.bf16 %v1816_v37, %v1816_v37 }
 0x390   : > { %7038 = vmatpush3.bf16.xpose.msra.mxu1 %v2056_v22  ;;  %7039 = vmatprep.mubr.msk.bf16.mxu1 %vm8419_vm0, %v8418_v32  ;;  %v1884_v26 = vpack.c.bf16 %v1766_v21, %v1766_v21 }
 0x391   : > { %7043 = vmatprep.subr.bf16.mxu1 %v8418_v32  ;;  %v2194_v44 = vsel %vm1913_vm1, %v1903_v38, 0 }
 0x392   : > { %v1778_v50 = vpop.permute.xlu0 %1777 }
 0x393   : > { %v1810_v23 = vpop.permute.xlu1 %1809  ;;  %v1888_v53 = vpack.c.bf16 %v1778_v50, %v1778_v50 }
 0x394   : > { %v1901_v24 = vpack.c.bf16 %v1810_v23, %v1810_v23 }
 0x396   : > { %v2102_v28 = vsel %vm1913_vm1, %v1901_v24, 0  ;;  %v7393_v0 = vpop.permute.xlu0 %7392 }
 0x397   : > { %7040 = vmatmul.mubr.msk.bf16.vlgmr.msra.gmra.mxu1 %vm1913_vm1, %v1884_v26  ;;  %v1772_v35 = vpop.permute.xlu1 %1771  ;;  %v7395_v55 = vunpack.i.h.bf16 %v7393_v0  ;;  %v7394_v63 = vunpack.i.l.bf16 %v7393_v0 }
 0x398   : > { %7044 = vmatpush3.bf16.xpose.msra.mxu1 %v2102_v28  ;;  %7045 = vmatprep.mubr.msk.bf16.mxu1 %vm8419_vm0, %v8418_v32  ;;  %v1886_v43 = vpack.c.bf16 %v1772_v35, %v1772_v35 }
 0x399   : > { %7049 = vmatprep.subr.bf16.mxu1 %v8418_v32  ;;  %v1908_v3 = vpack.c.bf16 %v7395_v55, %v7395_v55  ;;  %v1891_v4 = vpack.c.bf16 %v7394_v63, %v7394_v63 }
 0x39a   : > { %v1830_v62 = vpop.permute.xlu0 %1829 }
 0x39b   : > { %v7388_v39 = vpop.permute.xlu1 %7387  ;;  %v2424_v6 = vsel %vm1913_vm1, %v1908_v3, 0  ;;  %v1909_v8 = vpack.c.bf16 %v1830_v62, %v1830_v62 }
 0x39c   : > { %v7390_v45 = vunpack.i.h.bf16 %v7388_v39  ;;  %v7389_v46 = vunpack.i.l.bf16 %v7388_v39 }
 0x39d   : > { %v2470_v13 = vsel %vm1913_vm1, %v1909_v8, 0 }
 0x39e   : > { %v1904_v47 = vpack.c.bf16 %v7390_v45, %v7390_v45  ;;  %v1887_v48 = vpack.c.bf16 %v7389_v46, %v7389_v46  ;;  %v1792_v22 = vpop.permute.xlu0 %1791 }
 0x39f   : > { %7046 = vmatmul.mubr.msk.bf16.vlgmr.msra.gmra.mxu1 %vm1913_vm1, %v1885_v31  ;;  %v1824_v59 = vpop.permute.xlu1 %1823 }
 0x3a0   : > { %7050 = vmatpush3.bf16.xpose.msra.mxu1 %v2148_v36  ;;  %7051 = vmatprep.mubr.msk.bf16.mxu1 %vm8419_vm0, %v8418_v32  ;;  %v2240_v49 = vsel %vm1913_vm1, %v1904_v47, 0  ;;  %v1907_v60 = vpack.c.bf16 %v1824_v59, %v1824_v59  ;;  %v1894_v36 = vpack.c.bf16 %v1792_v22, %v1792_v22 }
 0x3a1   : > { %7055 = vmatprep.subr.bf16.mxu1 %v8418_v32 }
 0x3a2   : > { %v2378_v2 = vsel %vm1913_vm1, %v1907_v60, 0  ;;  %v7403_v31 = vpop.permute.xlu0 %7402 }
 0x3a3   : > { %v1786_v5 = vpop.permute.xlu1 %1785  ;;  %v7405_v39 = vunpack.i.h.bf16 %v7403_v31  ;;  %v7404_v46 = vunpack.i.l.bf16 %v7403_v31 }
 0x3a4   : > { %v1892_v11 = vpack.c.bf16 %v1786_v5, %v1786_v5 }
 0x3a7   : > { %7052 = vmatmul.mubr.msk.bf16.vlgmr.msra.gmra.mxu1 %vm1913_vm1, %v1886_v43  ;;  %v7398_v9 = vpop.permute.xlu1 %7397 }
 0x3a8   : > { %7056 = vmatpush3.bf16.xpose.msra.mxu1 %v2194_v44  ;;  %7057 = vmatprep.mubr.msk.bf16.mxu1 %vm8419_vm0, %v8418_v32  ;;  %v7400_v14 = vunpack.i.h.bf16 %v7398_v9  ;;  %v7399_v15 = vunpack.i.l.bf16 %v7398_v9 }
 0x3a9   : > { %7061 = vmatprep.subr.bf16.mxu1 %v8418_v32 }
 0x3aa   : > { %v1910_v16 = vpack.c.bf16 %v7400_v14, %v7400_v14  ;;  %v1893_v20 = vpack.c.bf16 %v7399_v15, %v7399_v15 }
 0x3ab   : > { %v1836_v26 = vpop.permute.xlu1 %1835 }
 0x3ac   : > { %v2516_v25 = vsel %vm1913_vm1, %v1910_v16, 0  ;;  %v1911_v29 = vpack.c.bf16 %v1836_v26, %v1836_v26 }
 0x3ae   : > { %v2562_v43 = vsel %vm1913_vm1, %v1911_v29, 0 }
 0x3af   : > { %7058 = vmatmul.mubr.msk.bf16.vlgmr.msra.gmra.mxu1 %vm1913_vm1, %v1887_v48  ;;  %v1912_v48 = vpack.c.bf16 %v7405_v39, %v7405_v39  ;;  %v1798_v52 = vpop.permute.xlu1 %1797 }
 0x3b0   : > { %7062 = vmatpush3.bf16.xpose.msra.mxu1 %v2240_v49  ;;  %7063 = vmatprep.mubr.msk.bf16.mxu1 %vm8419_vm0, %v8418_v32  ;;  %v1895_v49 = vpack.c.bf16 %v7404_v46, %v7404_v46 }
 0x3b1   : > { %7067 = vmatprep.subr.bf16.mxu1 %v8418_v32  ;;  %v2608_v50 = vsel %vm1913_vm1, %v1912_v48, 0 }
 0x3b7   : > { %7064 = vmatmul.mubr.msk.bf16.vlgmr.msra.gmra.mxu1 %vm1913_vm1, %v1888_v53  ;;  %v2877_v53 = vpack.c.bf16 %v9016_v10, %v9016_v10 }
 0x3b8   : > { %7068 = vmatpush3.bf16.xpose.msra.mxu1 %v2286_v54  ;;  %7069 = vmatprep.mubr.msk.bf16.mxu1 %vm8419_vm0, %v8418_v32  ;;  %v1896_v54 = vpack.c.bf16 %v1798_v52, %v1798_v52 }
 0x3b9   : > { %7073 = vmatprep.subr.bf16.mxu1 %v8418_v32  ;;  %v2943_v57 = vsel %vm2895_vm2, %v2877_v53, 0 }
 0x3bf   : > { %7070 = vmatmul.mubr.msk.bf16.vlgmr.msra.gmra.mxu1 %vm1913_vm1, %v1889_v58 }
 0x3c0   : > { %7074 = vmatpush3.bf16.xpose.msra.mxu1 %v2332_v56  ;;  %7075 = vmatprep.mubr.msk.bf16.mxu1 %vm8419_vm0, %v8418_v32 }
 0x3c1   : > { %7079 = vmatprep.subr.bf16.mxu1 %v8418_v32 }
 0x3c7   : > { %7076 = vmatmul.mubr.msk.bf16.vlgmr.msra.gmra.mxu1 %vm1913_vm1, %v1890_v1 }
 0x3c8   : > { %7080 = vmatpush3.bf16.xpose.msra.mxu1 %v2378_v2  ;;  %7081 = vmatprep.mubr.msk.bf16.mxu1 %vm8419_vm0, %v8418_v32 }
 0x3c9   : > { %7085 = vmatprep.subr.bf16.mxu1 %v8418_v32 }
 0x3cf   : > { %7082 = vmatmul.mubr.msk.bf16.vlgmr.msra.gmra.mxu1 %vm1913_vm1, %v1891_v4 }
 0x3d0   : > { %7086 = vmatpush3.bf16.xpose.msra.mxu1 %v2424_v6  ;;  %7087 = vmatprep.mubr.msk.bf16.mxu1 %vm8419_vm0, %v8418_v32 }
 0x3d1   : > { %7091 = vmatprep.subr.bf16.mxu1 %v8418_v32 }
 0x3d7   : > { %7088 = vmatmul.mubr.msk.bf16.vlgmr.msra.gmra.mxu1 %vm1913_vm1, %v1892_v11 }
 0x3d8   : > { %7092 = vmatpush3.bf16.xpose.msra.mxu1 %v2470_v13  ;;  %7093 = vmatprep.mubr.msk.bf16.mxu1 %vm8419_vm0, %v8418_v32 }
 0x3d9   : > { %7097 = vmatprep.subr.bf16.mxu1 %v8418_v32 }
 0x3dc   : > { %v1954_v17 = vpop.f32.mrf.mxu1 }
 0x3dd   : > { %v2650_v19 = vmul.f32 0.17677669, %v1954_v17 }
 0x3de   : > { %v7023_v21 = vpop.f32.mrf.mxu1 }
 0x3df   : > { %v9086_v23 = vadd.f32 %v9083_v18, %v2650_v19  ;;  %7094 = vmatmul.mubr.msk.bf16.vlgmr.msra.gmra.mxu1 %vm1913_vm1, %v1893_v20 }
 0x3e0   : > { %v1957_v24 = vpop.f32.mrf.mxu1  ;;  %7098 = vmatpush3.bf16.xpose.msra.mxu1 %v2516_v25  ;;  %7099 = vmatprep.mubr.msk.bf16.mxu1 %vm8419_vm0, %v8418_v32 }
 0x3e1   : > { %v2684_v27 = vsel %vm2683_vm3, %v9086_v23, -inf  ;;  %7103 = vmatprep.subr.bf16.mxu1 %v8418_v32 }
 0x3e2   : > { %2685 = vmax.xlane.f32.xlu0 %v2684_v27  ;;  %v7024_v28 = vpop.f32.mrf.mxu1 }
 0x3e4   : > { %v2000_v30 = vpop.f32.mrf.mxu1 }
 0x3e5   : > { %v2651_v35 = vmul.f32 0.17677669, %v2000_v30 }
 0x3e6   : > { %v7029_v37 = vpop.f32.mrf.mxu1 }
 0x3e7   : > { %v9096_v38 = vadd.f32 %v9083_v18, %v2651_v35  ;;  %7100 = vmatmul.mubr.msk.bf16.vlgmr.msra.gmra.mxu1 %vm1913_vm1, %v1894_v36 }
 0x3e8   : > { %v2003_v44 = vpop.f32.mrf.mxu1  ;;  %7104 = vmatpush3.bf16.xpose.msra.mxu1 %v2562_v43  ;;  %7105 = vmatprep.mubr.msk.bf16.mxu1 %vm8419_vm0, %v8418_v32 }
 0x3e9   : > { %v2687_v45 = vsel %vm2683_vm3, %v9096_v38, -inf  ;;  %7109 = vmatprep.subr.bf16.mxu1 %v8418_v32 }
 0x3ea   : > { %2688 = vmax.xlane.f32.xlu1 %v2687_v45  ;;  %v7030_v47 = vpop.f32.mrf.mxu1 }
 0x3ef   : > { %7106 = vmatmul.mubr.msk.bf16.vlgmr.msra.gmra.mxu1 %vm1913_vm1, %v1895_v49 }
 0x3f0   : > { %7110 = vmatpush3.bf16.xpose.msra.mxu1 %v2608_v50  ;;  %7111 = vmatprep.mubr.msk.bf16.mxu1 %vm8419_vm0, %v8418_v32 }
 0x3f1   : > { %7121 = vmatprep.subr.bf16.mxu1 %v8418_v32 }
 0x3f7   : > { %7112 = vmatmul.mubr.msk.bf16.vlgmr.msra.gmra.mxu1 %vm1913_vm1, %v1896_v54 }
 0x3f8   : > { %7122 = vmatpush3.bf16.msra.mxu1 %v2943_v57  ;;  %7123 = vmatprep.mubr.msk.bf16.mxu1 %vm8419_vm0, %v8418_v32 }
 0x3f9   : > { %7133 = vmatprep.subr.bf16.mxu1 %v8418_v32 }
 0x44f   : > { %v2046_v58 = vpop.f32.mrf.mxu1 }
 0x450   : > { %v2652_v56 = vmul.f32 0.17677669, %v2046_v58 }
 0x451   : > { %v7035_v59 = vpop.f32.mrf.mxu1 }
 0x452   : > { %v9118_v60 = vadd.f32 %v9083_v18, %v2652_v56 }
 0x453   : > { %v2049_v0 = vpop.f32.mrf.mxu1 }
 0x454   : > { %v2690_v10 = vsel %vm2683_vm3, %v9118_v60, -inf }
 0x455   : > { %2691 = vmax.xlane.f32.xlu0 %v2690_v10  ;;  %v7036_v1 = vpop.f32.mrf.mxu1 }
 0x457   : > { %v2092_v55 = vpop.f32.mrf.mxu1 }
 0x458   : > { %v2653_v2 = vmul.f32 0.17677669, %v2092_v55 }
 0x459   : > { %v7041_v63 = vpop.f32.mrf.mxu1 }
 0x45a   : > { %v9123_v3 = vadd.f32 %v9083_v18, %v2653_v2 }
 0x45b   : > { %v2095_v4 = vpop.f32.mrf.mxu1 }
 0x45c   : > { %v2693_v5 = vsel %vm2683_vm3, %v9123_v3, -inf }
 0x45d   : > { %2694 = vmax.xlane.f32.xlu0 %v2693_v5  ;;  %v7042_v6 = vpop.f32.mrf.mxu1 }
 0x45f   : > { %v2138_v62 = vpop.f32.mrf.mxu1 }
 0x460   : > { %v2654_v8 = vmul.f32 0.17677669, %v2138_v62 }
 0x461   : > { %v7047_v9 = vpop.f32.mrf.mxu1 }
 0x462   : > { %v9128_v11 = vadd.f32 %v9083_v18, %v2654_v8 }
 0x463   : > { %v2141_v13 = vpop.f32.mrf.mxu1 }
 0x464   : > { %v2696_v14 = vsel %vm2683_vm3, %v9128_v11, -inf }
 0x465   : > { %2697 = vmax.xlane.f32.xlu0 %v2696_v14  ;;  %v7048_v15 = vpop.f32.mrf.mxu1 }
 0x467   : > { %v2184_v16 = vpop.f32.mrf.mxu1 }
 0x468   : > { %v2655_v17 = vmul.f32 0.17677669, %v2184_v16 }
 0x469   : > { %v7053_v19 = vpop.f32.mrf.mxu1 }
 0x46a   : > { %v9133_v21 = vadd.f32 %v9083_v18, %v2655_v17 }
 0x46b   : > { %v2686_v20 = vpop.xlane.xlu0 %2685  ;;  %v2187_v24 = vpop.f32.mrf.mxu1 }
 0x46c   : > { %v2732_v22 = vsub.f32 %v9086_v23, %v2686_v20  ;;  %v2699_v25 = vsel %vm2683_vm3, %v9133_v21, -inf }
 0x46d   : > { %2700 = vmax.xlane.f32.xlu1 %v2699_v25  ;;  %v7054_v27 = vpop.f32.mrf.mxu1 }
 0x46e   : > { %v2748_v26 = vmul.f32 1.442695, %v2732_v22 }
 0x46f   : > { %v2230_v28 = vpop.f32.mrf.mxu1 }
 0x470   : > { %7854 = vpow2.f32 %v2748_v26  ;;  %v2656_v29 = vmul.f32 0.17677669, %v2230_v28 }
 0x471   : > { %v7059_v30 = vpop.f32.mrf.mxu1 }
 0x472   : > { %v9139_v35 = vadd.f32 %v9083_v18, %v2656_v29 }
 0x473   : > { %v2689_v31 = vpop.xlane.xlu1 %2688  ;;  %v2233_v37 = vpop.f32.mrf.mxu1 }
 0x474   : > { %v2733_v36 = vsub.f32 %v9096_v38, %v2689_v31  ;;  %v2702_v23 = vsel %vm2683_vm3, %v9139_v35, -inf }
 0x475   : > { %2703 = vmax.xlane.f32.xlu0 %v2702_v23  ;;  %v7060_v43 = vpop.f32.mrf.mxu1 }
 0x476   : > { %v2750_v39 = vmul.f32 1.442695, %v2733_v36 }
 0x477   : > { %v2276_v44 = vpop.f32.mrf.mxu1 }
 0x478   : > { %7856 = vpow2.f32 %v2750_v39  ;;  %v2657_v45 = vmul.f32 0.17677669, %v2276_v44 }
 0x479   : > { %v7065_v46 = vpop.f32.mrf.mxu1 }
 0x47a   : > { %v9145_v47 = vadd.f32 %v9083_v18, %v2657_v45 }
 0x47b   : > { %v2279_v48 = vpop.f32.mrf.mxu1 }
 0x47c   : > { %v2705_v38 = vsel %vm2683_vm3, %v9145_v47, -inf }
 0x47d   : > { %v9147_v49 = vpop.eup %7854  ;;  %2706 = vmax.xlane.f32.xlu1 %v2705_v38  ;;  %v7066_v50 = vpop.f32.mrf.mxu1 }
 0x47e   : > { %v2780_v52 = vsel %vm2683_vm3, %v9147_v49, 0.0 }
 0x47f   : > { %2781 = vadd.xlane.f32.xlu0 %v2780_v52  ;;  %v2322_v53 = vpop.f32.mrf.mxu1 }
 0x480   : > { %v2658_v54 = vmul.f32 0.17677669, %v2322_v53 }
 0x481   : > { %v7071_v57 = vpop.f32.mrf.mxu1 }
 0x482   : > { %v9154_v58 = vadd.f32 %v9083_v18, %v2658_v54 }
 0x483   : > { %v2325_v56 = vpop.f32.mrf.mxu1 }
 0x484   : > { %v2708_v0 = vsel %vm2683_vm3, %v9154_v58, -inf }
 0x485   : > { %v9156_v59 = vpop.eup %7856  ;;  %2709 = vmax.xlane.f32.xlu0 %v2708_v0  ;;  %v7072_v10 = vpop.f32.mrf.mxu1 }
 0x486   : > { %v2783_v1 = vsel %vm2683_vm3, %v9156_v59, 0.0 }
 0x487   : > { %2784 = vadd.xlane.f32.xlu1 %v2783_v1  ;;  %v2368_v55 = vpop.f32.mrf.mxu1 }
 0x488   : > { %v2659_v2 = vmul.f32 0.17677669, %v2368_v55 }
 0x489   : > { %v7077_v63 = vpop.f32.mrf.mxu1 }
 0x48a   : > { %v9163_v4 = vadd.f32 %v9083_v18, %v2659_v2 }
 0x48b   : > { %v2371_v5 = vpop.f32.mrf.mxu1 }
 0x48c   : > { %v2711_v6 = vsel %vm2683_vm3, %v9163_v4, -inf }
 0x48d   : > { %2712 = vmax.xlane.f32.xlu1 %v2711_v6  ;;  %v7078_v62 = vpop.f32.mrf.mxu1 }
 0x48f   : > { %v2414_v8 = vpop.f32.mrf.mxu1 }
 0x490   : > { %v2660_v9 = vmul.f32 0.17677669, %v2414_v8 }
 0x491   : > { %v7083_v13 = vpop.f32.mrf.mxu1 }
 0x492   : > { %v9168_v14 = vadd.f32 %v9083_v18, %v2660_v9 }
 0x493   : > { %v2417_v15 = vpop.f32.mrf.mxu1 }
 0x494   : > { %v2714_v16 = vsel %vm2683_vm3, %v9168_v14, -inf }
 0x495   : > { %2715 = vmax.xlane.f32.xlu0 %v2714_v16  ;;  %v7084_v17 = vpop.f32.mrf.mxu1 }
 0x497   : > { %v2460_v19 = vpop.f32.mrf.mxu1 }
 0x498   : > { %v2661_v20 = vmul.f32 0.17677669, %v2460_v19 }
 0x499   : > { %v7089_v22 = vpop.f32.mrf.mxu1 }
 0x49a   : > { %v9173_v24 = vadd.f32 %v9083_v18, %v2661_v20 }
 0x49b   : > { %v2463_v25 = vpop.f32.mrf.mxu1 }
 0x49c   : > { %v2717_v26 = vsel %vm2683_vm3, %v9173_v24, -inf }
 0x49d   : > { %2718 = vmax.xlane.f32.xlu1 %v2717_v26  ;;  %v7090_v27 = vpop.f32.mrf.mxu1 }
 0x49f   : > { %v2506_v28 = vpop.f32.mrf.mxu1 }
 0x4a0   : > { %v2662_v29 = vmul.f32 0.17677669, %v2506_v28 }
 0x4a1   : > { %v7095_v30 = vpop.f32.mrf.mxu1 }
 0x4a2   : > { %v9178_v31 = vadd.f32 %v9083_v18, %v2662_v29 }
 0x4a3   : > { %v2509_v36 = vpop.f32.mrf.mxu1 }
 0x4a4   : > { %v2720_v37 = vsel %vm2683_vm3, %v9178_v31, -inf }
 0x4a5   : > { %2721 = vmax.xlane.f32.xlu0 %v2720_v37  ;;  %v7096_v23 = vpop.f32.mrf.mxu1 }
 0x4a7   : > { %v2552_v39 = vpop.f32.mrf.mxu1 }
 0x4a8   : > { %v2663_v43 = vmul.f32 0.17677669, %v2552_v39 }
 0x4a9   : > { %v7101_v44 = vpop.f32.mrf.mxu1 }
 0x4aa   : > { %v9183_v45 = vadd.f32 %v9083_v18, %v2663_v43 }
 0x4ab   : > { %v2555_v46 = vpop.f32.mrf.mxu1 }
 0x4ac   : > { %v2723_v48 = vsel %vm2683_vm3, %v9183_v45, -inf }
 0x4ad   : > { %2724 = vmax.xlane.f32.xlu1 %v2723_v48  ;;  %v7102_v38 = vpop.f32.mrf.mxu1 }
 0x4af   : > { %v2598_v50 = vpop.f32.mrf.mxu1 }
 0x4b0   : > { %v2664_v52 = vmul.f32 0.17677669, %v2598_v50 }
 0x4b1   : > { %v7107_v53 = vpop.f32.mrf.mxu1 }
 0x4b2   : > { %v9188_v54 = vadd.f32 %v9083_v18, %v2664_v52 }
 0x4b3   : > { %v2601_v57 = vpop.f32.mrf.mxu1 }
 0x4b4   : > { %v2726_v56 = vsel %vm2683_vm3, %v9188_v54, -inf }
 0x4b5   : > { %2727 = vmax.xlane.f32.xlu0 %v2726_v56  ;;  %v7108_v0 = vpop.f32.mrf.mxu1 }
 0x4b7   : > { %v2644_v10 = vpop.f32.mrf.mxu1 }
 0x4b8   : > { %v2665_v1 = vmul.f32 0.17677669, %v2644_v10 }
 0x4b9   : > { %v7113_v55 = vpop.f32.mrf.mxu1 }
 0x4ba   : > { %v9193_v2 = vadd.f32 %v9083_v18, %v2665_v1 }
 0x4bb   : > { %v2647_v63 = vpop.f32.mrf.mxu1 }
 0x4bc   : > { %v2729_v5 = vsel %vm2683_vm3, %v9193_v2, -inf }
 0x4bd   : > { %2730 = vmax.xlane.f32.xlu1 %v2729_v5  ;;  %v7114_v6 = vpop.f32.mrf.mxu1 }
 0x4cb   : > { %7407 = vrot.lane.b32.xlu0 %v9020_v12, %s8420_s30 }
 0x4ce   : > { %7412 = vrot.lane.b32.xlu1 %v9020_v12, %s8421_s0 }
 0x4de   : > { %v2692_v62 = vpop.xlane.xlu0 %2691 }
 0x4df   : > { %v2734_v8 = vsub.f32 %v9118_v60, %v2692_v62 }
 0x4e1   : > { %v2752_v9 = vmul.f32 1.442695, %v2734_v8 }
 0x4e3   : > { %7858 = vpow2.f32 %v2752_v9 }
 0x4e6   : > { %v2695_v13 = vpop.xlane.xlu0 %2694 }
 0x4e7   : > { %v2735_v18 = vsub.f32 %v9123_v3, %v2695_v13 }
 0x4e9   : > { %v2754_v15 = vmul.f32 1.442695, %v2735_v18 }
 0x4eb   : > { %7860 = vpow2.f32 %v2754_v15 }
 0x4ee   : > { %v2698_v16 = vpop.xlane.xlu0 %2697 }
 0x4ef   : > { %v2736_v17 = vsub.f32 %v9128_v11, %v2698_v16 }
 0x4f0   : > { %v9204_v19 = vpop.eup %7858 }
 0x4f1   : > { %v2756_v20 = vmul.f32 1.442695, %v2736_v17  ;;  %v2786_v22 = vsel %vm2683_vm3, %v9204_v19, 0.0 }
 0x4f2   : > { %2787 = vadd.xlane.f32.xlu0 %v2786_v22 }
 0x4f3   : > { %7862 = vpow2.f32 %v2756_v20 }
 0x4f6   : > { %v2701_v25 = vpop.xlane.xlu1 %2700 }
 0x4f7   : > { %v2737_v60 = vsub.f32 %v9133_v21, %v2701_v25 }
 0x4f8   : > { %v9209_v26 = vpop.eup %7860 }
 0x4f9   : > { %v2758_v27 = vmul.f32 1.442695, %v2737_v60  ;;  %v2789_v3 = vsel %vm2683_vm3, %v9209_v26, 0.0 }
 0x4fa   : > { %2790 = vadd.xlane.f32.xlu1 %v2789_v3 }
 0x4fb   : > { %7864 = vpow2.f32 %v2758_v27 }
 0x4fe   : > { %v2704_v11 = vpop.xlane.xlu0 %2703 }
 0x4ff   : > { %v2738_v28 = vsub.f32 %v9139_v35, %v2704_v11 }
 0x500   : > { %v9214_v29 = vpop.eup %7862 }
 0x501   : > { %v2760_v30 = vmul.f32 1.442695, %v2738_v28  ;;  %v2792_v36 = vsel %vm2683_vm3, %v9214_v29, 0.0 }
 0x502   : > { %2793 = vadd.xlane.f32.xlu0 %v2792_v36 }
 0x503   : > { %7866 = vpow2.f32 %v2760_v30 }
 0x506   : > { %v2707_v21 = vpop.xlane.xlu1 %2706 }
 0x507   : > { %v2739_v37 = vsub.f32 %v9145_v47, %v2707_v21 }
 0x508   : > { %v2782_v23 = vpop.xlane.xlu0 %2781  ;;  %v9219_v39 = vpop.eup %7864 }
 0x509   : > { %7868 = vrcp.f32 %v2782_v23  ;;  %v2762_v43 = vmul.f32 1.442695, %v2739_v37  ;;  %v2795_v44 = vsel %vm2683_vm3, %v9219_v39, 0.0 }
 0x50a   : > { %2796 = vadd.xlane.f32.xlu1 %v2795_v44 }
 0x50b   : > { %7870 = vpow2.f32 %v2762_v43 }
 0x50e   : > { %v2710_v35 = vpop.xlane.xlu0 %2709 }
 0x50f   : > { %v2740_v46 = vsub.f32 %v9154_v58, %v2710_v35 }
 0x510   : > { %v2785_v48 = vpop.xlane.xlu1 %2784  ;;  %v9224_v38 = vpop.eup %7866 }
 0x511   : > { %7872 = vrcp.f32 %v2785_v48  ;;  %v2764_v50 = vmul.f32 1.442695, %v2740_v46  ;;  %v2798_v47 = vsel %vm2683_vm3, %v9224_v38, 0.0 }
 0x512   : > { %2799 = vadd.xlane.f32.xlu0 %v2798_v47  ;;  %v1144_v47 = vsub.s32 5, %v8890_v40 }
 0x513   : > { %7874 = vpow2.f32 %v2764_v50 }
 0x516   : > { %v7869_v52 = vpop.eup %7868  ;;  %v2713_v53 = vpop.xlane.xlu1 %2712 }
 0x517   : > { %v2844_v57 = vmul.f32 %v7869_v52, %v9147_v49  ;;  %v2741_v56 = vsub.f32 %v9163_v4, %v2713_v53  ;;  %v1758_v53 = vpop.f32.mrf.mxu0 }
 0x518   : > { %v9230_v0 = vpop.eup %7870 }
 0x519   : > { %v2860_v10 = vpack.c.bf16 %v2844_v57, %v2844_v57  ;;  %v2766_v58 = vmul.f32 1.442695, %v2741_v56  ;;  %v2801_v1 = vsel %vm2683_vm3, %v9230_v0, 0.0  ;;  %v1145_v57 = vrot.slane %v8953_v34, %v1144_v47 }
 0x51a   : > { %2802 = vadd.xlane.f32.xlu1 %v2801_v1 }
 0x51b   : > { %7118 = vmatmul.mubr.msk.bf16.vlgmr.msra.gmra.mxu0 %vm2683_vm3, %v2860_v10  ;;  %7876 = vpow2.f32 %v2766_v58  ;;  %v9285_v56 = vadd.f32 %v1758_v53, %v1145_v57  ;;  %v9290_v58 = vadd.f32 %v9014_v7, %v1145_v57 }
 0x51c   : > { %7129 = vmatprep.mubr.msk.bf16.mxu0 %vm8419_vm0, %v8418_v32 }
 0x51e   : > { %v7873_v55 = vpop.eup %7872  ;;  %v2716_v13 = vpop.xlane.xlu0 %2715 }
 0x51f   : > { %v2845_v63 = vmul.f32 %v7873_v55, %v9156_v59  ;;  %v2742_v18 = vsub.f32 %v9168_v14, %v2716_v13  ;;  %v7421_v55 = vpack.i.bf16 %v9285_v56, %v9290_v58 }
 0x520   : > { %v9238_v49 = vpop.eup %7874 }
 0x521   : > { %v2861_v4 = vpack.c.bf16 %v2845_v63, %v2845_v63  ;;  %v2804_v5 = vsel %vm2683_vm3, %v9238_v49, 0.0  ;;  %v2768_v20 = vmul.f32 1.442695, %v2742_v18 }
 0x522   : > { %2805 = vadd.xlane.f32.xlu1 %v2804_v5 }
 0x523   : > { %7124 = vmatmul.mubr.msk.bf16.vlgmr.msra.gmra.mxu1 %vm2683_vm3, %v2861_v4 }
 0x524   : > { %7135 = vmatprep.mubr.msk.bf16.mxu1 %vm8419_vm0, %v8418_v32 }
 0x526   : > { %v2719_v6 = vpop.xlane.xlu1 %2718 }
 0x527   : > { %v2743_v62 = vsub.f32 %v9173_v24, %v2719_v6 }
 0x528   : > { %v9246_v8 = vpop.eup %7876  ;;  %7417 = vrot.lane.b32.xlu0 %v9020_v12, %s8422_s27 }
 0x529   : > { %v2770_v59 = vmul.f32 1.442695, %v2743_v62  ;;  %v2807_v9 = vsel %vm2683_vm3, %v9246_v8, 0.0 }
 0x52a   : > { %2808 = vadd.xlane.f32.xlu1 %v2807_v9 }
 0x52b   : > { %7878 = vpow2.f32 %v2770_v59 }
 0x52e   : > { %v2722_v15 = vpop.xlane.xlu0 %2721 }
 0x52f   : > { %v2744_v16 = vsub.f32 %v9178_v31, %v2722_v15 }
 0x531   : > { %v2772_v17 = vmul.f32 1.442695, %v2744_v16 }
 0x533   : > { %7880 = vpow2.f32 %v2772_v17 }
 0x534   : > { %7882 = vpow2.f32 %v2768_v20 }
 0x536   : > { %v2725_v24 = vpop.xlane.xlu1 %2724 }
 0x537   : > { %v2745_v22 = vsub.f32 %v9183_v45, %v2725_v24 }
 0x538   : > { %v9255_v12 = vpop.eup %7878 }
 0x539   : > { %v2774_v25 = vmul.f32 1.442695, %v2745_v22  ;;  %v2813_v60 = vsel %vm2683_vm3, %v9255_v12, 0.0 }
 0x53a   : > { %2814 = vadd.xlane.f32.xlu1 %v2813_v60 }
 0x53b   : > { %7884 = vpow2.f32 %v2774_v25 }
 0x53e   : > { %v2728_v27 = vpop.xlane.xlu0 %2727 }
 0x53f   : > { %v2746_v14 = vsub.f32 %v9188_v54, %v2728_v27 }
 0x540   : > { %v9260_v3 = vpop.eup %7880 }
 0x541   : > { %v2776_v31 = vmul.f32 1.442695, %v2746_v14  ;;  %v2816_v11 = vsel %vm2683_vm3, %v9260_v3, 0.0  ;;  %v9264_v45 = vpop.eup %7882 }
 0x542   : > { %v7408_v28 = vpop.permute.xlu0 %7407  ;;  %2817 = vadd.xlane.f32.xlu1 %v2816_v11  ;;  %v2810_v43 = vsel %vm2683_vm3, %v9264_v45, 0.0 }
 0x543   : > { %7886 = vpow2.f32 %v2776_v31  ;;  %v7410_v30 = vunpack.i.h.bf16 %v7408_v28  ;;  %v7409_v36 = vunpack.i.l.bf16 %v7408_v28 }
 0x545   : > { %v2879_v21 = vpack.c.bf16 %v7410_v30, %v7410_v30  ;;  %v2878_v37 = vpack.c.bf16 %v7409_v36, %v7409_v36 }
 0x546   : > { %v2731_v23 = vpop.xlane.xlu1 %2730 }
 0x547   : > { %v2747_v54 = vsub.f32 %v9193_v2, %v2731_v23  ;;  %2811 = vadd.xlane.f32.xlu0 %v2810_v43  ;;  %v2989_v44 = vsel %vm2895_vm2, %v2878_v37, 0  ;;  %v3035_v35 = vsel %vm2895_vm2, %v2879_v21, 0 }
 0x548   : > { %v9271_v46 = vpop.eup %7884  ;;  %7128 = vmatpush3.bf16.msra.mxu0 %v2989_v44  ;;  %7134 = vmatpush3.bf16.msra.mxu1 %v3035_v35 }
 0x549   : > { %v2778_v48 = vmul.f32 1.442695, %v2747_v54  ;;  %v2819_v50 = vsel %vm2683_vm3, %v9271_v46, 0.0  ;;  %7139 = vmatprep.subr.bf16.mxu0 %v8418_v32  ;;  %7145 = vmatprep.subr.bf16.mxu1 %v8418_v32  ;;  %v2884_v54 = vpack.c.bf16 %v9290_v58, %v9290_v58 }
 0x54a   : > { %2820 = vadd.xlane.f32.xlu1 %v2819_v50  ;;  %v7413_v63 = vpop.permute.xlu1 %7412 }
 0x54b   : > { %7888 = vpow2.f32 %v2778_v48  ;;  %v7414_v7 = vunpack.i.l.bf16 %v7413_v63  ;;  %v7415_v13 = vunpack.i.h.bf16 %v7413_v63  ;;  %v3265_v48 = vsel %vm2895_vm2, %v2884_v54, 0 }
 0x54d   : > { %v2880_v6 = vpack.c.bf16 %v7414_v7, %v7414_v7  ;;  %v2881_v16 = vpack.c.bf16 %v7415_v13, %v7415_v13 }
 0x54f   : > { %v3081_v18 = vsel %vm2895_vm2, %v2880_v6, 0  ;;  %v3127_v24 = vsel %vm2895_vm2, %v2881_v16, 0 }
 0x550   : > { %v9277_v2 = vpop.eup %7886 }
 0x551   : > { %v2822_v52 = vsel %vm2683_vm3, %v9277_v2, 0.0 }
 0x552   : > { %2823 = vadd.xlane.f32.xlu1 %v2822_v52 }
 0x558   : > { %v9287_v10 = vpop.eup %7888 }
 0x559   : > { %v2825_v1 = vsel %vm2683_vm3, %v9287_v10, 0.0 }
 0x55a   : > { %2826 = vadd.xlane.f32.xlu1 %v2825_v1 }
 0x55d   : > { %7422 = vrot.lane.b32.xlu0 %v7421_v55, %s8420_s30 }
 0x561   : > { %7432 = vrot.lane.b32.xlu0 %v7421_v55, %s8422_s27 }
 0x56b   : > { %7427 = vrot.lane.b32.xlu1 %v7421_v55, %s8421_s0 }
 0x57b   : > { %v2788_v34 = vpop.xlane.xlu0 %2787 }
 0x57c   : > { %7890 = vrcp.f32 %v2788_v34 }
 0x583   : > { %v2791_v4 = vpop.xlane.xlu1 %2790 }
 0x584   : > { %7892 = vrcp.f32 %v2791_v4 }
 0x589   : > { %v7891_v5 = vpop.eup %7890 }
 0x58a   : > { %v2846_v62 = vmul.f32 %v7891_v5, %v9204_v19 }
 0x58b   : > { %v2794_v59 = vpop.xlane.xlu0 %2793 }
 0x58c   : > { %7894 = vrcp.f32 %v2794_v59  ;;  %v2862_v9 = vpack.c.bf16 %v2846_v62, %v2846_v62 }
 0x58e   : > { %7130 = vmatmul.mubr.msk.bf16.vlgmr.msra.gmra.mxu0 %vm2683_vm3, %v2862_v9 }
 0x58f   : > { %7140 = vmatpush3.bf16.msra.mxu0 %v3081_v18  ;;  %7141 = vmatprep.mubr.msk.bf16.mxu0 %vm8419_vm0, %v8418_v32 }
 0x590   : > { %7151 = vmatprep.subr.bf16.mxu0 %v8418_v32 }
 0x591   : > { %v7893_v15 = vpop.eup %7892 }
 0x592   : > { %v2847_v17 = vmul.f32 %v7893_v15, %v9209_v26 }
 0x593   : > { %v2797_v20 = vpop.xlane.xlu1 %2796 }
 0x594   : > { %7896 = vrcp.f32 %v2797_v20  ;;  %v2863_v19 = vpack.c.bf16 %v2847_v17, %v2847_v17 }
 0x596   : > { %7136 = vmatmul.mubr.msk.bf16.vlgmr.msra.gmra.mxu1 %vm2683_vm3, %v2863_v19 }
 0x597   : > { %7146 = vmatpush3.bf16.msra.mxu1 %v3127_v24  ;;  %7147 = vmatprep.mubr.msk.bf16.mxu1 %vm8419_vm0, %v8418_v32 }
 0x598   : > { %7157 = vmatprep.subr.bf16.mxu1 %v8418_v32 }
 0x599   : > { %v7895_v22 = vpop.eup %7894 }
 0x59a   : > { %v2848_v25 = vmul.f32 %v7895_v22, %v9214_v29 }
 0x59b   : > { %v2800_v60 = vpop.xlane.xlu0 %2799 }
 0x59c   : > { %7898 = vrcp.f32 %v2800_v60  ;;  %v2864_v27 = vpack.c.bf16 %v2848_v25, %v2848_v25 }
 0x59e   : > { %7142 = vmatmul.mubr.msk.bf16.vlgmr.msra.gmra.mxu0 %vm2683_vm3, %v2864_v27 }
 0x59f   : > { %v7418_v26 = vpop.permute.xlu0 %7417  ;;  %7153 = vmatprep.mubr.msk.bf16.mxu0 %vm8419_vm0, %v8418_v32 }
 0x5a0   : > { %v7420_v14 = vunpack.i.h.bf16 %v7418_v26  ;;  %v7419_v31 = vunpack.i.l.bf16 %v7418_v26 }
 0x5a1   : > { %v7897_v11 = vpop.eup %7896 }
 0x5a2   : > { %v2883_v28 = vpack.c.bf16 %v7420_v14, %v7420_v14  ;;  %v2882_v30 = vpack.c.bf16 %v7419_v31, %v7419_v31  ;;  %v2849_v36 = vmul.f32 %v7897_v11, %v9219_v39 }
 0x5a3   : > { %v2803_v21 = vpop.xlane.xlu1 %2802 }
 0x5a4   : > { %7900 = vrcp.f32 %v2803_v21  ;;  %v3173_v29 = vsel %vm2895_vm2, %v2882_v30, 0  ;;  %v2865_v37 = vpack.c.bf16 %v2849_v36, %v2849_v36  ;;  %v3219_v23 = vsel %vm2895_vm2, %v2883_v28, 0 }
 0x5a5   : > { %7152 = vmatpush3.bf16.msra.mxu0 %v3173_v29 }
 0x5a6   : > { %7148 = vmatmul.mubr.msk.bf16.vlgmr.msra.gmra.mxu1 %vm2683_vm3, %v2865_v37  ;;  %7163 = vmatprep.subr.bf16.mxu0 %v8418_v32 }
 0x5a7   : > { %7158 = vmatpush3.bf16.msra.mxu1 %v3219_v23  ;;  %7159 = vmatprep.mubr.msk.bf16.mxu1 %vm8419_vm0, %v8418_v32 }
 0x5a8   : > { %7169 = vmatprep.subr.bf16.mxu1 %v8418_v32 }
 0x5a9   : > { %v7899_v43 = vpop.eup %7898 }
 0x5aa   : > { %v2850_v39 = vmul.f32 %v7899_v43, %v9224_v38  ;;  %v2885_v38 = vpack.c.bf16 %v9285_v56, %v9285_v56 }
 0x5ab   : > { %v2806_v44 = vpop.xlane.xlu1 %2805 }
 0x5ac   : > { %7902 = vrcp.f32 %v2806_v44  ;;  %v2866_v35 = vpack.c.bf16 %v2850_v39, %v2850_v39  ;;  %v3311_v58 = vsel %vm2895_vm2, %v2885_v38, 0 }
 0x5ae   : > { %7154 = vmatmul.mubr.msk.bf16.vlgmr.msra.gmra.mxu0 %vm2683_vm3, %v2866_v35 }
 0x5af   : > { %7164 = vmatpush3.bf16.msra.mxu0 %v3265_v48  ;;  %7165 = vmatprep.mubr.msk.bf16.mxu0 %vm8419_vm0, %v8418_v32 }
 0x5b0   : > { %7175 = vmatprep.subr.bf16.mxu0 %v8418_v32 }
 0x5b1   : > { %v7901_v50 = vpop.eup %7900 }
 0x5b2   : > { %v2851_v52 = vmul.f32 %v7901_v50, %v9230_v0 }
 0x5b3   : > { %v2809_v53 = vpop.xlane.xlu1 %2808 }
 0x5b4   : > { %7904 = vrcp.f32 %v2809_v53  ;;  %v2867_v57 = vpack.c.bf16 %v2851_v52, %v2851_v52 }
 0x5b6   : > { %7160 = vmatmul.mubr.msk.bf16.vlgmr.msra.gmra.mxu1 %vm2683_vm3, %v2867_v57 }
 0x5b7   : > { %7170 = vmatpush3.bf16.msra.mxu1 %v3311_v58  ;;  %7171 = vmatprep.mubr.msk.bf16.mxu1 %vm8419_vm0, %v8418_v32 }
 0x5b8   : > { %7181 = vmatprep.subr.bf16.mxu1 %v8418_v32 }
 0x5b9   : > { %v7903_v1 = vpop.eup %7902 }
 0x5ba   : > { %v2852_v55 = vmul.f32 %v7903_v1, %v9238_v49 }
 0x5bc   : > { %v2868_v0 = vpack.c.bf16 %v2852_v55, %v2852_v55 }
 0x5be   : > { %7166 = vmatmul.mubr.msk.bf16.vlgmr.msra.gmra.mxu0 %vm2683_vm3, %v2868_v0 }
 0x5bf   : > { %7177 = vmatprep.mubr.msk.bf16.mxu0 %vm8419_vm0, %v8418_v32 }
 0x5c1   : > { %v7905_v56 = vpop.eup %7904 }
 0x5c2   : > { %v2853_v34 = vmul.f32 %v7905_v56, %v9246_v8 }
 0x5c3   : > { %v2815_v63 = vpop.xlane.xlu1 %2814 }
 0x5c4   : > { %v2869_v4 = vpack.c.bf16 %v2853_v34, %v2853_v34  ;;  %7906 = vrcp.f32 %v2815_v63 }
 0x5c6   : > { %7172 = vmatmul.mubr.msk.bf16.vlgmr.msra.gmra.mxu1 %vm2683_vm3, %v2869_v4 }
 0x5c7   : > { %7183 = vmatprep.mubr.msk.bf16.mxu1 %vm8419_vm0, %v8418_v32 }
 0x5cb   : > { %v2818_v49 = vpop.xlane.xlu1 %2817 }
 0x5d0   : > { %v2812_v7 = vpop.xlane.xlu0 %2811 }
 0x5d1   : > { %7908 = vrcp.f32 %v2812_v7  ;;  %v7907_v5 = vpop.eup %7906 }
 0x5d2   : > { %v2855_v8 = vmul.f32 %v7907_v5, %v9255_v12  ;;  %7910 = vrcp.f32 %v2818_v49 }
 0x5d3   : > { %v2821_v9 = vpop.xlane.xlu1 %2820 }
 0x5d4   : > { %v7423_v6 = vpop.permute.xlu0 %7422  ;;  %7912 = vrcp.f32 %v2821_v9  ;;  %v2871_v20 = vpack.c.bf16 %v2855_v8, %v2855_v8 }
 0x5d5   : > { %v7425_v62 = vunpack.i.h.bf16 %v7423_v6  ;;  %v7424_v59 = vunpack.i.l.bf16 %v7423_v6 }
 0x5d7   : > { %v2887_v13 = vpack.c.bf16 %v7425_v62, %v7425_v62  ;;  %v2886_v18 = vpack.c.bf16 %v7424_v59, %v7424_v59 }
 0x5d8   : > { %v7433_v11 = vpop.permute.xlu0 %7432 }
 0x5d9   : > { %v3357_v15 = vsel %vm2895_vm2, %v2886_v18, 0  ;;  %v3403_v16 = vsel %vm2895_vm2, %v2887_v13, 0  ;;  %v7435_v29 = vunpack.i.h.bf16 %v7433_v11 }
 0x5da   : > { %7176 = vmatpush3.bf16.msra.mxu0 %v3357_v15  ;;  %7182 = vmatpush3.bf16.msra.mxu1 %v3403_v16 }
 0x5db   : > { %v9350_v17 = vpop.f32.mrf.mxu0  ;;  %7187 = vmatprep.subr.bf16.mxu0 %v8418_v32  ;;  %7193 = vmatprep.subr.bf16.mxu1 %v8418_v32  ;;  %v2824_v22 = vpop.xlane.xlu1 %2823  ;;  %v2891_v48 = vpack.c.bf16 %v7435_v29, %v7435_v29 }
 0x5dc   : > { %7914 = vrcp.f32 %v2824_v22 }
 0x5dd   : > { %v7119_v19 = vpop.f32.mrf.mxu0  ;;  %7184 = vmatmul.mubr.msk.bf16.vlgmr.msra.gmra.mxu1 %vm2683_vm3, %v2871_v20 }
 0x5de   : > { %v7909_v24 = vpop.eup %7908  ;;  %7195 = vmatprep.mubr.msk.bf16.mxu1 %vm8419_vm0, %v8418_v32 }
 0x5df   : > { %v2936_v12 = vpop.f32.mrf.mxu0  ;;  %v2854_v25 = vmul.f32 %v7909_v24, %v9264_v45  ;;  %v7911_v28 = vpop.eup %7910  ;;  %v7434_v45 = vunpack.i.l.bf16 %v7433_v11  ;;  %v7610_v24 = vld [vmem:[%s8780_s28 + $0x70] ss:$8 sps:$4 sm:$0xff]  }
 0x5e0   : > { %v2856_v44 = vmul.f32 %v7911_v28, %v9260_v3  ;;  %v7612_v12 = vld [vmem:[%s8780_s28 + $0x74] ss:$8 sps:$4 sm:$0xff]   ;;  %v7616_v28 = vld [vmem:[%s8780_s28 + $0x50] ss:$8 sps:$4 sm:$0xff]  }
 0x5e1   : > { %v7120_v60 = vpop.f32.mrf.mxu0  ;;  %v2870_v27 = vpack.c.bf16 %v2854_v25, %v2854_v25  ;;  %v7913_v36 = vpop.eup %7912  ;;  %v2890_v50 = vpack.c.bf16 %v7434_v45, %v7434_v45  ;;  %v7615_v25 = vld [vmem:[%s8780_s28 + $0x64] ss:$8 sps:$4 sm:$0xff]   ;;  %v7619_v45 = vld [vmem:[%s8780_s28 + $0x40] ss:$8 sps:$4 sm:$0xff]  }
 0x5e2   : > { %v2857_v35 = vmul.f32 %v7913_v36, %v9271_v46  ;;  %v2872_v53 = vpack.c.bf16 %v2856_v44, %v2856_v44  ;;  %v3587_v46 = vsel %vm2895_vm2, %v2891_v48, 0  ;;  %v7621_v36 = vld [vmem:[%s8780_s28 + $0x44] ss:$8 sps:$4 sm:$0xff]   ;;  %v7625_v48 = vld [vmem:[%s8780_s28 + $0x20] ss:$8 sps:$4 sm:$0xff]  }
 0x5e3   : > { %v9358_v26 = vpop.f32.mrf.mxu1  ;;  %v2827_v14 = vpop.xlane.xlu1 %2826  ;;  %7178 = vmatmul.mubr.msk.bf16.vlgmr.msra.gmra.mxu0 %vm2683_vm3, %v2870_v27  ;;  %v3541_v3 = vsel %vm2895_vm2, %v2890_v50, 0  ;;  %v7613_v27 = vld [vmem:[%s8780_s28 + $0x60] ss:$8 sps:$4 sm:$0xff]   ;;  %v7630_v50 = vld [vmem:[%s8780_s28 + $0x14] ss:$8 sps:$4 sm:$0xff]  }
 0x5e4   : > { %7916 = vrcp.f32 %v2827_v14  ;;  %7189 = vmatprep.mubr.msk.bf16.mxu0 %vm8419_vm0, %v8418_v32  ;;  %v2873_v57 = vpack.c.bf16 %v2857_v35, %v2857_v35  ;;  %v7618_v14 = vld [vmem:[%s8780_s28 + $0x54] ss:$8 sps:$4 sm:$0xff]  }
 0x5e5   : > { %v7125_v31 = vpop.f32.mrf.mxu1 }
 0x5e7   : > { %v2982_v30 = vpop.f32.mrf.mxu1  ;;  %v7428_v21 = vpop.permute.xlu1 %7427 }
 0x5e8   : > { %v7430_v37 = vunpack.i.h.bf16 %v7428_v21  ;;  %v7429_v23 = vunpack.i.l.bf16 %v7428_v21 }
 0x5e9   : > { %v7126_v43 = vpop.f32.mrf.mxu1  ;;  %v7915_v58 = vpop.eup %7914 }
 0x5ea   : > { %v2889_v39 = vpack.c.bf16 %v7430_v37, %v7430_v37  ;;  %v2888_v54 = vpack.c.bf16 %v7429_v23, %v7429_v23  ;;  %v2858_v55 = vmul.f32 %v7915_v58, %v9277_v2  ;;  %v7624_v37 = vld [vmem:[%s8780_s28 + $0x34] ss:$8 sps:$4 sm:$0xff]  }
 0x5ec   : > { %v3449_v52 = vsel %vm2895_vm2, %v2888_v54, 0  ;;  %v3495_v38 = vsel %vm2895_vm2, %v2889_v39, 0  ;;  %v2874_v56 = vpack.c.bf16 %v2858_v55, %v2858_v55  ;;  %v7622_v39 = vld [vmem:[%s8780_s28 + $0x30] ss:$8 sps:$4 sm:$0xff]   ;;  %v7627_v54 = vld [vmem:[%s8780_s28 + $0x24] ss:$8 sps:$4 sm:$0xff]  }
 0x5ed   : > { %7188 = vmatpush3.bf16.msra.mxu0 %v3449_v52  ;;  %7194 = vmatpush3.bf16.msra.mxu1 %v3495_v38 }
 0x5ee   : > { %7199 = vmatprep.subr.bf16.mxu0 %v8418_v32  ;;  %7205 = vmatprep.subr.bf16.mxu1 %v8418_v32 }
 0x5f0   : > { %7190 = vmatmul.mubr.msk.bf16.vlgmr.msra.gmra.mxu0 %vm2683_vm3, %v2872_v53  ;;  %7196 = vmatmul.mubr.msk.bf16.vlgmr.msra.gmra.mxu1 %vm2683_vm3, %v2873_v57  ;;  %v7628_v53 = vld [vmem:[%s8780_s28 + $0x10] ss:$8 sps:$4 sm:$0xff]   ;;  %v7633_v57 = vld [vmem:[%s8780_s28 + $0x4] ss:$8 sps:$4 sm:$0xff]  }
 0x5f1   : > { %v7917_v1 = vpop.eup %7916  ;;  %7200 = vmatpush3.bf16.msra.mxu0 %v3541_v3  ;;  %7206 = vmatpush3.bf16.msra.mxu1 %v3587_v46  ;;  %v7631_v46 = vld [vmem:[%s8780_s28] ss:$8 sps:$4 sm:$0xff]  }
 0x5f2   : > { %7201 = vmatprep.mubr.msk.bf16.mxu0 %vm8419_vm0, %v8418_v32  ;;  %7207 = vmatprep.mubr.msk.bf16.mxu1 %vm8419_vm0, %v8418_v32  ;;  %v2859_v0 = vmul.f32 %v7917_v1, %v9287_v10  ;;  %v7636_v1 = vld [vmem:[%s8780_s28 + $0xf4] ss:$8 sps:$4 sm:$0xff]  }
 0x5f3   : > { %3897 = vmatprep.subr.bf16.mxu0 %v7612_v12  ;;  %v7657_v12 = vld [vmem:[%s8780_s28 + $0x84] ss:$8 sps:$4 sm:$0xff]  }
 0x5f4   : > { %v2875_v34 = vpack.c.bf16 %v2859_v0, %v2859_v0  ;;  %v7634_v0 = vld [vmem:[%s8780_s28 + $0xf0] ss:$8 sps:$4 sm:$0xff]  }
 0x5f8   : > { %7202 = vmatmul.mubr.msk.bf16.vlgmr.msra.gmra.mxu0 %vm2683_vm3, %v2874_v56  ;;  %7208 = vmatmul.mubr.msk.bf16.vlgmr.msra.gmra.mxu1 %vm2683_vm3, %v2875_v34  ;;  %v7639_v56 = vld [vmem:[%s8780_s28 + $0xe4] ss:$8 sps:$4 sm:$0xff]   ;;  %v7637_v34 = vld [vmem:[%s8780_s28 + $0xe0] ss:$8 sps:$4 sm:$0xff]  }
 0x5f9   : > { %3898 = vmatpush1.bf16.msra.mxu0 %v7610_v24  ;;  %v7655_v24 = vld [vmem:[%s8780_s28 + $0x80] ss:$8 sps:$4 sm:$0xff]  }
 0x5fa   : > { %3899 = vmatprep.subr.bf16.mxu0 %v7615_v25 }
 0x5fd   : > { %3900 = vmatpush1.bf16.msra.mxu0 %v7613_v27 }
 0x5fe   : > { %3901 = vmatprep.subr.bf16.mxu0 %v7618_v14 }
 0x601   : > { %3902 = vmatpush1.bf16.msra.mxu0 %v7616_v28 }
 0x602   : > { %3903 = vmatprep.subr.bf16.mxu0 %v7621_v36 }
 0x605   : > { %3904 = vmatpush1.bf16.msra.mxu0 %v7619_v45 }
 0x606   : > { %3905 = vmatprep.subr.bf16.mxu0 %v7624_v37 }
 0x609   : > { %3906 = vmatpush1.bf16.msra.mxu0 %v7622_v39 }
 0x60a   : > { %3907 = vmatprep.subr.bf16.mxu0 %v7627_v54 }
 0x60d   : > { %3908 = vmatpush1.bf16.msra.mxu0 %v7625_v48 }
 0x60e   : > { %3909 = vmatprep.subr.bf16.mxu0 %v7630_v50 }
 0x611   : > { %3910 = vmatpush1.bf16.msra.mxu0 %v7628_v53 }
 0x612   : > { %3911 = vmatprep.subr.bf16.mxu0 %v7633_v57 }
 0x615   : > { %3912 = vmatpush1.bf16.msra.mxu0 %v7631_v46 }
 0x616   : > { %3913 = vmatprep.subr.bf16.mxu0 %v7636_v1 }
 0x619   : > { %3914 = vmatpush2.bf16.msra.mxu0 %v7634_v0 }
 0x61a   : > { %3915 = vmatprep.subr.bf16.mxu0 %v7639_v56 }
 0x61d   : > { %3916 = vmatpush2.bf16.msra.mxu0 %v7637_v34 }
 0x64e   : > { %v3025_v63 = vpop.f32.mrf.mxu0 }
 0x650   : > { %v7131_v4 = vpop.f32.mrf.mxu0 }
 0x651   : > { %v7642_v4 = vld [vmem:[%s8780_s28 + $0xd4] ss:$8 sps:$4 sm:$0xff]  }
 0x652   : > { %v3028_v7 = vpop.f32.mrf.mxu0  ;;  %3917 = vmatprep.subr.bf16.mxu0 %v7642_v4 }
 0x653   : > { %v7645_v7 = vld [vmem:[%s8780_s28 + $0xc4] ss:$8 sps:$4 sm:$0xff]  }
 0x654   : > { %v7132_v49 = vpop.f32.mrf.mxu0 }
 0x656   : > { %v3071_v5 = vpop.f32.mrf.mxu1 }
 0x657   : > { %v7436_v6 = vpack.i.bf16 %v3071_v5, %v3025_v63  ;;  %v7640_v63 = vld [vmem:[%s8780_s28 + $0xd0] ss:$8 sps:$4 sm:$0xff]   ;;  %v7643_v5 = vld [vmem:[%s8780_s28 + $0xc0] ss:$8 sps:$4 sm:$0xff]  }
 0x658   : > { %v7137_v62 = vpop.f32.mrf.mxu1  ;;  %3918 = vmatpush2.bf16.msra.mxu0 %v7640_v63 }
 0x659   : > { %7437 = vrot.lane.b32.xlu0 %v7436_v6, %s8422_s27  ;;  %3919 = vmatprep.subr.bf16.mxu0 %v7645_v7  ;;  %v7648_v62 = vld [vmem:[%s8780_s28 + $0xb4] ss:$8 sps:$4 sm:$0xff]  }
 0x65a   : > { %v3074_v32 = vpop.f32.mrf.mxu1 }
 0x65c   : > { %v7138_v2 = vpop.f32.mrf.mxu1  ;;  %3920 = vmatpush2.bf16.msra.mxu0 %v7643_v5 }
 0x65d   : > { %v7646_v2 = vld [vmem:[%s8780_s28 + $0xb0] ss:$8 sps:$4 sm:$0xff]   ;;  %3921 = vmatprep.subr.bf16.mxu0 %v7648_v62 }
 0x65e   : > { %v3117_v10 = vpop.f32.mrf.mxu0 }
 0x660   : > { %v7143_v59 = vpop.f32.mrf.mxu0  ;;  %3922 = vmatpush2.bf16.msra.mxu0 %v7646_v2 }
 0x662   : > { %v3120_v9 = vpop.f32.mrf.mxu0 }
 0x664   : > { %v7144_v13 = vpop.f32.mrf.mxu0 }
 0x666   : > { %v3163_v18 = vpop.f32.mrf.mxu1 }
 0x667   : > { %v7441_v8 = vpack.i.bf16 %v3163_v18, %v3117_v10 }
 0x668   : > { %v7149_v15 = vpop.f32.mrf.mxu1 }
 0x669   : > { %7442 = vrot.lane.b32.xlu1 %v7441_v8, %s8421_s0  ;;  %v7651_v8 = vld [vmem:[%s8780_s28 + $0xa4] ss:$8 sps:$4 sm:$0xff]   ;;  %v7649_v15 = vld [vmem:[%s8780_s28 + $0xa0] ss:$8 sps:$4 sm:$0xff]  }
 0x66a   : > { %v3166_v16 = vpop.f32.mrf.mxu1  ;;  %3923 = vmatprep.subr.bf16.mxu0 %v7651_v8 }
 0x66b   : > { %v7654_v16 = vld [vmem:[%s8780_s28 + $0x94] ss:$8 sps:$4 sm:$0xff]   ;;  %3924 = vmatpush2.bf16.msra.mxu0 %v7649_v15 }
 0x66c   : > { %v7150_v20 = vpop.f32.mrf.mxu1  ;;  %3925 = vmatprep.subr.bf16.mxu0 %v7654_v16  ;;  %v3725_v16 = vld [vmem:[%s770_s18] sm:$0x3] }
 0x66e   : > { %v3209_v19 = vpop.f32.mrf.mxu0 }
 0x670   : > { %v7155_v22 = vpop.f32.mrf.mxu0 }
 0x672   : > { %v3212_v60 = vpop.f32.mrf.mxu0 }
 0x674   : > { %v7156_v31 = vpop.f32.mrf.mxu0 }
 0x676   : > { %v3255_v11 = vpop.f32.mrf.mxu1 }
 0x677   : > { %v7461_v30 = vpack.i.bf16 %v3255_v11, %v3209_v19  ;;  %v7652_v19 = vld [vmem:[%s8780_s28 + $0x90] ss:$8 sps:$4 sm:$0xff]  }
 0x678   : > { %v7161_v21 = vpop.f32.mrf.mxu1  ;;  %3926 = vmatpush2.bf16.msra.mxu0 %v7652_v19 }
 0x679   : > { %7462 = vrot.lane.b32.xlu1 %v7461_v30, %s8420_s30  ;;  %3927 = vmatprep.subr.bf16.mxu0 %v7657_v12 }
 0x67a   : > { %v3258_v29 = vpop.f32.mrf.mxu1 }
 0x67c   : > { %v7162_v23 = vpop.f32.mrf.mxu1  ;;  %3928 = vmatpush2.bf16.msra.mxu0 %v7655_v24 }
 0x67e   : > { %v9393_v43 = vpop.f32.mrf.mxu0 }
 0x680   : > { %v7167_v44 = vpop.f32.mrf.mxu0 }
 0x682   : > { %v3304_v35 = vpop.f32.mrf.mxu0 }
 0x684   : > { %v7168_v52 = vpop.f32.mrf.mxu0 }
 0x686   : > { %v9399_v38 = vpop.f32.mrf.mxu1 }
 0x688   : > { %v7173_v58 = vpop.f32.mrf.mxu1 }
 0x68a   : > { %v3350_v3 = vpop.f32.mrf.mxu1 }
 0x68c   : > { %v7174_v55 = vpop.f32.mrf.mxu1 }
 0x69d   : > { %v3439_v49 = vpop.f32.mrf.mxu1 }
 0x69f   : > { %v7185_v6 = vpop.f32.mrf.mxu1 }
 0x6a1   : > { %v3442_v32 = vpop.f32.mrf.mxu1 }
 0x6a3   : > { %v3393_v10 = vpop.f32.mrf.mxu0  ;;  %v7186_v59 = vpop.f32.mrf.mxu1 }
 0x6a4   : > { %v7446_v9 = vpack.i.bf16 %v3439_v49, %v3393_v10 }
 0x6a5   : > { %v7179_v13 = vpop.f32.mrf.mxu0 }
 0x6a6   : > { %7447 = vrot.lane.b32.xlu0 %v7446_v9, %s8422_s27 }
 0x6a7   : > { %v3396_v18 = vpop.f32.mrf.mxu0 }
 0x6a9   : > { %v7180_v20 = vpop.f32.mrf.mxu0 }
 0x6b0   : > { %v3485_v22 = vpop.f32.mrf.mxu0  ;;  %v3531_v25 = vpop.f32.mrf.mxu1 }
 0x6b1   : > { %v7451_v60 = vpack.i.bf16 %v3531_v25, %v3485_v22  ;;  %v7954_v25 = vld [vmem:[#allocation2 + $0x10] sm:$0xff] }
 0x6b2   : > { %v7191_v27 = vpop.f32.mrf.mxu0  ;;  %v7197_v14 = vpop.f32.mrf.mxu1 }
 0x6b3   : > { %7452 = vrot.lane.b32.xlu0 %v7451_v60, %s8421_s0  ;;  %v7955_v27 = vld [vmem:[#allocation2] sm:$0xff] }
 0x6b4   : > { %v3488_v31 = vpop.f32.mrf.mxu0  ;;  %v3534_v11 = vpop.f32.mrf.mxu1 }
 0x6b6   : > { %v7192_v28 = vpop.f32.mrf.mxu0  ;;  %v7198_v30 = vpop.f32.mrf.mxu1 }
 0x6b8   : > { %v3577_v36 = vpop.f32.mrf.mxu0  ;;  %v3623_v21 = vpop.f32.mrf.mxu1 }
 0x6b9   : > { %v7456_v29 = vpack.i.bf16 %v3623_v21, %v3577_v36  ;;  %v7956_v36 = vld [vmem:[#allocation2 + $0x18] sm:$0xff] }
 0x6ba   : > { %v7203_v45 = vpop.f32.mrf.mxu0  ;;  %v7209_v37 = vpop.f32.mrf.mxu1 }
 0x6bb   : > { %7457 = vrot.lane.b32.xlu0 %v7456_v29, %s8420_s30  ;;  %v7957_v29 = vld [vmem:[#allocation2 + $0x8] sm:$0xff] }
 0x6bc   : > { %v3580_v23 = vpop.f32.mrf.mxu0  ;;  %v3626_v39 = vpop.f32.mrf.mxu1 }
 0x6bd   : > { %v4066_v23 = vld [vmem:[%s8785_s19 + $0x1c0] sm:$0xff] }
 0x6be   : > { %v7204_v54 = vpop.f32.mrf.mxu0  ;;  %v7210_v44 = vpop.f32.mrf.mxu1  ;;  %v4070_v39 = vld [vmem:[%s8785_s19 + $0x1e0] sm:$0xff] }
 0x6bf   : > { %v4067_v54 = vld [vmem:[%s8785_s19 + $0x1c8] sm:$0xff]  ;;  %v6741_v44 = vcombine.low %v4066_v23, %v4070_v39 }
 0x6cb   : > { %v7438_v35 = vpop.permute.xlu0 %7437 }
 0x6cc   : > { %v7440_v52 = vunpack.i.h.bf16 %v7438_v35  ;;  %v7439_v53 = vunpack.i.l.bf16 %v7438_v35  ;;  %v6742_v35 = vcombine.high %v4066_v23, %v4070_v39  ;;  %v4010_v39 = vld [vmem:[%s8785_s19] sm:$0xff] }
 0x6ce   : > { %v3678_v4 = vsel %vm1913_vm1, %v9358_v26, %v7440_v52  ;;  %v3677_v7 = vsel %vm1913_vm1, %v9350_v17, %v7439_v53  ;;  %v4062_v52 = vld [vmem:[%s8785_s19 + $0x1a0] sm:$0xff]  ;;  %4820 = vmatprep.subr.bf16.mxu1 %v6742_v35  ;;  %v4015_v35 = vld [vmem:[%s8785_s19 + $0x28] sm:$0xff] }
 0x6cf   : > { %4821 = vmatpush1.bf16.msra.mxu1 %v6741_v44  ;;  %v4011_v44 = vld [vmem:[%s8785_s19 + $0x8] sm:$0xff] }
 0x6db   : > { %v7443_v48 = vpop.permute.xlu1 %7442 }
 0x6dc   : > { %v7445_v3 = vunpack.i.h.bf16 %v7443_v48  ;;  %v7444_v46 = vunpack.i.l.bf16 %v7443_v48  ;;  %v4071_v48 = vld [vmem:[%s8785_s19 + $0x1e8] sm:$0xff] }
 0x6dd   : > { %v6743_v53 = vcombine.low %v4067_v54, %v4071_v48 }
 0x6de   : > { %v3681_v49 = vsel %vm3679_vm4, %v3678_v4, %v7445_v3  ;;  %v3680_v5 = vsel %vm3679_vm4, %v3677_v7, %v7444_v46  ;;  %v4059_v3 = vld [vmem:[%s8785_s19 + $0x188] sm:$0xff] }
 0x6df   : > { %v4063_v46 = vld [vmem:[%s8785_s19 + $0x1a8] sm:$0xff] }
 0x6e0   : > { %v6735_v4 = vcombine.low %v4059_v3, %v4063_v46 }
 0x6eb   : > { %v7463_v57 = vpop.permute.xlu1 %7462 }
 0x6ec   : > { %v7465_v0 = vunpack.i.h.bf16 %v7463_v57  ;;  %v7464_v56 = vunpack.i.l.bf16 %v7463_v57  ;;  %v6744_v57 = vcombine.high %v4067_v54, %v4071_v48  ;;  %v4014_v54 = vld [vmem:[%s8785_s19 + $0x20] sm:$0xff] }
 0x6ee   : > { %v3684_v59 = vsel %vm3682_vm5, %v3681_v49, %v7465_v0  ;;  %v3683_v26 = vsel %vm3682_vm5, %v3680_v5, %v7464_v56  ;;  %v4054_v0 = vld [vmem:[%s8785_s19 + $0x160] sm:$0xff]  ;;  %v4051_v56 = vld [vmem:[%s8785_s19 + $0x148] sm:$0xff]  ;;  %4863 = vmatprep.subr.bf16.mxu0 %v6744_v57 }
 0x6ef   : > { %v3691_v15 = vpack.c.bf16 %v3684_v59, %v3683_v26  ;;  %v4042_v5 = vld [vmem:[%s8785_s19 + $0x100] sm:$0xff] }
 0x6f0   : > { %v4130_v57 = vld [vmem:[%s8785_s19 + $0x3c0] sm:$0xff] }
 0x718   : > { %v7448_v50 = vpop.permute.xlu0 %7447 }
 0x719   : > { %v7450_v1 = vunpack.i.h.bf16 %v7448_v50  ;;  %v7449_v55 = vunpack.i.l.bf16 %v7448_v50  ;;  %v4058_v50 = vld [vmem:[%s8785_s19 + $0x180] sm:$0xff] }
 0x71b   : > { %v3686_v62 = vsel %vm1913_vm1, %v9399_v38, %v7450_v1  ;;  %v3685_v32 = vsel %vm1913_vm1, %v9393_v43, %v7449_v55  ;;  %v3730_v38 = vrot.slane %v3725_v16, %v8896_v42  ;;  %v3734_v43 = vrot.slane %v3725_v16, %v8893_v41  ;;  %v4050_v1 = vld [vmem:[%s8785_s19 + $0x140] sm:$0xff] }
 0x71c   : > { %v6736_v55 = vcombine.high %v4059_v3, %v4063_v46  ;;  %v6726_v7 = vcombine.high %v4050_v1, %v4054_v0  ;;  %v4131_v3 = vld [vmem:[%s8785_s19 + $0x3c8] sm:$0xff] }
 0x71d   : > { %v4135_v46 = vld [vmem:[%s8785_s19 + $0x3e8] sm:$0xff] }
 0x725   : > { %v7453_v58 = vpop.permute.xlu0 %7452 }
 0x726   : > { %v7455_v34 = vunpack.i.h.bf16 %v7453_v58  ;;  %v7454_v63 = vunpack.i.l.bf16 %v7453_v58  ;;  %v6734_v58 = vcombine.high %v4058_v50, %v4062_v52 }
 0x728   : > { %v3688_v9 = vsel %vm3679_vm4, %v3686_v62, %v7455_v34  ;;  %v3687_v17 = vsel %vm3679_vm4, %v3685_v32, %v7454_v63  ;;  %v4055_v34 = vld [vmem:[%s8785_s19 + $0x168] sm:$0xff]  ;;  %v6733_v63 = vcombine.low %v4058_v50, %v4062_v52  ;;  %4822 = vmatprep.subr.bf16.mxu1 %v6734_v58  ;;  %v6686_v52 = vcombine.high %v4010_v39, %v4014_v54  ;;  %v4134_v58 = vld [vmem:[%s8785_s19 + $0x3e0] sm:$0xff] }
 0x729   : > { %v6728_v49 = vcombine.high %v4051_v56, %v4055_v34  ;;  %v4043_v62 = vld [vmem:[%s8785_s19 + $0x108] sm:$0xff] }
 0x72a   : > { %v4047_v32 = vld [vmem:[%s8785_s19 + $0x128] sm:$0xff]  ;;  %4823 = vmatpush1.bf16.msra.mxu1 %v6733_v63  ;;  %v6807_v63 = vcombine.low %v4131_v3, %v4135_v46 }
 0x72b   : > { %4824 = vmatprep.subr.bf16.mxu1 %v6726_v7  ;;  %v6720_v26 = vcombine.high %v4043_v62, %v4047_v32 }
 0x72d   : > { %v7458_v6 = vpop.permute.xlu0 %7457 }
 0x72e   : > { %v7460_v2 = vunpack.i.h.bf16 %v7458_v6  ;;  %v7459_v10 = vunpack.i.l.bf16 %v7458_v6  ;;  %v4046_v6 = vld [vmem:[%s8785_s19 + $0x120] sm:$0xff] }
 0x72f   : > { %v6718_v59 = vcombine.high %v4042_v5, %v4046_v6 }
 0x730   : > { %v3689_v13 = vsel %vm3682_vm5, %v3687_v17, %v7459_v10  ;;  %v3690_v18 = vsel %vm3682_vm5, %v3688_v9, %v7460_v2  ;;  %v6725_v2 = vcombine.low %v4050_v1, %v4054_v0  ;;  %v6727_v10 = vcombine.low %v4051_v56, %v4055_v34  ;;  %v4034_v9 = vld [vmem:[%s8785_s19 + $0xc0] sm:$0xff] }
 0x731   : > { %v3692_v8 = vpack.c.bf16 %v3690_v18, %v3689_v13  ;;  %v4038_v17 = vld [vmem:[%s8785_s19 + $0xe0] sm:$0xff]  ;;  %v4035_v13 = vld [vmem:[%s8785_s19 + $0xc8] sm:$0xff]  ;;  %v6685_v1 = vcombine.low %v4010_v39, %v4014_v54  ;;  %v6806_v0 = vcombine.high %v4130_v57, %v4134_v58  ;;  %v6808_v56 = vcombine.high %v4131_v3, %v4135_v46 }
 0x732   : > { %v4039_v18 = vld [vmem:[%s8785_s19 + $0xe8] sm:$0xff]  ;;  %4825 = vmatpush1.bf16.msra.mxu1 %v6725_v2  ;;  %v6710_v16 = vcombine.high %v4034_v9, %v4038_v17  ;;  %v6805_v34 = vcombine.low %v4130_v57, %v4134_v58  ;;  %v4098_v54 = vld [vmem:[%s8785_s19 + $0x2c0] sm:$0xff] }
 0x733   : > { %3929 = vmatprep.mubr.bf16.mxu0 %v3692_v8  ;;  %v6717_v8 = vcombine.low %v4042_v5, %v4046_v6  ;;  %4826 = vmatprep.subr.bf16.mxu1 %v6718_v59  ;;  %v4111_v39 = vld [vmem:[%s8785_s19 + $0x328] sm:$0xff]  ;;  %v4090_v57 = vld [vmem:[%s8785_s19 + $0x280] sm:$0xff] }
 0x734   : > { %3930 = vmatmul.mubr.bf16.vlgmr.msra.gmra.mxu0 %v3691_v15  ;;  %v6719_v15 = vcombine.low %v4043_v62, %v4047_v32  ;;  %v4094_v3 = vld [vmem:[%s8785_s19 + $0x2a0] sm:$0xff]  ;;  %v4091_v46 = vld [vmem:[%s8785_s19 + $0x288] sm:$0xff] }
 0x735   : > { %4864 = vmatpush1.bf16.msra.mxu0 %v6743_v53  ;;  %v6688_v53 = vcombine.high %v4011_v44, %v4015_v35 }
 0x736   : > { %4865 = vmatprep.subr.bf16.mxu0 %v6736_v55  ;;  %4827 = vmatpush1.bf16.msra.mxu1 %v6717_v8  ;;  %v6687_v55 = vcombine.low %v4011_v44, %v4015_v35  ;;  %v4126_v8 = vld [vmem:[%s8785_s19 + $0x3a0] sm:$0xff] }
 0x737   : > { %4828 = vmatprep.subr.bf16.mxu1 %v6710_v16  ;;  %v4102_v44 = vld [vmem:[%s8785_s19 + $0x2e0] sm:$0xff] }
 0x739   : > { %4866 = vmatpush1.bf16.msra.mxu0 %v6735_v4 }
 0x73a   : > { %4867 = vmatprep.subr.bf16.mxu0 %v6728_v49 }
 0x73d   : > { %4868 = vmatpush1.bf16.msra.mxu0 %v6727_v10 }
 0x73e   : > { %4869 = vmatprep.subr.bf16.mxu0 %v6720_v26 }
 0x741   : > { %4870 = vmatpush1.bf16.msra.mxu0 %v6719_v15  ;;  %v4123_v15 = vld [vmem:[%s8785_s19 + $0x388] sm:$0xff] }
 0x7f4   : > { %v3931_v20 = vpop.f32.mrf.mxu0 }
 0x7f5   : > { %v3932_v19 = vadd.f32 %v3931_v20, %v3730_v38  ;;  %v4030_v20 = vld [vmem:[%s8785_s19 + $0xa0] sm:$0xff] }
 0x7f6   : > { %v3933_v24 = vpop.f32.mrf.mxu0 }
 0x7f7   : > { %v3934_v12 = vadd.f32 %v3933_v24, %v3734_v43  ;;  %v9439_v60 = vadd.f32 %v7954_v25, %v3932_v19  ;;  %v4027_v19 = vld [vmem:[%s8785_s19 + $0x88] sm:$0xff] }
 0x7f8   : > { %v3935_v22 = vpop.f32.mrf.mxu0  ;;  %v4031_v24 = vld [vmem:[%s8785_s19 + $0xa8] sm:$0xff] }
 0x7f9   : > { %v9441_v14 = vadd.f32 %v7955_v27, %v3934_v12  ;;  %v3936_v31 = vadd.f32 %v3935_v22, %v3730_v38  ;;  %v6712_v38 = vcombine.high %v4035_v13, %v4039_v18  ;;  %v6709_v12 = vcombine.low %v4034_v9, %v4038_v17 }
 0x7fa   : > { %v3937_v11 = vpop.f32.mrf.mxu0  ;;  %v6711_v22 = vcombine.low %v4035_v13, %v4039_v18  ;;  %v6704_v27 = vcombine.high %v4027_v19, %v4031_v24  ;;  %v4122_v18 = vld [vmem:[%s8785_s19 + $0x380] sm:$0xff] }
 0x7fb   : > { %v3938_v28 = vadd.f32 %v3937_v11, %v3734_v43  ;;  %v3946_v30 = vadd.f32 %v9441_v14, %v9439_v60  ;;  %v9445_v21 = vadd.f32 %v7956_v36, %v3936_v31  ;;  %v4026_v43 = vld [vmem:[%s8785_s19 + $0x80] sm:$0xff]  ;;  %4871 = vmatprep.subr.bf16.mxu0 %v6712_v38  ;;  %4829 = vmatpush1.bf16.msra.mxu1 %v6709_v12  ;;  %v4127_v38 = vld [vmem:[%s8785_s19 + $0x3a8] sm:$0xff] }
 0x7fc   : > { %v6702_v25 = vcombine.high %v4026_v43, %v4030_v20  ;;  %v4018_v31 = vld [vmem:[%s8785_s19 + $0x40] sm:$0xff]  ;;  %v6701_v36 = vcombine.low %v4026_v43, %v4030_v20  ;;  %4872 = vmatpush1.bf16.msra.mxu0 %v6711_v22  ;;  %v6798_v16 = vcombine.high %v4122_v18, %v4126_v8  ;;  %v6797_v43 = vcombine.low %v4122_v18, %v4126_v8  ;;  %v4115_v22 = vld [vmem:[%s8785_s19 + $0x348] sm:$0xff] }
 0x7fd   : > { %v9447_v45 = vadd.f32 %v7957_v29, %v3938_v28  ;;  %3947 = vadd.xlane.f32.xlu0 %v3946_v30  ;;  %v4022_v11 = vld [vmem:[%s8785_s19 + $0x60] sm:$0xff]  ;;  %v4019_v28 = vld [vmem:[%s8785_s19 + $0x48] sm:$0xff]  ;;  %v6703_v29 = vcombine.low %v4027_v19, %v4031_v24  ;;  %4873 = vmatprep.subr.bf16.mxu0 %v6704_v27  ;;  %v6799_v20 = vcombine.low %v4123_v15, %v4127_v38 }
 0x7fe   : > { %v4023_v30 = vld [vmem:[%s8785_s19 + $0x68] sm:$0xff]  ;;  %4830 = vmatprep.subr.bf16.mxu1 %v6702_v25  ;;  %v6693_v48 = vcombine.low %v4018_v31, %v4022_v11  ;;  %v6800_v19 = vcombine.high %v4123_v15, %v4127_v38  ;;  %v4114_v24 = vld [vmem:[%s8785_s19 + $0x340] sm:$0xff] }
 0x7ff   : > { %v3949_v37 = vadd.f32 %v9447_v45, %v9445_v21  ;;  %v6696_v23 = vcombine.high %v4019_v28, %v4023_v30  ;;  %4831 = vmatpush1.bf16.msra.mxu1 %v6701_v36  ;;  %v6695_v50 = vcombine.low %v4019_v28, %v4023_v30  ;;  %v4118_v12 = vld [vmem:[%s8785_s19 + $0x360] sm:$0xff]  ;;  %v4119_v27 = vld [vmem:[%s8785_s19 + $0x368] sm:$0xff] }
 0x800   : > { %4874 = vmatpush1.bf16.msra.mxu0 %v6703_v29  ;;  %v6790_v25 = vcombine.high %v4114_v24, %v4118_v12  ;;  %v6792_v28 = vcombine.high %v4115_v22, %v4119_v27  ;;  %v4106_v30 = vld [vmem:[%s8785_s19 + $0x300] sm:$0xff]  ;;  %v4107_v29 = vld [vmem:[%s8785_s19 + $0x308] sm:$0xff] }
 0x801   : > { %3950 = vadd.xlane.f32.xlu1 %v3949_v37  ;;  %v6694_v37 = vcombine.high %v4018_v31, %v4022_v11  ;;  %4875 = vmatprep.subr.bf16.mxu0 %v6696_v23  ;;  %v6789_v31 = vcombine.low %v4114_v24, %v4118_v12  ;;  %v6791_v11 = vcombine.low %v4115_v22, %v4119_v27  ;;  %v4110_v36 = vld [vmem:[%s8785_s19 + $0x320] sm:$0xff]  ;;  %v4079_v18 = vld [vmem:[%s8785_s19 + $0x228] sm:$0xff]  ;;  %v4072_v24 = vld [vmem:[%s8785_s19 + $0x1f0] sm:$0xff] }
 0x802   : > { %v6782_v23 = vcombine.high %v4106_v30, %v4110_v36  ;;  %v6783_v35 = vcombine.low %v4107_v29, %v4111_v39  ;;  %v4069_v12 = vld [vmem:[%s8785_s19 + $0x1d8] sm:$0xff] }
 0x803   : > { %4832 = vmatprep.subr.bf16.mxu1 %v6694_v37  ;;  %v6781_v37 = vcombine.low %v4106_v30, %v4110_v36 }
 0x804   : > { %4833 = vmatpush1.bf16.msra.mxu1 %v6693_v48  ;;  %4876 = vmatpush1.bf16.msra.mxu0 %v6695_v50  ;;  %v6784_v48 = vcombine.high %v4107_v29, %v4111_v39  ;;  %v6774_v50 = vcombine.high %v4098_v54, %v4102_v44  ;;  %v3944_v39 = vld [vmem:[%s779_s22] sm:$0x3] }
 0x805   : > { %4834 = vmatprep.subr.bf16.mxu1 %v6686_v52  ;;  %4877 = vmatprep.subr.bf16.mxu0 %v6688_v53  ;;  %v4099_v52 = vld [vmem:[%s8785_s19 + $0x2c8] sm:$0xff] }
 0x806   : > { %v4103_v53 = vld [vmem:[%s8785_s19 + $0x2e8] sm:$0xff] }
 0x807   : > { %v6776_v58 = vcombine.high %v4099_v52, %v4103_v53 }
 0x808   : > { %4835 = vmatpush1.bf16.msra.mxu1 %v6685_v1  ;;  %4878 = vmatpush1.bf16.msra.mxu0 %v6687_v55  ;;  %v4095_v1 = vld [vmem:[%s8785_s19 + $0x2a8] sm:$0xff]  ;;  %v6773_v55 = vcombine.low %v4098_v54, %v4102_v44  ;;  %v3945_v44 = vld [vmem:[%s788_s4] sm:$0x3] }
 0x809   : > { %4836 = vmatprep.subr.bf16.mxu1 %v6806_v0  ;;  %4879 = vmatprep.subr.bf16.mxu0 %v6808_v56  ;;  %v6775_v0 = vcombine.low %v4099_v52, %v4103_v53  ;;  %v6766_v56 = vcombine.high %v4090_v57, %v4094_v3  ;;  %v3982_v52 = vrot.slane %v3944_v39, %v8896_v42 }
 0x80c   : > { %4837 = vmatpush2.bf16.msra.mxu1 %v6805_v34  ;;  %4880 = vmatpush2.bf16.msra.mxu0 %v6807_v63  ;;  %v6768_v34 = vcombine.high %v4091_v46, %v4095_v1  ;;  %v4082_v63 = vld [vmem:[%s8785_s19 + $0x240] sm:$0xff] }
 0x80d   : > { %4838 = vmatprep.subr.bf16.mxu1 %v6798_v16  ;;  %4881 = vmatprep.subr.bf16.mxu0 %v6800_v19  ;;  %v4068_v19 = vld [vmem:[%s8785_s19 + $0x1d0] sm:$0xff] }
 0x80e   : > { %v6746_v22 = vcombine.high %v4068_v19, %v4072_v24  ;;  %v6745_v27 = vcombine.low %v4068_v19, %v4072_v24  ;;  %v4049_v19 = vld [vmem:[%s8785_s19 + $0x138] sm:$0xff] }
 0x810   : > { %4839 = vmatpush2.bf16.msra.mxu1 %v6797_v43  ;;  %4882 = vmatpush2.bf16.msra.mxu0 %v6799_v20 }
 0x811   : > { %4840 = vmatprep.subr.bf16.mxu1 %v6790_v25  ;;  %4883 = vmatprep.subr.bf16.mxu0 %v6792_v28  ;;  %v4073_v25 = vld [vmem:[%s8785_s19 + $0x1f8] sm:$0xff] }
 0x814   : > { %4841 = vmatpush2.bf16.msra.mxu1 %v6789_v31  ;;  %4884 = vmatpush2.bf16.msra.mxu0 %v6791_v11  ;;  %v6747_v31 = vcombine.low %v4069_v12, %v4073_v25  ;;  %v6748_v11 = vcombine.high %v4069_v12, %v4073_v25 }
 0x815   : > { %4842 = vmatprep.subr.bf16.mxu1 %v6782_v23  ;;  %4885 = vmatprep.subr.bf16.mxu0 %v6784_v48  ;;  %v3986_v48 = vrot.slane %v3944_v39, %v8893_v41  ;;  %v4032_v39 = vld [vmem:[%s8785_s19 + $0xb0] sm:$0xff] }
 0x818   : > { %4843 = vmatpush2.bf16.msra.mxu1 %v6781_v37  ;;  %4886 = vmatpush2.bf16.msra.mxu0 %v6783_v35 }
 0x819   : > { %4844 = vmatprep.subr.bf16.mxu1 %v6774_v50  ;;  %4887 = vmatprep.subr.bf16.mxu0 %v6776_v58  ;;  %v3997_v58 = vrot.slane %v3945_v44, %v8896_v42 }
 0x81c   : > { %4845 = vmatpush2.bf16.msra.mxu1 %v6773_v55  ;;  %4888 = vmatpush2.bf16.msra.mxu0 %v6775_v0 }
 0x81d   : > { %4846 = vmatprep.subr.bf16.mxu1 %v6766_v56  ;;  %4889 = vmatprep.subr.bf16.mxu0 %v6768_v34 }
 0x886   : > { %v3948_v4 = vpop.xlane.xlu0 %3947 }
 0x887   : > { %v3952_v7 = vmul.f32 0.00390625, %v3948_v4  ;;  %v4086_v4 = vld [vmem:[%s8785_s19 + $0x260] sm:$0xff] }
 0x888   : > { %v6757_v8 = vcombine.low %v4082_v63, %v4086_v4 }
 0x889   : > { %v9488_v49 = vsub.f32 %v9439_v60, %v3952_v7  ;;  %v9491_v5 = vsub.f32 %v9441_v14, %v3952_v7  ;;  %v4083_v7 = vld [vmem:[%s8785_s19 + $0x248] sm:$0xff] }
 0x88a   : > { %v3951_v6 = vpop.xlane.xlu1 %3950 }
 0x88b   : > { %v3953_v62 = vmul.f32 0.00390625, %v3951_v6  ;;  %v3958_v32 = vmul.f32 %v9488_v49, %v9488_v49  ;;  %v3959_v2 = vmul.f32 %v9491_v5, %v9491_v5  ;;  %v4087_v6 = vld [vmem:[%s8785_s19 + $0x268] sm:$0xff] }
 0x88c   : > { %v6759_v15 = vcombine.low %v4083_v7, %v4087_v6 }
 0x88d   : > { %v9498_v10 = vsub.f32 %v9445_v21, %v3953_v62  ;;  %v9501_v59 = vsub.f32 %v9447_v45, %v3953_v62  ;;  %v3962_v26 = vadd.f32 %v3959_v2, %v3958_v32  ;;  %v6765_v62 = vcombine.low %v4090_v57, %v4094_v3 }
 0x88e   : > { %v6767_v32 = vcombine.low %v4091_v46, %v4095_v1  ;;  %v6758_v2 = vcombine.high %v4082_v63, %v4086_v4  ;;  %v4001_v57 = vrot.slane %v3945_v44, %v8893_v41  ;;  %v4060_v4 = vld [vmem:[%s8785_s19 + $0x190] sm:$0xff]  ;;  %v4033_v44 = vld [vmem:[%s8785_s19 + $0xb8] sm:$0xff] }
 0x88f   : > { %3963 = vadd.xlane.f32.xlu0 %v3962_v26  ;;  %v3960_v9 = vmul.f32 %v9498_v10, %v9498_v10  ;;  %v3961_v17 = vmul.f32 %v9501_v59, %v9501_v59  ;;  %v6760_v26 = vcombine.high %v4083_v7, %v4087_v6  ;;  %4847 = vmatpush2.bf16.msra.mxu1 %v6765_v62  ;;  %v4064_v7 = vld [vmem:[%s8785_s19 + $0x1b0] sm:$0xff]  ;;  %v4061_v6 = vld [vmem:[%s8785_s19 + $0x198] sm:$0xff] }
 0x890   : > { %4890 = vmatpush2.bf16.msra.mxu0 %v6767_v32  ;;  %4848 = vmatprep.subr.bf16.mxu1 %v6758_v2  ;;  %v4065_v62 = vld [vmem:[%s8785_s19 + $0x1b8] sm:$0xff]  ;;  %v4052_v2 = vld [vmem:[%s8785_s19 + $0x150] sm:$0xff] }
 0x891   : > { %v3965_v13 = vadd.f32 %v3961_v17, %v3960_v9  ;;  %v4074_v9 = vld [vmem:[%s8785_s19 + $0x200] sm:$0xff]  ;;  %4891 = vmatprep.subr.bf16.mxu0 %v6760_v26  ;;  %v6740_v26 = vcombine.high %v4061_v6, %v4065_v62 }
 0x892   : > { %v4078_v17 = vld [vmem:[%s8785_s19 + $0x220] sm:$0xff] }
 0x893   : > { %3966 = vadd.xlane.f32.xlu0 %v3965_v13  ;;  %v4075_v13 = vld [vmem:[%s8785_s19 + $0x208] sm:$0xff]  ;;  %v6750_v16 = vcombine.high %v4074_v9, %v4078_v17  ;;  %4849 = vmatpush2.bf16.msra.mxu1 %v6757_v8  ;;  %v6749_v43 = vcombine.low %v4074_v9, %v4078_v17  ;;  %v4056_v9 = vld [vmem:[%s8785_s19 + $0x170] sm:$0xff]  ;;  %v4053_v17 = vld [vmem:[%s8785_s19 + $0x158] sm:$0xff]  ;;  %v6739_v8 = vcombine.low %v4061_v6, %v4065_v62 }
 0x894   : > { %v6752_v38 = vcombine.high %v4075_v13, %v4079_v18  ;;  %4892 = vmatpush2.bf16.msra.mxu0 %v6759_v15  ;;  %v6751_v20 = vcombine.low %v4075_v13, %v4079_v18  ;;  %v4057_v13 = vld [vmem:[%s8785_s19 + $0x178] sm:$0xff]  ;;  %v6737_v18 = vcombine.low %v4060_v4, %v4064_v7  ;;  %v6730_v15 = vcombine.high %v4052_v2, %v4056_v9  ;;  %v4132_v62 = vld [vmem:[%s8785_s19 + $0x3d0] sm:$0xff] }
 0x895   : > { %4850 = vmatprep.subr.bf16.mxu1 %v6750_v16  ;;  %v6732_v16 = vcombine.high %v4053_v17, %v4057_v13  ;;  %v6729_v24 = vcombine.low %v4052_v2, %v4056_v9  ;;  %v6731_v12 = vcombine.low %v4053_v17, %v4057_v13  ;;  %v4133_v2 = vld [vmem:[%s8785_s19 + $0x3d8] sm:$0xff] }
 0x896   : > { %4893 = vmatprep.subr.bf16.mxu0 %v6752_v38  ;;  %v4044_v38 = vld [vmem:[%s8785_s19 + $0x110] sm:$0xff] }
 0x897   : > { %4851 = vmatpush2.bf16.msra.mxu1 %v6749_v43  ;;  %v4048_v43 = vld [vmem:[%s8785_s19 + $0x130] sm:$0xff] }
 0x898   : > { %4894 = vmatpush2.bf16.msra.mxu0 %v6751_v20  ;;  %4906 = vmatprep.subr.bf16.mxu1 %v6746_v22  ;;  %v4045_v20 = vld [vmem:[%s8785_s19 + $0x118] sm:$0xff]  ;;  %v6722_v22 = vcombine.high %v4044_v38, %v4048_v43 }
 0x899   : > { %4949 = vmatprep.subr.bf16.mxu0 %v6748_v11  ;;  %v6724_v25 = vcombine.high %v4045_v20, %v4049_v19  ;;  %v4037_v11 = vld [vmem:[%s8785_s19 + $0xd8] sm:$0xff] }
 0x918   : > { %v3964_v28 = vpop.xlane.xlu0 %3963 }
 0x919   : > { %v3968_v30 = vmul.f32 0.00390625, %v3964_v28  ;;  %v4041_v28 = vld [vmem:[%s8785_s19 + $0xf8] sm:$0xff] }
 0x91b   : > { %v3970_v36 = vadd.f32 1e-05, %v3968_v30  ;;  %v6721_v30 = vcombine.low %v4044_v38, %v4048_v43 }
 0x91c   : > { %v3967_v29 = vpop.xlane.xlu0 %3966 }
 0x91d   : > { %7918 = vrsqrt.f32 %v3970_v36  ;;  %v3969_v37 = vmul.f32 0.00390625, %v3967_v29  ;;  %v6723_v36 = vcombine.low %v4045_v20, %v4049_v19 }
 0x91f   : > { %v3971_v23 = vadd.f32 1e-05, %v3969_v37  ;;  %v6716_v37 = vcombine.high %v4037_v11, %v4041_v28 }
 0x921   : > { %7920 = vrsqrt.f32 %v3971_v23  ;;  %v4028_v23 = vld [vmem:[%s8785_s19 + $0x90] sm:$0xff] }
 0x92a   : > { %v7919_v54 = vpop.eup %7918 }
 0x92b   : > { %v3975_v35 = vmul.f32 %v7919_v54, %v9491_v5  ;;  %v3974_v50 = vmul.f32 %v7919_v54, %v9488_v49  ;;  %v4029_v54 = vld [vmem:[%s8785_s19 + $0x98] sm:$0xff] }
 0x92d   : > { %v3990_v46 = vmul.f32 %v3986_v48, %v3975_v35  ;;  %v3989_v1 = vmul.f32 %v3982_v52, %v3974_v50  ;;  %v6706_v50 = vcombine.high %v4028_v23, %v4032_v39 }
 0x92e   : > { %v7921_v53 = vpop.eup %7920 }
 0x92f   : > { %v3977_v3 = vmul.f32 %v7921_v53, %v9501_v59  ;;  %v3976_v5 = vmul.f32 %v7921_v53, %v9498_v10  ;;  %v4005_v49 = vadd.f32 %v4001_v57, %v3990_v46  ;;  %v4004_v34 = vadd.f32 %v3997_v58, %v3989_v1  ;;  %v4020_v53 = vld [vmem:[%s8785_s19 + $0x50] sm:$0xff] }
 0x930   : > { %v6738_v10 = vcombine.high %v4060_v4, %v4064_v7  ;;  %v6705_v46 = vcombine.low %v4028_v23, %v4032_v39 }
 0x931   : > { %v3992_v55 = vmul.f32 %v3986_v48, %v3977_v3  ;;  %v3991_v0 = vmul.f32 %v3982_v52, %v3976_v5  ;;  %v6715_v48 = vcombine.low %v4037_v11, %v4041_v28  ;;  %v6708_v52 = vcombine.high %v4029_v54, %v4033_v44  ;;  %v4025_v3 = vld [vmem:[%s8785_s19 + $0x78] sm:$0xff] }
 0x932   : > { %v6707_v5 = vcombine.low %v4029_v54, %v4033_v44 }
 0x933   : > { %v4007_v56 = vadd.f32 %v4001_v57, %v3992_v55  ;;  %v4006_v63 = vadd.f32 %v3997_v58, %v3991_v0  ;;  %v4024_v57 = vld [vmem:[%s8785_s19 + $0x70] sm:$0xff]  ;;  %v4021_v58 = vld [vmem:[%s8785_s19 + $0x58] sm:$0xff] }
 0x934   : > { %v6698_v1 = vcombine.high %v4020_v53, %v4024_v57  ;;  %v6700_v55 = vcombine.high %v4021_v58, %v4025_v3  ;;  %v4012_v0 = vld [vmem:[%s8785_s19 + $0x10] sm:$0xff]  ;;  %v6699_v4 = vcombine.low %v4021_v58, %v4025_v3 }
 0x935   : > { %v4009_v32 = vpack.c.bf16 %v4007_v56, %v4005_v49  ;;  %v9555_v59 = vpack.c.bf16 %v4006_v63, %v4004_v34  ;;  %v4016_v49 = vld [vmem:[%s8785_s19 + $0x30] sm:$0xff]  ;;  %v4013_v56 = vld [vmem:[%s8785_s19 + $0x18] sm:$0xff]  ;;  %v6697_v63 = vcombine.low %v4020_v53, %v4024_v57 }
 0x936   : > { %v4017_v34 = vld [vmem:[%s8785_s19 + $0x38] sm:$0xff]  ;;  %v6690_v7 = vcombine.high %v4012_v0, %v4016_v49 }
 0x937   : > { %4852 = vmatprep.mubr.bf16.mxu1 %v4009_v32  ;;  %4895 = vmatprep.mubr.bf16.mxu0 %v4009_v32  ;;  %v6692_v6 = vcombine.high %v4013_v56, %v4017_v34  ;;  %v6691_v9 = vcombine.low %v4013_v56, %v4017_v34 }
 0x938   : > { %4853 = vmatmul.mubr.bf16.vlgmr.msra.gmra.mxu1 %v9555_v59  ;;  %4896 = vmatmul.mubr.bf16.vlgmr.msra.gmra.mxu0 %v9555_v59 }
 0x939   : > { %4907 = vmatpush1.bf16.msra.mxu1 %v6745_v27  ;;  %4950 = vmatpush1.bf16.msra.mxu0 %v6747_v31  ;;  %v4036_v27 = vld [vmem:[%s8785_s19 + $0xd0] sm:$0xff] }
 0x93a   : > { %4938 = vmatprep.mubr.bf16.mxu1 %v4009_v32  ;;  %4981 = vmatprep.mubr.bf16.mxu0 %v4009_v32  ;;  %v4040_v31 = vld [vmem:[%s8785_s19 + $0xf0] sm:$0xff] }
 0x93b   : > { %4908 = vmatprep.subr.bf16.mxu1 %v6738_v10  ;;  %4951 = vmatprep.subr.bf16.mxu0 %v6740_v26  ;;  %v6714_v29 = vcombine.high %v4036_v27, %v4040_v31  ;;  %v6713_v35 = vcombine.low %v4036_v27, %v4040_v31  ;;  %v4136_v32 = vld [vmem:[%s8785_s19 + $0x3f0] sm:$0xff]  ;;  %v4137_v10 = vld [vmem:[%s8785_s19 + $0x3f8] sm:$0xff]  ;;  %v6689_v26 = vcombine.low %v4012_v0, %v4016_v49 }
 0x93c   : > { %v6810_v17 = vcombine.high %v4132_v62, %v4136_v32  ;;  %v6812_v13 = vcombine.high %v4133_v2, %v4137_v10  ;;  %v6809_v38 = vcombine.low %v4132_v62, %v4136_v32  ;;  %v6811_v43 = vcombine.low %v4133_v2, %v4137_v10 }
 0x93d   : > { %4909 = vmatpush1.bf16.msra.mxu1 %v6737_v18  ;;  %4952 = vmatpush1.bf16.msra.mxu0 %v6739_v8  ;;  %v4124_v18 = vld [vmem:[%s8785_s19 + $0x390] sm:$0xff] }
 0x93e   : > { %4910 = vmatprep.subr.bf16.mxu1 %v6730_v15  ;;  %4953 = vmatprep.subr.bf16.mxu0 %v6732_v16  ;;  %v4128_v8 = vld [vmem:[%s8785_s19 + $0x3b0] sm:$0xff]  ;;  %v4125_v15 = vld [vmem:[%s8785_s19 + $0x398] sm:$0xff] }
 0x93f   : > { %v4129_v16 = vld [vmem:[%s8785_s19 + $0x3b8] sm:$0xff]  ;;  %v6802_v20 = vcombine.high %v4124_v18, %v4128_v8  ;;  %v6801_v27 = vcombine.low %v4124_v18, %v4128_v8 }
 0x940   : > { %v6804_v19 = vcombine.high %v4125_v15, %v4129_v16  ;;  %v6803_v31 = vcombine.low %v4125_v15, %v4129_v16 }
 0x941   : > { %4911 = vmatpush1.bf16.msra.mxu1 %v6729_v24  ;;  %4954 = vmatpush1.bf16.msra.mxu0 %v6731_v12  ;;  %v4116_v24 = vld [vmem:[%s8785_s19 + $0x350] sm:$0xff] }
 0x942   : > { %4912 = vmatprep.subr.bf16.mxu1 %v6722_v22  ;;  %4955 = vmatprep.subr.bf16.mxu0 %v6724_v25  ;;  %v4120_v12 = vld [vmem:[%s8785_s19 + $0x370] sm:$0xff]  ;;  %v4117_v22 = vld [vmem:[%s8785_s19 + $0x358] sm:$0xff] }
 0x943   : > { %v4121_v25 = vld [vmem:[%s8785_s19 + $0x378] sm:$0xff]  ;;  %v6794_v11 = vcombine.high %v4116_v24, %v4120_v12  ;;  %v6793_v23 = vcombine.low %v4116_v24, %v4120_v12 }
 0x944   : > { %v6796_v28 = vcombine.high %v4117_v22, %v4121_v25  ;;  %v6795_v39 = vcombine.low %v4117_v22, %v4121_v25  ;;  %v7658_v24 = vld [vmem:[%s8787_s5 + $0x70] ss:$8 sps:$4 sm:$0xff]   ;;  %v7666_v22 = vld [vmem:[%s8787_s5 + $0x64] ss:$8 sps:$4 sm:$0xff]  }
 0x945   : > { %4913 = vmatpush1.bf16.msra.mxu1 %v6721_v30  ;;  %4956 = vmatpush1.bf16.msra.mxu0 %v6723_v36  ;;  %v4108_v30 = vld [vmem:[%s8785_s19 + $0x310] sm:$0xff]  ;;  %v7669_v25 = vld [vmem:[%s8787_s5 + $0x164] ss:$8 sps:$4 sm:$0xff]  }
 0x946   : > { %4914 = vmatprep.subr.bf16.mxu1 %v6714_v29  ;;  %4957 = vmatprep.subr.bf16.mxu0 %v6716_v37  ;;  %v4112_v36 = vld [vmem:[%s8785_s19 + $0x330] sm:$0xff]  ;;  %v4109_v29 = vld [vmem:[%s8785_s19 + $0x318] sm:$0xff] }
 0x947   : > { %v4113_v37 = vld [vmem:[%s8785_s19 + $0x338] sm:$0xff]  ;;  %v6786_v54 = vcombine.high %v4108_v30, %v4112_v36  ;;  %v6785_v53 = vcombine.low %v4108_v30, %v4112_v36 }
 0x948   : > { %v6788_v44 = vcombine.high %v4109_v29, %v4113_v37  ;;  %v6787_v57 = vcombine.low %v4109_v29, %v4113_v37  ;;  %v7661_v12 = vld [vmem:[%s8787_s5 + $0x170] ss:$8 sps:$4 sm:$0xff]   ;;  %v7681_v29 = vld [vmem:[%s8787_s5 + $0x144] ss:$8 sps:$4 sm:$0xff]   ;;  %v7676_v37 = vld [vmem:[%s8787_s5 + $0x40] ss:$8 sps:$4 sm:$0xff]  }
 0x949   : > { %4915 = vmatpush1.bf16.msra.mxu1 %v6713_v35  ;;  %4958 = vmatpush1.bf16.msra.mxu0 %v6715_v48  ;;  %v4100_v35 = vld [vmem:[%s8785_s19 + $0x2d0] sm:$0xff] }
 0x94a   : > { %4916 = vmatprep.subr.bf16.mxu1 %v6706_v50  ;;  %4959 = vmatprep.subr.bf16.mxu0 %v6708_v52  ;;  %v4104_v48 = vld [vmem:[%s8785_s19 + $0x2f0] sm:$0xff]  ;;  %v4101_v50 = vld [vmem:[%s8785_s19 + $0x2d8] sm:$0xff] }
 0x94b   : > { %v4105_v52 = vld [vmem:[%s8785_s19 + $0x2f8] sm:$0xff]  ;;  %v6778_v58 = vcombine.high %v4100_v35, %v4104_v48  ;;  %v6777_v0 = vcombine.low %v4100_v35, %v4104_v48  ;;  %v7690_v48 = vld [vmem:[%s8787_s5 + $0x24] ss:$8 sps:$4 sm:$0xff]  }
 0x94c   : > { %v6780_v3 = vcombine.high %v4101_v50, %v4105_v52  ;;  %v6779_v49 = vcombine.low %v4101_v50, %v4105_v52  ;;  %v7670_v30 = vld [vmem:[%s8787_s5 + $0x50] ss:$8 sps:$4 sm:$0xff]   ;;  %v7693_v50 = vld [vmem:[%s8787_s5 + $0x124] ss:$8 sps:$4 sm:$0xff]   ;;  %v7688_v52 = vld [vmem:[%s8787_s5 + $0x20] ss:$8 sps:$4 sm:$0xff]  }
 0x94d   : > { %4917 = vmatpush1.bf16.msra.mxu1 %v6705_v46  ;;  %4960 = vmatpush1.bf16.msra.mxu0 %v6707_v5  ;;  %v4092_v46 = vld [vmem:[%s8785_s19 + $0x290] sm:$0xff] }
 0x94e   : > { %4918 = vmatprep.subr.bf16.mxu1 %v6698_v1  ;;  %4961 = vmatprep.subr.bf16.mxu0 %v6700_v55  ;;  %v4096_v5 = vld [vmem:[%s8785_s19 + $0x2b0] sm:$0xff]  ;;  %v4093_v1 = vld [vmem:[%s8785_s19 + $0x298] sm:$0xff] }
 0x94f   : > { %v4097_v55 = vld [vmem:[%s8785_s19 + $0x2b8] sm:$0xff]  ;;  %v6770_v56 = vcombine.high %v4092_v46, %v4096_v5  ;;  %v6769_v62 = vcombine.low %v4092_v46, %v4096_v5  ;;  %v7702_v5 = vld [vmem:[%s8787_s5 + $0x4] ss:$8 sps:$4 sm:$0xff]  }
 0x950   : > { %v6772_v34 = vcombine.high %v4093_v1, %v4097_v55  ;;  %v6771_v32 = vcombine.low %v4093_v1, %v4097_v55  ;;  %v7673_v36 = vld [vmem:[%s8787_s5 + $0x150] ss:$8 sps:$4 sm:$0xff]   ;;  %v7705_v1 = vld [vmem:[%s8787_s5 + $0x104] ss:$8 sps:$4 sm:$0xff]   ;;  %v7700_v55 = vld [vmem:[%s8787_s5] ss:$8 sps:$4 sm:$0xff]  }
 0x951   : > { %4919 = vmatpush1.bf16.msra.mxu1 %v6697_v63  ;;  %4962 = vmatpush1.bf16.msra.mxu0 %v6699_v4  ;;  %v4084_v63 = vld [vmem:[%s8785_s19 + $0x250] sm:$0xff] }
 0x952   : > { %4920 = vmatprep.subr.bf16.mxu1 %v6690_v7  ;;  %4963 = vmatprep.subr.bf16.mxu0 %v6692_v6  ;;  %v4088_v4 = vld [vmem:[%s8785_s19 + $0x270] sm:$0xff]  ;;  %v4085_v7 = vld [vmem:[%s8785_s19 + $0x258] sm:$0xff] }
 0x953   : > { %v4089_v6 = vld [vmem:[%s8785_s19 + $0x278] sm:$0xff]  ;;  %v6762_v2 = vcombine.high %v4084_v63, %v4088_v4  ;;  %v6761_v18 = vcombine.low %v4084_v63, %v4088_v4  ;;  %v7714_v4 = vld [vmem:[%s8787_s5 + $0xe4] ss:$8 sps:$4 sm:$0xff]  }
 0x954   : > { %v6764_v10 = vcombine.high %v4085_v7, %v4089_v6  ;;  %v6763_v8 = vcombine.low %v4085_v7, %v4089_v6  ;;  %v7685_v35 = vld [vmem:[%s8787_s5 + $0x130] ss:$8 sps:$4 sm:$0xff]   ;;  %v7717_v7 = vld [vmem:[%s8787_s5 + $0x1e4] ss:$8 sps:$4 sm:$0xff]   ;;  %v7712_v6 = vld [vmem:[%s8787_s5 + $0xe0] ss:$8 sps:$4 sm:$0xff]  }
 0x955   : > { %4921 = vmatpush1.bf16.msra.mxu1 %v6689_v26  ;;  %4964 = vmatpush1.bf16.msra.mxu0 %v6691_v9  ;;  %v4076_v26 = vld [vmem:[%s8785_s19 + $0x210] sm:$0xff] }
 0x956   : > { %4922 = vmatprep.subr.bf16.mxu1 %v6810_v17  ;;  %4965 = vmatprep.subr.bf16.mxu0 %v6812_v13  ;;  %v4080_v9 = vld [vmem:[%s8785_s19 + $0x230] sm:$0xff]  ;;  %v4077_v17 = vld [vmem:[%s8785_s19 + $0x218] sm:$0xff] }
 0x957   : > { %v4081_v13 = vld [vmem:[%s8785_s19 + $0x238] sm:$0xff]  ;;  %v6754_v15 = vcombine.high %v4076_v26, %v4080_v9 }
 0x958   : > { %v6756_v16 = vcombine.high %v4077_v17, %v4081_v13  ;;  %v7697_v46 = vld [vmem:[%s8787_s5 + $0x110] ss:$8 sps:$4 sm:$0xff]  }
 0x959   : > { %4923 = vmatpush2.bf16.msra.mxu1 %v6809_v38  ;;  %4966 = vmatpush2.bf16.msra.mxu0 %v6811_v43  ;;  %v6753_v38 = vcombine.low %v4076_v26, %v4080_v9  ;;  %v6755_v43 = vcombine.low %v4077_v17, %v4081_v13  ;;  %v7709_v63 = vld [vmem:[%s8787_s5 + $0x1f0] ss:$8 sps:$4 sm:$0xff]   ;;  %v7726_v9 = vld [vmem:[%s8787_s5 + $0xc4] ss:$8 sps:$4 sm:$0xff]   ;;  %v7724_v13 = vld [vmem:[%s8787_s5 + $0xc0] ss:$8 sps:$4 sm:$0xff]  }
 0x95a   : > { %4924 = vmatprep.subr.bf16.mxu1 %v6802_v20  ;;  %4967 = vmatprep.subr.bf16.mxu0 %v6804_v19  ;;  %v7660_v20 = vld [vmem:[%s8787_s5 + $0x74] ss:$8 sps:$4 sm:$0xff]   ;;  %v7721_v26 = vld [vmem:[%s8787_s5 + $0x1d0] ss:$8 sps:$4 sm:$0xff]   ;;  %v7729_v17 = vld [vmem:[%s8787_s5 + $0x1c4] ss:$8 sps:$4 sm:$0xff]  }
 0x95b   : > { %v7663_v19 = vld [vmem:[%s8787_s5 + $0x174] ss:$8 sps:$4 sm:$0xff]  }
 0x95d   : > { %4925 = vmatpush2.bf16.msra.mxu1 %v6801_v27  ;;  %4968 = vmatpush2.bf16.msra.mxu0 %v6803_v31  ;;  %v7664_v27 = vld [vmem:[%s8787_s5 + $0x60] ss:$8 sps:$4 sm:$0xff]  }
 0x95e   : > { %4926 = vmatprep.subr.bf16.mxu1 %v6794_v11  ;;  %4969 = vmatprep.subr.bf16.mxu0 %v6796_v28  ;;  %v7667_v31 = vld [vmem:[%s8787_s5 + $0x160] ss:$8 sps:$4 sm:$0xff]   ;;  %v7672_v11 = vld [vmem:[%s8787_s5 + $0x54] ss:$8 sps:$4 sm:$0xff]  }
 0x95f   : > { %v7675_v28 = vld [vmem:[%s8787_s5 + $0x154] ss:$8 sps:$4 sm:$0xff]  }
 0x961   : > { %4927 = vmatpush2.bf16.msra.mxu1 %v6793_v23  ;;  %4970 = vmatpush2.bf16.msra.mxu0 %v6795_v39  ;;  %v7679_v23 = vld [vmem:[%s8787_s5 + $0x140] ss:$8 sps:$4 sm:$0xff]   ;;  %v7684_v39 = vld [vmem:[%s8787_s5 + $0x34] ss:$8 sps:$4 sm:$0xff]  }
 0x962   : > { %4928 = vmatprep.subr.bf16.mxu1 %v6786_v54  ;;  %4971 = vmatprep.subr.bf16.mxu0 %v6788_v44  ;;  %v7687_v54 = vld [vmem:[%s8787_s5 + $0x134] ss:$8 sps:$4 sm:$0xff]   ;;  %v7682_v44 = vld [vmem:[%s8787_s5 + $0x30] ss:$8 sps:$4 sm:$0xff]  }
 0x965   : > { %4929 = vmatpush2.bf16.msra.mxu1 %v6785_v53  ;;  %4972 = vmatpush2.bf16.msra.mxu0 %v6787_v57  ;;  %v7691_v53 = vld [vmem:[%s8787_s5 + $0x120] ss:$8 sps:$4 sm:$0xff]   ;;  %v7696_v57 = vld [vmem:[%s8787_s5 + $0x14] ss:$8 sps:$4 sm:$0xff]  }
 0x966   : > { %4930 = vmatprep.subr.bf16.mxu1 %v6778_v58  ;;  %4973 = vmatprep.subr.bf16.mxu0 %v6780_v3  ;;  %v7699_v58 = vld [vmem:[%s8787_s5 + $0x114] ss:$8 sps:$4 sm:$0xff]   ;;  %v7694_v3 = vld [vmem:[%s8787_s5 + $0x10] ss:$8 sps:$4 sm:$0xff]  }
 0x969   : > { %4931 = vmatpush2.bf16.msra.mxu1 %v6777_v0  ;;  %4974 = vmatpush2.bf16.msra.mxu0 %v6779_v49  ;;  %v7703_v0 = vld [vmem:[%s8787_s5 + $0x100] ss:$8 sps:$4 sm:$0xff]   ;;  %v7708_v49 = vld [vmem:[%s8787_s5 + $0xf4] ss:$8 sps:$4 sm:$0xff]  }
 0x96a   : > { %4932 = vmatprep.subr.bf16.mxu1 %v6770_v56  ;;  %4975 = vmatprep.subr.bf16.mxu0 %v6772_v34  ;;  %v7711_v56 = vld [vmem:[%s8787_s5 + $0x1f4] ss:$8 sps:$4 sm:$0xff]   ;;  %v7706_v34 = vld [vmem:[%s8787_s5 + $0xf0] ss:$8 sps:$4 sm:$0xff]  }
 0x96d   : > { %4933 = vmatpush2.bf16.msra.mxu1 %v6769_v62  ;;  %4976 = vmatpush2.bf16.msra.mxu0 %v6771_v32  ;;  %v7715_v62 = vld [vmem:[%s8787_s5 + $0x1e0] ss:$8 sps:$4 sm:$0xff]   ;;  %v7720_v32 = vld [vmem:[%s8787_s5 + $0xd4] ss:$8 sps:$4 sm:$0xff]  }
 0x96e   : > { %4934 = vmatprep.subr.bf16.mxu1 %v6762_v2  ;;  %4977 = vmatprep.subr.bf16.mxu0 %v6764_v10  ;;  %v7723_v2 = vld [vmem:[%s8787_s5 + $0x1d4] ss:$8 sps:$4 sm:$0xff]   ;;  %v7718_v10 = vld [vmem:[%s8787_s5 + $0xd0] ss:$8 sps:$4 sm:$0xff]  }
 0x971   : > { %4935 = vmatpush2.bf16.msra.mxu1 %v6761_v18  ;;  %4978 = vmatpush2.bf16.msra.mxu0 %v6763_v8  ;;  %v7727_v18 = vld [vmem:[%s8787_s5 + $0x1c0] ss:$8 sps:$4 sm:$0xff]   ;;  %v7732_v8 = vld [vmem:[%s8787_s5 + $0xb4] ss:$8 sps:$4 sm:$0xff]  }
 0x972   : > { %4936 = vmatprep.subr.bf16.mxu1 %v6754_v15  ;;  %4979 = vmatprep.subr.bf16.mxu0 %v6756_v16  ;;  %v7735_v15 = vld [vmem:[%s8787_s5 + $0x1b4] ss:$8 sps:$4 sm:$0xff]   ;;  %v7730_v16 = vld [vmem:[%s8787_s5 + $0xb0] ss:$8 sps:$4 sm:$0xff]  }
 0x975   : > { %4937 = vmatpush2.bf16.msra.mxu1 %v6753_v38  ;;  %4980 = vmatpush2.bf16.msra.mxu0 %v6755_v43  ;;  %v7733_v38 = vld [vmem:[%s8787_s5 + $0x1b0] ss:$8 sps:$4 sm:$0xff]   ;;  %v7738_v43 = vld [vmem:[%s8787_s5 + $0xa4] ss:$8 sps:$4 sm:$0xff]  }
 0x976   : > { %5924 = vmatprep.subr.bf16.mxu1 %v7660_v20  ;;  %5967 = vmatprep.subr.bf16.mxu0 %v7663_v19  ;;  %v7741_v20 = vld [vmem:[%s8787_s5 + $0x1a4] ss:$8 sps:$4 sm:$0xff]   ;;  %v7736_v19 = vld [vmem:[%s8787_s5 + $0xa0] ss:$8 sps:$4 sm:$0xff]  }
 0x978   : > { %4939 = vmatmul.mubr.bf16.vlgmr.msra.gmra.mxu1 %v9555_v59  ;;  %4982 = vmatmul.mubr.bf16.vlgmr.msra.gmra.mxu0 %v9555_v59  ;;  %v7678_v59 = vld [vmem:[%s8787_s5 + $0x44] ss:$8 sps:$4 sm:$0xff]  }
 0x979   : > { %5925 = vmatpush1.bf16.msra.mxu1 %v7658_v24  ;;  %5968 = vmatpush1.bf16.msra.mxu0 %v7661_v12  ;;  %v7739_v24 = vld [vmem:[%s8787_s5 + $0x1a0] ss:$8 sps:$4 sm:$0xff]   ;;  %v7744_v12 = vld [vmem:[%s8787_s5 + $0x94] ss:$8 sps:$4 sm:$0xff]  }
 0x97a   : > { %5926 = vmatprep.subr.bf16.mxu1 %v7666_v22  ;;  %5969 = vmatprep.subr.bf16.mxu0 %v7669_v25  ;;  %v7747_v22 = vld [vmem:[%s8787_s5 + $0x194] ss:$8 sps:$4 sm:$0xff]   ;;  %v7742_v25 = vld [vmem:[%s8787_s5 + $0x90] ss:$8 sps:$4 sm:$0xff]  }
 0x97d   : > { %5927 = vmatpush1.bf16.msra.mxu1 %v7664_v27  ;;  %5970 = vmatpush1.bf16.msra.mxu0 %v7667_v31  ;;  %v7745_v27 = vld [vmem:[%s8787_s5 + $0x190] ss:$8 sps:$4 sm:$0xff]   ;;  %v7750_v31 = vld [vmem:[%s8787_s5 + $0x84] ss:$8 sps:$4 sm:$0xff]  }
 0x97e   : > { %5928 = vmatprep.subr.bf16.mxu1 %v7672_v11  ;;  %5971 = vmatprep.subr.bf16.mxu0 %v7675_v28  ;;  %v7753_v11 = vld [vmem:[%s8787_s5 + $0x184] ss:$8 sps:$4 sm:$0xff]   ;;  %v7748_v28 = vld [vmem:[%s8787_s5 + $0x80] ss:$8 sps:$4 sm:$0xff]  }
 0x981   : > { %5929 = vmatpush1.bf16.msra.mxu1 %v7670_v30  ;;  %5972 = vmatpush1.bf16.msra.mxu0 %v7673_v36  ;;  %v7751_v30 = vld [vmem:[%s8787_s5 + $0x180] ss:$8 sps:$4 sm:$0xff]   ;;  %v7756_v36 = vld [vmem:[%s8787_s5 + $0x274] ss:$8 sps:$4 sm:$0xff]  }
 0x982   : > { %5930 = vmatprep.subr.bf16.mxu1 %v7678_v59  ;;  %5973 = vmatprep.subr.bf16.mxu0 %v7681_v29  ;;  %v7759_v59 = vld [vmem:[%s8787_s5 + $0x374] ss:$8 sps:$4 sm:$0xff]  }
 0x983   : > { %v9684_v29 = vld [vmem:[%s8774_s17] sm:$0xff] }
 0x985   : > { %5931 = vmatpush1.bf16.msra.mxu1 %v7676_v37  ;;  %5974 = vmatpush1.bf16.msra.mxu0 %v7679_v23  ;;  %v4143_v37 = vrot.slane %v9684_v29, %v8896_v42  ;;  %v4151_v23 = vrot.slane %v9684_v29, %v1132_v33 }
 0x986   : > { %5932 = vmatprep.subr.bf16.mxu1 %v7684_v39  ;;  %5975 = vmatprep.subr.bf16.mxu0 %v7687_v54  ;;  %v4147_v39 = vrot.slane %v9684_v29, %v8893_v41  ;;  %v4155_v54 = vrot.slane %v9684_v29, %v1136_v51 }
 0x989   : > { %5933 = vmatpush1.bf16.msra.mxu1 %v7682_v44  ;;  %5976 = vmatpush1.bf16.msra.mxu0 %v7685_v35 }
 0x98a   : > { %5934 = vmatprep.subr.bf16.mxu1 %v7690_v48  ;;  %5977 = vmatprep.subr.bf16.mxu0 %v7693_v50 }
 0x98d   : > { %5935 = vmatpush1.bf16.msra.mxu1 %v7688_v52  ;;  %5978 = vmatpush1.bf16.msra.mxu0 %v7691_v53 }
 0x98e   : > { %5936 = vmatprep.subr.bf16.mxu1 %v7696_v57  ;;  %5979 = vmatprep.subr.bf16.mxu0 %v7699_v58 }
 0x991   : > { %5937 = vmatpush1.bf16.msra.mxu1 %v7694_v3  ;;  %5980 = vmatpush1.bf16.msra.mxu0 %v7697_v46 }
 0x992   : > { %5938 = vmatprep.subr.bf16.mxu1 %v7702_v5  ;;  %5981 = vmatprep.subr.bf16.mxu0 %v7705_v1 }
 0x995   : > { %5939 = vmatpush1.bf16.msra.mxu1 %v7700_v55  ;;  %5982 = vmatpush1.bf16.msra.mxu0 %v7703_v0 }
 0x996   : > { %5940 = vmatprep.subr.bf16.mxu1 %v7708_v49  ;;  %5983 = vmatprep.subr.bf16.mxu0 %v7711_v56 }
 0x999   : > { %5941 = vmatpush2.bf16.msra.mxu1 %v7706_v34  ;;  %5984 = vmatpush2.bf16.msra.mxu0 %v7709_v63 }
 0x99a   : > { %5942 = vmatprep.subr.bf16.mxu1 %v7714_v4  ;;  %5985 = vmatprep.subr.bf16.mxu0 %v7717_v7 }
 0x99d   : > { %5943 = vmatpush2.bf16.msra.mxu1 %v7712_v6  ;;  %5986 = vmatpush2.bf16.msra.mxu0 %v7715_v62 }
 0x99e   : > { %5944 = vmatprep.subr.bf16.mxu1 %v7720_v32  ;;  %5987 = vmatprep.subr.bf16.mxu0 %v7723_v2 }
 0x9a1   : > { %5945 = vmatpush2.bf16.msra.mxu1 %v7718_v10  ;;  %5988 = vmatpush2.bf16.msra.mxu0 %v7721_v26 }
 0x9a2   : > { %5946 = vmatprep.subr.bf16.mxu1 %v7726_v9  ;;  %5989 = vmatprep.subr.bf16.mxu0 %v7729_v17 }
 0x9a5   : > { %5947 = vmatpush2.bf16.msra.mxu1 %v7724_v13  ;;  %5990 = vmatpush2.bf16.msra.mxu0 %v7727_v18 }
 0x9a6   : > { %5948 = vmatprep.subr.bf16.mxu1 %v7732_v8  ;;  %5991 = vmatprep.subr.bf16.mxu0 %v7735_v15 }
 0x9a9   : > { %5949 = vmatpush2.bf16.msra.mxu1 %v7730_v16  ;;  %5992 = vmatpush2.bf16.msra.mxu0 %v7733_v38 }
 0x9aa   : > { %5950 = vmatprep.subr.bf16.mxu1 %v7738_v43  ;;  %5993 = vmatprep.subr.bf16.mxu0 %v7741_v20 }
 0x9ad   : > { %5951 = vmatpush2.bf16.msra.mxu1 %v7736_v19  ;;  %5994 = vmatpush2.bf16.msra.mxu0 %v7739_v24 }
 0x9ae   : > { %5952 = vmatprep.subr.bf16.mxu1 %v7744_v12  ;;  %5995 = vmatprep.subr.bf16.mxu0 %v7747_v22 }
 0x9b1   : > { %5953 = vmatpush2.bf16.msra.mxu1 %v7742_v25  ;;  %5996 = vmatpush2.bf16.msra.mxu0 %v7745_v27 }
 0x9b2   : > { %5954 = vmatprep.subr.bf16.mxu1 %v7750_v31  ;;  %5997 = vmatprep.subr.bf16.mxu0 %v7753_v11 }
 0x9b5   : > { %5955 = vmatpush2.bf16.msra.mxu1 %v7748_v28  ;;  %5998 = vmatpush2.bf16.msra.mxu0 %v7751_v30 }
 0x9b6   : > { %6010 = vmatprep.subr.bf16.mxu1 %v7756_v36  ;;  %6053 = vmatprep.subr.bf16.mxu0 %v7759_v59 }
 0x9f8   : > { %v4854_v44 = vpop.f32.mrf.mxu1  ;;  %v4897_v35 = vpop.f32.mrf.mxu0 }
 0x9f9   : > { %v9696_v48 = vadd.f32 %v4854_v44, %v4143_v37  ;;  %v9698_v50 = vadd.f32 %v4897_v35, %v4151_v23 }
 0x9fa   : > { %v4856_v52 = vpop.f32.mrf.mxu1  ;;  %v4899_v53 = vpop.f32.mrf.mxu0 }
 0x9fb   : > { %v5008_v57 = vmul.f32 0.044715, %v9696_v48  ;;  %v5010_v58 = vmul.f32 0.044715, %v9698_v50  ;;  %v4857_v33 = vadd.f32 %v4856_v52, %v4147_v39  ;;  %v9702_v3 = vadd.f32 %v4899_v53, %v4155_v54 }
 0x9fc   : > { %v4858_v46 = vpop.f32.mrf.mxu1  ;;  %v4901_v5 = vpop.f32.mrf.mxu0 }
 0x9fd   : > { %v5024_v1 = vmul.f32 %v5008_v57, %v9696_v48  ;;  %v5026_v51 = vmul.f32 %v5010_v58, %v9698_v50  ;;  %v5009_v55 = vmul.f32 0.044715, %v4857_v33  ;;  %v5011_v0 = vmul.f32 0.044715, %v9702_v3 }
 0x9fe   : > { %v4859_v49 = vadd.f32 %v4858_v46, %v4143_v37  ;;  %v9707_v56 = vadd.f32 %v4901_v5, %v4151_v23  ;;  %v4860_v34 = vpop.f32.mrf.mxu1  ;;  %v4903_v63 = vpop.f32.mrf.mxu0 }
 0x9ff   : > { %v5040_v4 = vmul.f32 %v5024_v1, %v9696_v48  ;;  %v5042_v7 = vmul.f32 %v5026_v51, %v9698_v50  ;;  %v5025_v6 = vmul.f32 %v5009_v55, %v4857_v33  ;;  %v5027_v62 = vmul.f32 %v5011_v0, %v9702_v3 }
 0xa00   : > { %v5016_v32 = vmul.f32 0.044715, %v4859_v49  ;;  %v5018_v2 = vmul.f32 0.044715, %v9707_v56  ;;  %v4861_v10 = vadd.f32 %v4860_v34, %v4147_v39  ;;  %v4904_v26 = vadd.f32 %v4903_v63, %v4155_v54 }
 0xa01   : > { %v5056_v9 = vadd.f32 %v5040_v4, %v9696_v48  ;;  %v5058_v17 = vadd.f32 %v5042_v7, %v9698_v50  ;;  %v5041_v13 = vmul.f32 %v5025_v6, %v4857_v33  ;;  %v5043_v18 = vmul.f32 %v5027_v62, %v9702_v3 }
 0xa02   : > { %v5032_v8 = vmul.f32 %v5016_v32, %v4859_v49  ;;  %v5034_v15 = vmul.f32 %v5018_v2, %v9707_v56  ;;  %v5017_v16 = vmul.f32 0.044715, %v4861_v10  ;;  %v5019_v38 = vmul.f32 0.044715, %v4904_v26 }
 0xa03   : > { %v5072_v43 = vmul.f32 0.7978846, %v5056_v9  ;;  %v5074_v20 = vmul.f32 0.7978846, %v5058_v17  ;;  %v5057_v19 = vadd.f32 %v5041_v13, %v4857_v33  ;;  %v5059_v31 = vadd.f32 %v5043_v18, %v9702_v3 }
 0xa04   : > { %v5048_v24 = vmul.f32 %v5032_v8, %v4859_v49  ;;  %v5050_v12 = vmul.f32 %v5034_v15, %v9707_v56  ;;  %v5033_v22 = vmul.f32 %v5017_v16, %v4861_v10  ;;  %v5035_v25 = vmul.f32 %v5019_v38, %v4904_v26 }
 0xa05   : > { %v5073_v27 = vmul.f32 0.7978846, %v5057_v19  ;;  %7922 = vtanh.f32 %v5072_v43  ;;  %v5075_v59 = vmul.f32 0.7978846, %v5059_v31  ;;  %v4993_v1 = vmul.f32 0.5, %v4857_v33 }
 0xa06   : > { %v5064_v11 = vadd.f32 %v5048_v24, %v4859_v49  ;;  %v5066_v28 = vadd.f32 %v5050_v12, %v9707_v56  ;;  %v5049_v30 = vmul.f32 %v5033_v22, %v4861_v10  ;;  %7924 = vtanh.f32 %v5074_v20  ;;  %v7762_v12 = vld [vmem:[%s8787_s5 + $0x264] ss:$8 sps:$4 sm:$0xff]   ;;  %v7768_v31 = vld [vmem:[%s8787_s5 + $0x254] ss:$8 sps:$4 sm:$0xff]  }
 0xa07   : > { %v5051_v36 = vmul.f32 %v5035_v25, %v4904_v26  ;;  %7926 = vtanh.f32 %v5073_v27  ;;  %v4992_v55 = vmul.f32 0.5, %v9696_v48  ;;  %v5000_v4 = vmul.f32 0.5, %v4859_v49  ;;  %v7765_v25 = vld [vmem:[%s8787_s5 + $0x364] ss:$8 sps:$4 sm:$0xff]   ;;  %v7763_v27 = vld [vmem:[%s8787_s5 + $0x360] ss:$8 sps:$4 sm:$0xff]  }
 0xa08   : > { %v5080_v37 = vmul.f32 0.7978846, %v5064_v11  ;;  %v5082_v23 = vmul.f32 0.7978846, %v5066_v28  ;;  %v5065_v39 = vadd.f32 %v5049_v30, %v4861_v10  ;;  %7928 = vtanh.f32 %v5075_v59  ;;  %v7771_v11 = vld [vmem:[%s8787_s5 + $0x354] ss:$8 sps:$4 sm:$0xff]  }
 0xa09   : > { %v5067_v54 = vadd.f32 %v5051_v36, %v4904_v26  ;;  %v5001_v32 = vmul.f32 0.5, %v4861_v10  ;;  %v5002_v9 = vmul.f32 0.5, %v9707_v56  ;;  %v4995_v13 = vmul.f32 0.5, %v9702_v3  ;;  %v7754_v56 = vld [vmem:[%s8787_s5 + $0x270] ss:$8 sps:$4 sm:$0xff]  }
 0xa0a   : > { %7930 = vtanh.f32 %v5080_v37  ;;  %v5081_v44 = vmul.f32 0.7978846, %v5065_v39  ;;  %v5003_v33 = vmul.f32 0.5, %v4904_v26  ;;  %v4994_v49 = vmul.f32 0.5, %v9698_v50  ;;  %v7757_v26 = vld [vmem:[%s8787_s5 + $0x370] ss:$8 sps:$4 sm:$0xff]  }
 0xa0b   : > { %7932 = vtanh.f32 %v5082_v23  ;;  %v5083_v35 = vmul.f32 0.7978846, %v5067_v54  ;;  %v7760_v50 = vld [vmem:[%s8787_s5 + $0x260] ss:$8 sps:$4 sm:$0xff]   ;;  %v7766_v28 = vld [vmem:[%s8787_s5 + $0x250] ss:$8 sps:$4 sm:$0xff]  }
 0xa0c   : > { %7934 = vtanh.f32 %v5081_v44  ;;  %v7769_v30 = vld [vmem:[%s8787_s5 + $0x350] ss:$8 sps:$4 sm:$0xff]   ;;  %v7774_v36 = vld [vmem:[%s8787_s5 + $0x244] ss:$8 sps:$4 sm:$0xff]   ;;  %v7772_v37 = vld [vmem:[%s8787_s5 + $0x240] ss:$8 sps:$4 sm:$0xff]  }
 0xa0d   : > { %7936 = vtanh.f32 %v5083_v35  ;;  %v7777_v59 = vld [vmem:[%s8787_s5 + $0x344] ss:$8 sps:$4 sm:$0xff]   ;;  %v7775_v23 = vld [vmem:[%s8787_s5 + $0x340] ss:$8 sps:$4 sm:$0xff]   ;;  %v7780_v39 = vld [vmem:[%s8787_s5 + $0x234] ss:$8 sps:$4 sm:$0xff]  }
 0xa0e   : > { %v7783_v54 = vld [vmem:[%s8787_s5 + $0x334] ss:$8 sps:$4 sm:$0xff]   ;;  %v7778_v44 = vld [vmem:[%s8787_s5 + $0x230] ss:$8 sps:$4 sm:$0xff]  }
 0xa0f   : > { %v7781_v35 = vld [vmem:[%s8787_s5 + $0x330] ss:$8 sps:$4 sm:$0xff]  }
 0xa12   : > { %v7923_v52 = vpop.eup %7922 }
 0xa13   : > { %v7925_v53 = vpop.eup %7924  ;;  %v5104_v7 = vadd.f32 1.0, %v7923_v52  ;;  %v7786_v52 = vld [vmem:[%s8787_s5 + $0x224] ss:$8 sps:$4 sm:$0xff]  }
 0xa14   : > { %v7927_v57 = vpop.eup %7926  ;;  %v5106_v17 = vadd.f32 1.0, %v7925_v53  ;;  %v7789_v53 = vld [vmem:[%s8787_s5 + $0x324] ss:$8 sps:$4 sm:$0xff]  }
 0xa15   : > { %v7929_v58 = vpop.eup %7928  ;;  %v5105_v51 = vadd.f32 1.0, %v7927_v57  ;;  %v5120_v43 = vmul.f32 %v5104_v7, %v4992_v55  ;;  %v4166_v57 = vsub.s32 6, %v8890_v40  ;;  %v4159_v55 = vrot.slane %v9684_v29, %v1140_v61  ;;  %v7798_v7 = vld [vmem:[%s8787_s5 + $0x204] ss:$8 sps:$4 sm:$0xff]  }
 0xa16   : > { %v5107_v63 = vadd.f32 1.0, %v7929_v58  ;;  %v5122_v19 = vmul.f32 %v5106_v17, %v4994_v49  ;;  %v7784_v58 = vld [vmem:[%s8787_s5 + $0x220] ss:$8 sps:$4 sm:$0xff]  }
 0xa17   : > { %v7931_v46 = vpop.eup %7930  ;;  %v5121_v8 = vmul.f32 %v5105_v51, %v4993_v1  ;;  %v7795_v1 = vld [vmem:[%s8787_s5 + $0x314] ss:$8 sps:$4 sm:$0xff]   ;;  %v4170_v51 = vsub.s32 7, %v8890_v40  ;;  %v7799_v40 = vld [vmem:[%s8787_s5 + $0x300] ss:$8 sps:$4 sm:$0xff]  }
 0xa18   : > { %v7933_v5 = vpop.eup %7932  ;;  %v5112_v0 = vadd.f32 1.0, %v7931_v46  ;;  %v5123_v38 = vmul.f32 %v5107_v63, %v4995_v13  ;;  %v7787_v46 = vld [vmem:[%s8787_s5 + $0x320] ss:$8 sps:$4 sm:$0xff]   ;;  %v7793_v63 = vld [vmem:[%s8787_s5 + $0x310] ss:$8 sps:$4 sm:$0xff]  }
 0xa19   : > { %v7935_v34 = vpop.eup %7934  ;;  %v5114_v6 = vadd.f32 1.0, %v7933_v5  ;;  %v7792_v5 = vld [vmem:[%s8787_s5 + $0x214] ss:$8 sps:$4 sm:$0xff]   ;;  %v4171_v61 = vrot.slane %v9684_v29, %v4170_v51 }
 0xa1a   : > { %v7937_v62 = vpop.eup %7936  ;;  %v5113_v2 = vadd.f32 1.0, %v7935_v34  ;;  %v5128_v48 = vmul.f32 %v5112_v0, %v5000_v4  ;;  %v4167_v0 = vrot.slane %v9684_v29, %v4166_v57  ;;  %v7790_v34 = vld [vmem:[%s8787_s5 + $0x210] ss:$8 sps:$4 sm:$0xff]   ;;  %v4163_v4 = vrot.slane %v9684_v29, %v1144_v47  ;;  %v7804_v29 = vld [vmem:[%s8787_s5 + $0x2f4] ss:$8 sps:$4 sm:$0xff]  }
 0xa1b   : > { %v5115_v18 = vadd.f32 1.0, %v7937_v62  ;;  %v5130_v16 = vmul.f32 %v5114_v6, %v5002_v9 }
 0xa1c   : > { %v5129_v15 = vmul.f32 %v5113_v2, %v5001_v32  ;;  %v5136_v24 = vpack.c.bf16 %v5128_v48, %v5120_v43  ;;  %v7801_v32 = vld [vmem:[%s8787_s5 + $0x304] ss:$8 sps:$4 sm:$0xff]  }
 0xa1d   : > { %v5131_v10 = vmul.f32 %v5115_v18, %v5003_v33  ;;  %v5138_v22 = vpack.c.bf16 %v5130_v16, %v5122_v19  ;;  %v7796_v33 = vld [vmem:[%s8787_s5 + $0x200] ss:$8 sps:$4 sm:$0xff]   ;;  %v7807_v16 = vld [vmem:[%s8787_s5 + $0x3f4] ss:$8 sps:$4 sm:$0xff]  }
 0xa1e   : > { %v5137_v20 = vpack.c.bf16 %v5129_v15, %v5121_v8 }
 0xa1f   : > { %v5139_v3 = vpack.c.bf16 %v5131_v10, %v5123_v38 }
 0xa20   : > { %5956 = vmatprep.mubr.bf16.mxu1 %v5137_v20 }
 0xa21   : > { %5999 = vmatprep.mubr.bf16.mxu0 %v5139_v3  ;;  %5957 = vmatmul.mubr.bf16.vlgmr.msra.gmra.mxu1 %v5136_v24  ;;  %v7802_v24 = vld [vmem:[%s8787_s5 + $0x2f0] ss:$8 sps:$4 sm:$0xff]  }
 0xa22   : > { %6000 = vmatmul.mubr.bf16.vlgmr.msra.gmra.mxu0 %v5138_v22  ;;  %6011 = vmatpush1.bf16.msra.mxu1 %v7754_v56 }
 0xa23   : > { %6054 = vmatpush1.bf16.msra.mxu0 %v7757_v26  ;;  %6012 = vmatprep.subr.bf16.mxu1 %v7762_v12 }
 0xa24   : > { %6055 = vmatprep.subr.bf16.mxu0 %v7765_v25 }
 0xa26   : > { %6013 = vmatpush1.bf16.msra.mxu1 %v7760_v50  ;;  %v7805_v50 = vld [vmem:[%s8787_s5 + $0x3f0] ss:$8 sps:$4 sm:$0xff]  }
 0xa27   : > { %6056 = vmatpush1.bf16.msra.mxu0 %v7763_v27  ;;  %6014 = vmatprep.subr.bf16.mxu1 %v7768_v31  ;;  %v7810_v27 = vld [vmem:[%s8787_s5 + $0x2e4] ss:$8 sps:$4 sm:$0xff]  }
 0xa28   : > { %6057 = vmatprep.subr.bf16.mxu0 %v7771_v11 }
 0xa2a   : > { %6015 = vmatpush1.bf16.msra.mxu1 %v7766_v28 }
 0xa2b   : > { %6058 = vmatpush1.bf16.msra.mxu0 %v7769_v30  ;;  %6016 = vmatprep.subr.bf16.mxu1 %v7774_v36  ;;  %v7813_v36 = vld [vmem:[%s8787_s5 + $0x3e4] ss:$8 sps:$4 sm:$0xff]  }
 0xa2c   : > { %6059 = vmatprep.subr.bf16.mxu0 %v7777_v59 }
 0xa2e   : > { %6017 = vmatpush1.bf16.msra.mxu1 %v7772_v37 }
 0xa2f   : > { %6060 = vmatpush1.bf16.msra.mxu0 %v7775_v23  ;;  %6018 = vmatprep.subr.bf16.mxu1 %v7780_v39 }
 0xa30   : > { %6061 = vmatprep.subr.bf16.mxu0 %v7783_v54 }
 0xa32   : > { %6019 = vmatpush1.bf16.msra.mxu1 %v7778_v44 }
 0xa33   : > { %6062 = vmatpush1.bf16.msra.mxu0 %v7781_v35  ;;  %6020 = vmatprep.subr.bf16.mxu1 %v7786_v52  ;;  %v7808_v52 = vld [vmem:[%s8787_s5 + $0x2e0] ss:$8 sps:$4 sm:$0xff]  }
 0xa34   : > { %6063 = vmatprep.subr.bf16.mxu0 %v7789_v53  ;;  %v7811_v53 = vld [vmem:[%s8787_s5 + $0x3e0] ss:$8 sps:$4 sm:$0xff]  }
 0xa36   : > { %6021 = vmatpush1.bf16.msra.mxu1 %v7784_v58 }
 0xa37   : > { %6064 = vmatpush1.bf16.msra.mxu0 %v7787_v46  ;;  %6022 = vmatprep.subr.bf16.mxu1 %v7792_v5  ;;  %v7816_v5 = vld [vmem:[%s8787_s5 + $0x2d4] ss:$8 sps:$4 sm:$0xff]  }
 0xa38   : > { %v4940_v6 = vpop.f32.mrf.mxu1  ;;  %v4983_v62 = vpop.f32.mrf.mxu0  ;;  %6065 = vmatprep.subr.bf16.mxu0 %v7795_v1 }
 0xa39   : > { %v9762_v2 = vadd.f32 %v4940_v6, %v4159_v55  ;;  %v9764_v9 = vadd.f32 %v4983_v62, %v4167_v0 }
 0xa3a   : > { %6023 = vmatpush1.bf16.msra.mxu1 %v7790_v34  ;;  %v4942_v17 = vpop.f32.mrf.mxu1  ;;  %v4985_v13 = vpop.f32.mrf.mxu0  ;;  %v7819_v34 = vld [vmem:[%s8787_s5 + $0x3d4] ss:$8 sps:$4 sm:$0xff]  }
 0xa3b   : > { %v5012_v47 = vmul.f32 0.044715, %v9762_v2  ;;  %v5014_v18 = vmul.f32 0.044715, %v9764_v9  ;;  %6066 = vmatpush1.bf16.msra.mxu0 %v7793_v63  ;;  %v9770_v48 = vadd.f32 %v4942_v17, %v4163_v4  ;;  %6024 = vmatprep.subr.bf16.mxu1 %v7798_v7  ;;  %v9773_v8 = vadd.f32 %v4985_v13, %v4171_v61  ;;  %v7817_v13 = vld [vmem:[%s8787_s5 + $0x3d0] ss:$8 sps:$4 sm:$0xff]  }
 0xa3c   : > { %v4944_v15 = vpop.f32.mrf.mxu1  ;;  %v4987_v49 = vpop.f32.mrf.mxu0  ;;  %6067 = vmatprep.subr.bf16.mxu0 %v7801_v32  ;;  %v7814_v32 = vld [vmem:[%s8787_s5 + $0x2d0] ss:$8 sps:$4 sm:$0xff]  }
 0xa3d   : > { %v5028_v38 = vmul.f32 %v5012_v47, %v9762_v2  ;;  %v5030_v10 = vmul.f32 %v5014_v18, %v9764_v9  ;;  %v5013_v43 = vmul.f32 0.044715, %v9770_v48  ;;  %v9779_v20 = vadd.f32 %v4944_v15, %v4159_v55 }
 0xa3e   : > { %v5015_v56 = vmul.f32 0.044715, %v9773_v8  ;;  %v9782_v19 = vadd.f32 %v4987_v49, %v4167_v0  ;;  %6025 = vmatpush1.bf16.msra.mxu1 %v7796_v33  ;;  %v4946_v3 = vpop.f32.mrf.mxu1  ;;  %v4989_v26 = vpop.f32.mrf.mxu0  ;;  %v7822_v33 = vld [vmem:[%s8787_s5 + $0x2c4] ss:$8 sps:$4 sm:$0xff]  }
 0xa3f   : > { %v5044_v12 = vmul.f32 %v5028_v38, %v9762_v2  ;;  %v5046_v22 = vmul.f32 %v5030_v10, %v9764_v9  ;;  %v5029_v25 = vmul.f32 %v5013_v43, %v9770_v48  ;;  %6068 = vmatpush1.bf16.msra.mxu0 %v7799_v40  ;;  %6026 = vmatprep.subr.bf16.mxu1 %v7804_v29  ;;  %v5020_v11 = vmul.f32 0.044715, %v9779_v20  ;;  %v7825_v29 = vld [vmem:[%s8787_s5 + $0x3c4] ss:$8 sps:$4 sm:$0xff]   ;;  %v7820_v38 = vld [vmem:[%s8787_s5 + $0x2c0] ss:$8 sps:$4 sm:$0xff]  }
 0xa40   : > { %v5031_v31 = vmul.f32 %v5015_v56, %v9773_v8  ;;  %v5022_v28 = vmul.f32 0.044715, %v9782_v19  ;;  %v9793_v30 = vadd.f32 %v4946_v3, %v4163_v4  ;;  %6069 = vmatprep.subr.bf16.mxu0 %v7807_v16  ;;  %v9799_v39 = vadd.f32 %v4989_v26, %v4171_v61  ;;  %v7823_v43 = vld [vmem:[%s8787_s5 + $0x3c0] ss:$8 sps:$4 sm:$0xff]   ;;  %v7828_v56 = vld [vmem:[%s8787_s5 + $0x2b4] ss:$8 sps:$4 sm:$0xff]  }
 0xa41   : > { %v5060_v59 = vadd.f32 %v5044_v12, %v9762_v2  ;;  %v5062_v37 = vadd.f32 %v5046_v22, %v9764_v9  ;;  %v5045_v23 = vmul.f32 %v5029_v25, %v9770_v48  ;;  %v5036_v54 = vmul.f32 %v5020_v11, %v9779_v20  ;;  %v7831_v26 = vld [vmem:[%s8787_s5 + $0x3b4] ss:$8 sps:$4 sm:$0xff]   ;;  %v7829_v12 = vld [vmem:[%s8787_s5 + $0x3b0] ss:$8 sps:$4 sm:$0xff]   ;;  %v7834_v22 = vld [vmem:[%s8787_s5 + $0x2a4] ss:$8 sps:$4 sm:$0xff]  }
 0xa42   : > { %v5038_v44 = vmul.f32 %v5022_v28, %v9782_v19  ;;  %v5021_v35 = vmul.f32 0.044715, %v9793_v30  ;;  %6027 = vmatpush2.bf16.msra.mxu1 %v7802_v24  ;;  %v5047_v58 = vmul.f32 %v5031_v31, %v9773_v8  ;;  %v5023_v46 = vmul.f32 0.044715, %v9799_v39  ;;  %v7826_v24 = vld [vmem:[%s8787_s5 + $0x2b0] ss:$8 sps:$4 sm:$0xff]  }
 0xa43   : > { %v5076_v57 = vmul.f32 0.7978846, %v5060_v59  ;;  %6070 = vmatpush2.bf16.msra.mxu0 %v7805_v50  ;;  %6028 = vmatprep.subr.bf16.mxu1 %v7810_v27  ;;  %v5061_v1 = vadd.f32 %v5045_v23, %v9770_v48  ;;  %v5052_v51 = vmul.f32 %v5036_v54, %v9779_v20  ;;  %v5078_v63 = vmul.f32 0.7978846, %v5062_v37  ;;  %v7837_v25 = vld [vmem:[%s8787_s5 + $0x3a4] ss:$8 sps:$4 sm:$0xff]  }
 0xa44   : > { %v5054_v55 = vmul.f32 %v5038_v44, %v9782_v19  ;;  %v5037_v0 = vmul.f32 %v5021_v35, %v9793_v30  ;;  %6071 = vmatprep.subr.bf16.mxu0 %v7813_v36  ;;  %v5039_v4 = vmul.f32 %v5023_v46, %v9799_v39  ;;  %v5063_v40 = vadd.f32 %v5047_v58, %v9773_v8  ;;  %v7832_v50 = vld [vmem:[%s8787_s5 + $0x2a0] ss:$8 sps:$4 sm:$0xff]   ;;  %v7840_v31 = vld [vmem:[%s8787_s5 + $0x294] ss:$8 sps:$4 sm:$0xff]   ;;  %v7838_v37 = vld [vmem:[%s8787_s5 + $0x290] ss:$8 sps:$4 sm:$0xff]  }
 0xa45   : > { %v5077_v7 = vmul.f32 0.7978846, %v5061_v1  ;;  %v5068_v6 = vadd.f32 %v5052_v51, %v9779_v20  ;;  %7938 = vtanh.f32 %v5076_v57  ;;  %v7835_v27 = vld [vmem:[%s8787_s5 + $0x3a0] ss:$8 sps:$4 sm:$0xff]   ;;  %v7843_v28 = vld [vmem:[%s8787_s5 + $0x394] ss:$8 sps:$4 sm:$0xff]  }
 0xa46   : > { %v5070_v62 = vadd.f32 %v5054_v55, %v9782_v19  ;;  %v5053_v61 = vmul.f32 %v5037_v0, %v9793_v30  ;;  %6029 = vmatpush2.bf16.msra.mxu1 %v7808_v52  ;;  %v5055_v17 = vmul.f32 %v5039_v4, %v9799_v39  ;;  %v5079_v16 = vmul.f32 0.7978846, %v5063_v40  ;;  %v7841_v54 = vld [vmem:[%s8787_s5 + $0x390] ss:$8 sps:$4 sm:$0xff]   ;;  %v7846_v44 = vld [vmem:[%s8787_s5 + $0x284] ss:$8 sps:$4 sm:$0xff]  }
 0xa47   : > { %6072 = vmatpush2.bf16.msra.mxu0 %v7811_v53  ;;  %6030 = vmatprep.subr.bf16.mxu1 %v7816_v5  ;;  %v5084_v47 = vmul.f32 0.7978846, %v5068_v6  ;;  %7940 = vtanh.f32 %v5077_v7  ;;  %v7849_v52 = vld [vmem:[%s8787_s5 + $0x384] ss:$8 sps:$4 sm:$0xff]   ;;  %v4996_v46 = vmul.f32 0.5, %v9762_v2  ;;  %v5004_v5 = vmul.f32 0.5, %v9779_v20 }
 0xa48   : > { %v5086_v18 = vmul.f32 0.7978846, %v5070_v62  ;;  %6073 = vmatprep.subr.bf16.mxu0 %v7819_v34  ;;  %v5069_v15 = vadd.f32 %v5053_v61, %v9793_v30  ;;  %7942 = vtanh.f32 %v5078_v63  ;;  %v5071_v49 = vadd.f32 %v5055_v17, %v9799_v39  ;;  %v7844_v0 = vld [vmem:[%s8787_s5 + $0x280] ss:$8 sps:$4 sm:$0xff]  }
 0xa49   : > { %7944 = vtanh.f32 %v5084_v47  ;;  %v4997_v34 = vmul.f32 0.5, %v9770_v48  ;;  %v5005_v63 = vmul.f32 0.5, %v9793_v30  ;;  %v4999_v7 = vmul.f32 0.5, %v9773_v8  ;;  %v7847_v62 = vld [vmem:[%s8787_s5 + $0x380] ss:$8 sps:$4 sm:$0xff]   ;;  %s9989_s5 = sld [smem:[#allocation26_spill]] }
 0xa4a   : > { %6031 = vmatpush2.bf16.msra.mxu1 %v7814_v32  ;;  %v5085_v10 = vmul.f32 0.7978846, %v5069_v15  ;;  %7946 = vtanh.f32 %v5086_v18  ;;  %v5087_v3 = vmul.f32 0.7978846, %v5071_v49  ;;  %v5006_v20 = vmul.f32 0.5, %v9782_v19 }
 0xa4b   : > { %6074 = vmatpush2.bf16.msra.mxu0 %v7817_v13  ;;  %6032 = vmatprep.subr.bf16.mxu1 %v7822_v33  ;;  %v5007_v33 = vmul.f32 0.5, %v9799_v39  ;;  %v4998_v30 = vmul.f32 0.5, %v9764_v9 }
 0xa4c   : > { %6075 = vmatprep.subr.bf16.mxu0 %v7825_v29  ;;  %7948 = vtanh.f32 %v5085_v10 }
 0xa4d   : > { %7950 = vtanh.f32 %v5079_v16 }
 0xa4e   : > { %6033 = vmatpush2.bf16.msra.mxu1 %v7820_v38  ;;  %7952 = vtanh.f32 %v5087_v3  ;;  %v5272_v38 = vld [vmem:[%s815_s1] sm:$0x3] }
 0xa4f   : > { %6076 = vmatpush2.bf16.msra.mxu0 %v7823_v43  ;;  %6034 = vmatprep.subr.bf16.mxu1 %v7828_v56  ;;  %v5277_v43 = vrot.slane %v5272_v38, %v8896_v42  ;;  %v5281_v3 = vrot.slane %v5272_v38, %v8893_v41  ;;  %p6941_p2 = scmp.ne.s32.totalorder %s9989_s5, 1 }
 0xa50   : > { %6077 = vmatprep.subr.bf16.mxu0 %v7831_v26  ;;  %s9990_s11 = sld [smem:[#allocation44_spill]] (!%p6941_p2) }
 0xa51   : > { %s9991_s29 = sld [smem:[#allocation45_spill]] (!%p6941_p2) }
 0xa52   : > { %6035 = vmatpush2.bf16.msra.mxu1 %v7826_v24  ;;  %v7939_v11 = vpop.eup %7938  ;;  %s9992_s24 = sld [smem:[#allocation27_spill]] (!%p6941_p2) }
 0xa53   : > { %6078 = vmatpush2.bf16.msra.mxu0 %v7829_v12  ;;  %6036 = vmatprep.subr.bf16.mxu1 %v7834_v22  ;;  %v5108_v1 = vadd.f32 1.0, %v7939_v11 }
 0xa54   : > { %6079 = vmatprep.subr.bf16.mxu0 %v7837_v25  ;;  %v7941_v36 = vpop.eup %7940 }
 0xa55   : > { %v7943_v59 = vpop.eup %7942  ;;  %v5109_v53 = vadd.f32 1.0, %v7941_v36  ;;  %v5124_v40 = vmul.f32 %v5108_v1, %v4996_v46 }
 0xa56   : > { %6037 = vmatpush2.bf16.msra.mxu1 %v7832_v50  ;;  %v7945_v23 = vpop.eup %7944  ;;  %v5110_v32 = vadd.f32 1.0, %v7943_v59 }
 0xa57   : > { %6080 = vmatpush2.bf16.msra.mxu0 %v7835_v27  ;;  %6038 = vmatprep.subr.bf16.mxu1 %v7840_v31  ;;  %v7947_v35 = vpop.eup %7946  ;;  %v5116_v57 = vadd.f32 1.0, %v7945_v23  ;;  %v5125_v17 = vmul.f32 %v5109_v53, %v4997_v34 }
 0xa58   : > { %6081 = vmatprep.subr.bf16.mxu0 %v7843_v28  ;;  %v5118_v51 = vadd.f32 1.0, %v7947_v35  ;;  %v5126_v49 = vmul.f32 %v5110_v32, %v4998_v30  ;;  %p6942_p12 = scmp.ne.s32.totalorder (!%p6941_p2), %s9992_s24, 1 }
 0xa59   : > { %v7949_v58 = vpop.eup %7948  ;;  %v5132_v2 = vmul.f32 %v5116_v57, %v5004_v5 }
 0xa5a   : > { %v7951_v55 = vpop.eup %7950  ;;  %6039 = vmatpush2.bf16.msra.mxu1 %v7838_v37  ;;  %v5117_v4 = vadd.f32 1.0, %v7949_v58  ;;  %v5134_v8 = vmul.f32 %v5118_v51, %v5006_v20 }
 0xa5b   : > { %v7953_v6 = vpop.eup %7952  ;;  %6082 = vmatpush2.bf16.msra.mxu0 %v7841_v54  ;;  %6040 = vmatprep.subr.bf16.mxu1 %v7846_v44  ;;  %v5111_v61 = vadd.f32 1.0, %v7951_v55  ;;  %v5140_v15 = vpack.c.bf16 %v5132_v2, %v5124_v40 }
 0xa5c   : > { %6083 = vmatprep.subr.bf16.mxu0 %v7849_v52  ;;  %v5133_v13 = vmul.f32 %v5117_v4, %v5005_v63  ;;  %v5119_v48 = vadd.f32 1.0, %v7953_v6  ;;  %v5142_v16 = vpack.c.bf16 %v5134_v8, %v5126_v49 }
 0xa5d   : > { %v5127_v18 = vmul.f32 %v5111_v61, %v4999_v7 }
 0xa5e   : > { %6041 = vmatpush2.bf16.msra.mxu1 %v7844_v0  ;;  %v5141_v47 = vpack.c.bf16 %v5133_v13, %v5125_v17  ;;  %v5135_v29 = vmul.f32 %v5119_v48, %v5007_v33 }
 0xa5f   : > { %6084 = vmatpush2.bf16.msra.mxu0 %v7847_v62 }
 0xa60   : > { %6042 = vmatprep.mubr.bf16.mxu1 %v5141_v47  ;;  %v5143_v19 = vpack.c.bf16 %v5135_v29, %v5127_v18 }
 0xa61   : > { %6043 = vmatmul.mubr.bf16.vlgmr.msra.gmra.mxu1 %v5140_v15 }
 0xa62   : > { %6085 = vmatprep.mubr.bf16.mxu0 %v5143_v19 }
 0xa63   : > { %6086 = vmatmul.mubr.bf16.vlgmr.msra.gmra.mxu0 %v5142_v16 }
 0xae1   : > { %v5958_v39 = vpop.f32.mrf.mxu1 }
 0xae2   : > { %v6001_v10 = vpop.f32.mrf.mxu0  ;;  %v5959_v24 = vadd.f32 %v5958_v39, %v5277_v43 }
 0xae3   : > { %v5960_v9 = vpop.f32.mrf.mxu1 }
 0xae4   : > { %v6003_v56 = vpop.f32.mrf.mxu0  ;;  %v5961_v22 = vadd.f32 %v5960_v9, %v5281_v3  ;;  %v6002_v50 = vadd.f32 %v6001_v10, %v5959_v24 }
 0xae5   : > { %v5962_v26 = vpop.f32.mrf.mxu1 }
 0xae6   : > { %v6005_v12 = vpop.f32.mrf.mxu0  ;;  %v5963_v27 = vadd.f32 %v5962_v26, %v5277_v43  ;;  %v6004_v28 = vadd.f32 %v6003_v56, %v5961_v22 }
 0xae7   : > { %v5964_v25 = vpop.f32.mrf.mxu1 }
 0xae8   : > { %v6007_v31 = vpop.f32.mrf.mxu0  ;;  %v5965_v36 = vadd.f32 %v5964_v25, %v5281_v3  ;;  %v6006_v54 = vadd.f32 %v6005_v12, %v5963_v27 }
 0xaea   : > { %v6008_v57 = vadd.f32 %v6007_v31, %v5965_v36 }
 0xb21   : > { %v6044_v11 = vpop.f32.mrf.mxu1 }
 0xb22   : > { %v6045_v59 = vadd.f32 %v6044_v11, %v6002_v50 }
 0xb23   : > { %v6087_v37 = vpop.f32.mrf.mxu0  ;;  %v6046_v23 = vpop.f32.mrf.mxu1 }
 0xb24   : > { %v6088_v44 = vadd.f32 %v6087_v37, %v6045_v59  ;;  %v6047_v35 = vadd.f32 %v6046_v23, %v6004_v28 }
 0xb25   : > { %v6089_v52 = vpop.f32.mrf.mxu0  ;;  %v6048_v53 = vpop.f32.mrf.mxu1 }
 0xb26   : > { %v6096_v58 = vadd.f32 %v6088_v44, %v9439_v60  ;;  %v6090_v46 = vadd.f32 %v6089_v52, %v6047_v35  ;;  %v6049_v5 = vadd.f32 %v6048_v53, %v6006_v54 }
 0xb27   : > { %v6091_v1 = vpop.f32.mrf.mxu0  ;;  %v6050_v51 = vpop.f32.mrf.mxu1 }
 0xb28   : > { %6100 = vst [vmem:[#allocation2 + $0x10] sm:$0xff] %v6096_v58  ;;  %v6097_v55 = vadd.f32 %v6090_v46, %v9441_v14  ;;  %v6092_v0 = vadd.f32 %v6091_v1, %v6049_v5  ;;  %v6051_v34 = vadd.f32 %v6050_v51, %v6008_v57 }
 0xb29   : > { %v6093_v63 = vpop.f32.mrf.mxu0 }
 0xb2a   : > { %6101 = vst [vmem:[#allocation2] sm:$0xff] %v6097_v55  ;;  %v6098_v4 = vadd.f32 %v6092_v0, %v9445_v21  ;;  %v6094_v7 = vadd.f32 %v6093_v63, %v6051_v34  ;;  %6107 = sbr.rel (%p6941_p2) target bundleno = 3180 (0xc6c), region = 148 }
 0xb2c   : > { %6102 = vst [vmem:[#allocation2 + $0x18] sm:$0xff] %v6098_v4  ;;  %v6099_v6 = vadd.f32 %v6094_v7, %v9447_v45 }
 0xb2e   : > { %6103 = vst [vmem:[#allocation2 + $0x8] sm:$0xff] %v6099_v6 }
 0xb2f   : > { %v6110_v60 = vadd.f32 %v6097_v55, %v6096_v58  ;;  %v6113_v62 = vadd.f32 %v6099_v6, %v6098_v4  ;;  %v6108_v16 = vld [vmem:[%s9990_s11] sm:$0x3] }
 0xb30   : > { %v6109_v39 = vld [vmem:[%s9991_s29] sm:$0x3]  ;;  %v6146_v38 = vrot.slane %v6108_v16, %v8896_v42  ;;  %v6150_v10 = vrot.slane %v6108_v16, %v8893_v41 }
 0xb31   : > { %6111 = vadd.xlane.f32.xlu0 %v6110_v60  ;;  %v6161_v3 = vrot.slane %v6109_v39, %v8896_v42  ;;  %v6165_v26 = vrot.slane %v6109_v39, %v8893_v41 }
 0xb35   : > { %6114 = vadd.xlane.f32.xlu0 %v6113_v62 }
 0xbba   : > { %v6112_v61 = vpop.xlane.xlu0 %6111 }
 0xbbb   : > { %v6116_v14 = vmul.f32 0.00390625, %v6112_v61 }
 0xbbd   : > { %v6118_v2 = vsub.f32 %v6096_v58, %v6116_v14  ;;  %v6119_v20 = vsub.f32 %v6097_v55, %v6116_v14 }
 0xbbe   : > { %v6115_v32 = vpop.xlane.xlu0 %6114 }
 0xbbf   : > { %v6117_v17 = vmul.f32 0.00390625, %v6115_v32  ;;  %v6122_v13 = vmul.f32 %v6118_v2, %v6118_v2  ;;  %v6123_v21 = vmul.f32 %v6119_v20, %v6119_v20 }
 0xbc1   : > { %v6120_v33 = vsub.f32 %v6098_v4, %v6117_v17  ;;  %v6121_v48 = vsub.f32 %v6099_v6, %v6117_v17  ;;  %v6126_v40 = vadd.f32 %v6123_v21, %v6122_v13 }
 0xbc3   : > { %6127 = vadd.xlane.f32.xlu1 %v6126_v40  ;;  %v6124_v45 = vmul.f32 %v6120_v33, %v6120_v33  ;;  %v6125_v30 = vmul.f32 %v6121_v48, %v6121_v48 }
 0xbc5   : > { %v6129_v8 = vadd.f32 %v6125_v30, %v6124_v45 }
 0xbc7   : > { %6130 = vadd.xlane.f32.xlu1 %v6129_v8 }
 0xc4c   : > { %v6128_v47 = vpop.xlane.xlu1 %6127 }
 0xc4d   : > { %v6132_v18 = vmul.f32 0.00390625, %v6128_v47 }
 0xc4f   : > { %v6134_v29 = vadd.f32 1e-05, %v6132_v18 }
 0xc50   : > { %v6131_v15 = vpop.xlane.xlu1 %6130 }
 0xc51   : > { %7958 = vrsqrt.f32 %v6134_v29  ;;  %v6133_v49 = vmul.f32 0.00390625, %v6131_v15 }
 0xc53   : > { %v6135_v19 = vadd.f32 1e-05, %v6133_v49 }
 0xc55   : > { %7960 = vrsqrt.f32 %v6135_v19 }
 0xc5e   : > { %v7959_v9 = vpop.eup %7958 }
 0xc5f   : > { %v6138_v43 = vmul.f32 %v7959_v9, %v6118_v2  ;;  %v6139_v56 = vmul.f32 %v7959_v9, %v6119_v20 }
 0xc61   : > { %v6153_v24 = vmul.f32 %v6146_v38, %v6138_v43  ;;  %v6154_v12 = vmul.f32 %v6150_v10, %v6139_v56 }
 0xc62   : > { %v7961_v22 = vpop.eup %7960 }
 0xc63   : > { %v6168_v25 = vadd.f32 %v6161_v3, %v6153_v24  ;;  %v6169_v50 = vadd.f32 %v6165_v26, %v6154_v12  ;;  %v6140_v27 = vmul.f32 %v7961_v22, %v6120_v33  ;;  %v6141_v31 = vmul.f32 %v7961_v22, %v6121_v48 }
 0xc65   : > { %6172 = vst [vmem:[#allocation3] sm:$0xff] %v6168_v25  ;;  %6173 = vst [vmem:[#allocation3 + $0x18] sm:$0xff] %v6169_v50  ;;  %v6155_v11 = vmul.f32 %v6146_v38, %v6140_v27  ;;  %v6156_v28 = vmul.f32 %v6150_v10, %v6141_v31  ;;  %6179 = sbr.rel (%p6942_p12) target bundleno = 3180 (0xc6c), region = 152 }
 0xc67   : > { %v6170_v36 = vadd.f32 %v6161_v3, %v6155_v11  ;;  %v6171_v59 = vadd.f32 %v6165_v26, %v6156_v28 }
 0xc69   : > { %6174 = vst [vmem:[#allocation3 + $0x8] sm:$0xff] %v6170_v36  ;;  %6175 = vst [vmem:[#allocation3 + $0x10] sm:$0xff] %v6171_v59 }
 0xc6a   : > { %6180 = vst [vmem:[#allocation19] sm:$0xff] %v6168_v25  ;;  %6181 = vst [vmem:[#allocation19 + $0x8] sm:$0xff] %v6169_v50 }
 0xc6b   : > { %6182 = vst [vmem:[#allocation19 + $0x10] sm:$0xff] %v6170_v36  ;;  %6183 = vst [vmem:[#allocation19 + $0x18] sm:$0xff] %v6171_v59 }
 0xc6c PF: > { %s9993_s13 = sld [smem:[#allocation30_spill]]  ;;  %s8423_s25 = smov [#allocation19]  }
 0xc6d   : > { %s6190_s17 = sshll.u32 %s8423_s25, 4  ;;  %s6191_s17 = int_to_ptr.vmem [resolvable:$true] %s6190_s17 }
 0xc6e   : > { %s8294_s15 = scalar_lea.vmem %s6191_s17, 512  ;;  %p8301_p0 = scmp.lt.s32.totalorder %s6191_s17, %s6191_s17 }
 0xc6f   : > { %p8295_p13 = scmp.ne.s32.totalorder %s6191_s17, %s8294_s15  ;;  %p8302_p5 = scmp.lt.s32.totalorder %s8294_s15, %s8294_s15 }
 0xc71   : > { %p8303_p6 = por %p8302_p5, %p8301_p0 }
 0xc72   : > { %p7292_p7 = scmp.eq.s32.totalorder %s9993_s13, 3 }
 0xc74   : > { %p8296_p3 = pnand %p8295_p13, %p7292_p7 }
 0xc76   : > { %p8297_p4 = pneg %p8296_p3 }
 0xc78   : > { %p8304_p8 = pnand %p8303_p6, %p8297_p4 }
 0xc7a   : > { %8307 = shalt.err (!%p8304_p8)
}
 0xc7b   : > { %s8424_s20 = smov 256   ;;  %s8425_s28 = smov 16  }
 0xc7c   : > { %s9994_s19 = sld [smem:[#allocation46_spill]] }
 0xc82   : > { %7246 = dma.vmem_to_hbm [thread:$0]  (%p7292_p7), %s6191_s17, 512, %s9994_s19, [#allocation6], %s8424_s20, %s8424_s20, %s8425_s28  }
 0xc83   : > { %8363 = dma.done.wait (%p7292_p7), [#allocation6], 512  }
 0xc84   : > { %8365 = vsyncadd (%p7292_p7), [#allocation6], 4294966784 }
 0xc85 PF: > { %s9995_s1 = sld [smem:[#allocation29_spill]]  ;;  %s10002_s24 = smov %s8388_s26 }
 0xc86   : > { %s9996_s21 = sld [smem:[#allocation24_spill]] }
 0xc87   : > { %s9997_s22 = sld [smem:[#allocation25_spill]] }
 0xc88   : > { %s9998_s23 = sld [smem:[#allocation33_spill]] }
 0xc89   : > { %s9999_s25 = sld [smem:[#allocation28_spill]] }
 0xc8a   : > { %s10000_s3 = sld [smem:[#allocation31_spill]] }
 0xc8b   : > { %s29_s28 = sadd.s32 1, %s9995_s1   ;;  %s10001_s27 = sld [smem:[#allocation32_spill]] }
 0xc8c   : > { %p26_p11 = scmp.ge.s32.totalorder %s29_s28, 6  }
 0xc8e   :  { %28 = sbr.rel (!%p26_p11) target bundleno = 18 (0x12), region = 253 }
 0xc90   : > { %s10003_s26 = smov %s10000_s3 }
 0xc93   :  { %6206 = vsyncpa [#allocation5], 1 }
 0xc94   :  { %6208 = vsyncpa [#allocation5 + $0x1], 1 }
 0xc95   :  { %6209 = vsyncpa [#allocation8], 1 }
 0xc96   :  { %6210 = vsyncpa [#allocation6], 1 }
 0xc97   :  { %6212 = vsyncpa [#allocation6 + $0x1], 1 }

</bundles_post_ra>
